<compile_context>
chip_gen: v6e
topology: v6e:2x2x1
jax: 0.10.0
libtpu: 0.0.40
codegen_flags: <defaults>
</compile_context>

<pallas_src>
import functools

import jax
import jax.numpy as jnp
from jax.experimental import pallas as pl
from jax.experimental.pallas import tpu as pltpu


LANE = 128     # TPU lane width: keep feature / hidden dims multiples of this
SUBLANE = 8


def _round_up(x, m):
    return ((x + m - 1) // m) * m


def _choose_tile(n):
    # 256/512 tiles feed the 2x256x256 MXUs of v6e/v7x fully and amortize the
    # ~0.35us per-grid-step overhead; fall back to 128 for tiny graphs so
    # padding stays small (also fine for v5e's 4x128x128 MXU).
    if n >= 2048:
        return 512
    if n >= 256:
        return 256
    return 128


# ----------------------------------------------------------------------------
# Pallas kernels
# ----------------------------------------------------------------------------
def _gin_layer_kernel(a_ref, x_ref, w1_ref, b1_ref, w2_ref, b2_ref, o_ref, acc_ref):
    """One GIN layer for one row tile of nodes.

    grid = (row_tiles "parallel", k_tiles "arbitrary"); the contraction over
    source nodes (k) is the last axis.  acc_ref accumulates A_hat_tile @ x_tile
    in f32; at the final k step the 2-layer MLP (Linear->ReLU->Linear->ReLU) is
    applied and the row tile of node embeddings is written (lane-dense).
    """
    k = pl.program_id(1)

    @pl.when(k == 0)
    def _init():
        acc_ref[...] = jnp.zeros_like(acc_ref)

    # aggregation: (1+eps)*x_i + sum_j w_ij * x_j  ==  A_hat @ x
    # A_hat / x are bf16 (exact for 0 / 1 / (1+eps) entries); accumulate in f32.
    acc_ref[...] += jnp.dot(a_ref[...], x_ref[...],
                            preferred_element_type=jnp.float32)

    @pl.when(k == pl.num_programs(1) - 1)
    def _mlp():
        # TODO(synk): the reference GIN MLP applies BatchNorm (running stats)
        # between the Linear and ReLU; running-stat BN is omitted here.
        h = jnp.dot(acc_ref[...].astype(jnp.bfloat16), w1_ref[...],
                    preferred_element_type=jnp.float32) + b1_ref[...]
        h = jnp.maximum(h, 0.0)
        h = jnp.dot(h.astype(jnp.bfloat16), w2_ref[...],
                    preferred_element_type=jnp.float32) + b2_ref[...]
        o_ref[...] = jnp.maximum(h, 0.0).astype(o_ref.dtype)


def _pool_proj_kernel(p_ref, h_ref, wp1_ref, bp1_ref, wp2_ref, bp2_ref, z_ref, acc_ref):
    """Global-add-pool + projection head, accumulated over node tiles."""
    k = pl.program_id(0)

    @pl.when(k == 0)
    def _init():
        acc_ref[...] = jnp.zeros_like(acc_ref)

    # pooled[g] += P[g, tile] @ node_emb[tile]  (P is 0/1, exact in bf16;
    # node_emb tile is cast to bf16 in-register for a single-pass MXU matmul,
    # the pooled sum itself accumulates in f32)
    acc_ref[...] += jnp.dot(p_ref[...], h_ref[...].astype(jnp.bfloat16),
                            preferred_element_type=jnp.float32)

    @pl.when(k == pl.num_programs(0) - 1)
    def _proj():
        z = jnp.dot(acc_ref[...].astype(jnp.bfloat16), wp1_ref[...],
                    preferred_element_type=jnp.float32) + bp1_ref[...]
        z = jnp.maximum(z, 0.0)
        z = jnp.dot(z.astype(jnp.bfloat16), wp2_ref[...],
                    preferred_element_type=jnp.float32) + bp2_ref[...]
        z_ref[...] = z.astype(z_ref.dtype)


# ----------------------------------------------------------------------------
# pallas_call wrappers
# ----------------------------------------------------------------------------
def gin_layer(a_hat, x, w1, b1, w2, b2, *, out_dtype, tile_m, tile_k):
    n_pad = a_hat.shape[0]
    f_in = x.shape[1]
    f_out = w2.shape[1]
    w1 = w1.astype(jnp.bfloat16)
    w2 = w2.astype(jnp.bfloat16)
    grid = (n_pad // tile_m, n_pad // tile_k)
    return pl.pallas_call(
        _gin_layer_kernel,
        out_shape=jax.ShapeDtypeStruct((n_pad, f_out), out_dtype),
        grid=grid,
        in_specs=[
            pl.BlockSpec((tile_m, tile_k), lambda i, k: (i, k)),   # A_hat tile
            pl.BlockSpec((tile_k, f_in), lambda i, k: (k, 0)),     # x tile
            pl.BlockSpec((f_in, f_out), lambda i, k: (0, 0)),      # W1 (resident)
            pl.BlockSpec((1, f_out), lambda i, k: (0, 0)),         # b1
            pl.BlockSpec((f_out, f_out), lambda i, k: (0, 0)),     # W2
            pl.BlockSpec((1, f_out), lambda i, k: (0, 0)),         # b2
        ],
        out_specs=pl.BlockSpec((tile_m, f_out), lambda i, k: (i, 0)),
        scratch_shapes=[pltpu.VMEM((tile_m, f_in), jnp.float32)],
        compiler_params=pltpu.CompilerParams(
            dimension_semantics=("parallel", "arbitrary"),   # rows shard across TCs (v7x)
            vmem_limit_bytes=32 << 20,                       # fits v5e/v6e/v7x scoped VMEM
        ),
    )(a_hat, x, w1, b1, w2, b2)


def pool_and_project(pool_mat, node_emb, wp1, bp1, wp2, bp2, *, tile_k):
    g_pad, n_pad = pool_mat.shape
    emb = node_emb.shape[1]
    proj = wp2.shape[1]
    wp1 = wp1.astype(jnp.bfloat16)
    wp2 = wp2.astype(jnp.bfloat16)
    grid = (n_pad // tile_k,)
    return pl.pallas_call(
        _pool_proj_kernel,
        out_shape=jax.ShapeDtypeStruct((g_pad, proj), jnp.float32),
        grid=grid,
        in_specs=[
            pl.BlockSpec((g_pad, tile_k), lambda k: (0, k)),   # pooling matrix tile (bf16)
            pl.BlockSpec((tile_k, emb), lambda k: (k, 0)),     # node-embedding tile (f32)
            pl.BlockSpec((emb, proj), lambda k: (0, 0)),       # proj W1
            pl.BlockSpec((1, proj), lambda k: (0, 0)),         # proj b1
            pl.BlockSpec((proj, proj), lambda k: (0, 0)),      # proj W2
            pl.BlockSpec((1, proj), lambda k: (0, 0)),         # proj b2
        ],
        out_specs=pl.BlockSpec((g_pad, proj), lambda k: (0, 0)),
        scratch_shapes=[pltpu.VMEM((g_pad, emb), jnp.float32)],
        compiler_params=pltpu.CompilerParams(
            dimension_semantics=("arbitrary",),
            vmem_limit_bytes=32 << 20,
        ),
    )(pool_mat, node_emb, wp1, bp1, wp2, bp2)


# ----------------------------------------------------------------------------
# Parameter init (deterministic, matches init_emb: xavier_uniform W, zero bias)
# ----------------------------------------------------------------------------
def xavier_uniform(key, fan_in, fan_out):
    bound = jnp.sqrt(6.0 / (fan_in + fan_out))
    # stored as [in, out] so the kernel computes x @ W (== torch x @ W.T)
    return jax.random.uniform(key, (fan_in, fan_out), jnp.float32, -bound, bound)


def make_params(key, in_dim, emb_dim, proj_hidden_dim):
    assert emb_dim % LANE == 0 and proj_hidden_dim % LANE == 0, "keep hidden dims lane-dense"
    in_pad = _round_up(in_dim, LANE)
    ks = jax.random.split(key, 6)
    # Layer-1 W1 is zero-padded on its input rows so zero-padded input features
    # contribute exactly nothing (numerically identical to the unpadded matmul).
    l1_w1 = jnp.zeros((in_pad, emb_dim), jnp.float32).at[:in_dim].set(
        xavier_uniform(ks[0], in_dim, emb_dim))
    return {
        # GIN layer 1 MLP: Linear(in, emb) -> ReLU -> Linear(emb, emb) -> ReLU
        "l1_w1": l1_w1,
        "l1_b1": jnp.zeros((1, emb_dim), jnp.float32),
        "l1_w2": xavier_uniform(ks[1], emb_dim, emb_dim),
        "l1_b2": jnp.zeros((1, emb_dim), jnp.float32),
        # GIN layer 2 MLP
        "l2_w1": xavier_uniform(ks[2], emb_dim, emb_dim),
        "l2_b1": jnp.zeros((1, emb_dim), jnp.float32),
        "l2_w2": xavier_uniform(ks[3], emb_dim, emb_dim),
        "l2_b2": jnp.zeros((1, emb_dim), jnp.float32),
        # proj_head: Linear(emb, proj) -> ReLU -> Linear(proj, proj)
        "p_w1": xavier_uniform(ks[4], emb_dim, proj_hidden_dim),
        "p_b1": jnp.zeros((1, proj_hidden_dim), jnp.float32),
        "p_w2": xavier_uniform(ks[5], proj_hidden_dim, proj_hidden_dim),
        "p_b2": jnp.zeros((1, proj_hidden_dim), jnp.float32),
    }


# ----------------------------------------------------------------------------
# Forward (glue in plain JAX: padded dense adjacency / pooling matrix)
# ----------------------------------------------------------------------------
@functools.partial(jax.jit, static_argnames=("num_graphs",))
def ginfominmax_forward(params, batch, x, edge_index, num_graphs,
                        edge_weight=None, eps=0.0):
    n, f_in = x.shape
    if edge_weight is None:
        edge_weight = jnp.ones((edge_index.shape[1],), jnp.float32)

    tile = _choose_tile(n)
    n_pad = _round_up(n, tile)
    f_pad = _round_up(f_in, LANE)
    g_pad = _round_up(num_graphs, SUBLANE)

    src, dst = edge_index[0], edge_index[1]

    # Dense adjacency with the GIN self term folded in:
    #   A_hat[dst, src] += w ; diagonal += 1 + eps.
    # Padded nodes have all-zero feature rows and zero pooling weight, so the
    # extra diagonal entries / rows never influence real nodes.
    # TODO(synk): for large sparse graphs, build A_hat blockwise from a
    # scalar-prefetched edge list instead of materializing the dense [N,N].
    diag = jnp.arange(n_pad, dtype=jnp.int32)
    a_hat = (jnp.zeros((n_pad, n_pad), jnp.float32)
             .at[dst, src].add(edge_weight)
             .at[diag, diag].add(1.0 + eps)
             ).astype(jnp.bfloat16)

    # zero-pad node features to [n_pad, f_pad]; bf16 feeds the MXU aggregation
    x_p = jnp.zeros((n_pad, f_pad), jnp.float32).at[:n, :f_in].set(x).astype(jnp.bfloat16)

    # encoder: two GIN layers (tiled Pallas kernels).  Layer-1 output stays bf16
    # (halves HBM traffic into layer 2); layer-2 output is the f32 node_emb.
    h1 = gin_layer(a_hat, x_p,
                   params["l1_w1"], params["l1_b1"], params["l1_w2"], params["l1_b2"],
                   out_dtype=jnp.bfloat16, tile_m=tile, tile_k=tile)
    node_emb_p = gin_layer(a_hat, h1,
                           params["l2_w1"], params["l2_b1"], params["l2_w2"], params["l2_b2"],
                           out_dtype=jnp.float32, tile_m=tile, tile_k=tile)

    # global-add-pool matrix P[g, n] = 1 iff batch[n] == g (padded nodes masked out)
    batch_p = jnp.full((n_pad,), -1, jnp.int32).at[:n].set(batch.astype(jnp.int32))
    pool_mat = (batch_p[None, :] ==
                jnp.arange(g_pad, dtype=jnp.int32)[:, None]).astype(jnp.bfloat16)

    # pooling + proj_head (Pallas)
    z_p = pool_and_project(pool_mat, node_emb_p,
                           params["p_w1"], params["p_b1"],
                           params["p_w2"], params["p_b2"],
                           tile_k=tile)

    return z_p[:num_graphs], node_emb_p[:n]


# ----------------------------------------------------------------------------
# Pure-JAX f32 reference (same math, no padding / no bf16) for validation
# ----------------------------------------------------------------------------
def reference_forward(params, batch, x, edge_index, num_graphs,
                      edge_weight=None, eps=0.0):
    n, f_in = x.shape
    if edge_weight is None:
        edge_weight = jnp.ones((edge_index.shape[1],), jnp.float32)
    a = (jnp.zeros((n, n), jnp.float32)
         .at[edge_index[1], edge_index[0]].add(edge_weight)
         .at[jnp.arange(n), jnp.arange(n)].add(1.0 + eps))

    h = a @ x
    h = jnp.maximum(h @ params["l1_w1"][:f_in] + params["l1_b1"], 0.0)
    h = jnp.maximum(h @ params["l1_w2"] + params["l1_b2"], 0.0)
    h = a @ h
    h = jnp.maximum(h @ params["l2_w1"] + params["l2_b1"], 0.0)
    node_emb = jnp.maximum(h @ params["l2_w2"] + params["l2_b2"], 0.0)

    pool = (batch[None, :] == jnp.arange(num_graphs)[:, None]).astype(jnp.float32)
    z = pool @ node_emb
    z = jnp.maximum(z @ params["p_w1"] + params["p_b1"], 0.0)
    z = z @ params["p_w2"] + params["p_b2"]
    return z, node_emb


# ----------------------------------------------------------------------------
# Main
# ----------------------------------------------------------------------------
if __name__ == "__main__":
    key = jax.random.PRNGKey(0)
    k_x, k_params = jax.random.split(key)

    # synthetic graph batch: 4 graphs x 96 nodes = 384 nodes -> padded to 512
    # -> 2x2 tile grid on the aggregation matmul (exercises the pipelined path)
    NUM_GRAPHS, N_PER_GRAPH = 4, 96
    N = NUM_GRAPHS * N_PER_GRAPH
    IN_DIM, EMB_DIM, PROJ_DIM = 16, 128, 128

    batch = jnp.repeat(jnp.arange(NUM_GRAPHS, dtype=jnp.int32), N_PER_GRAPH)
    x = jax.random.normal(k_x, (N, IN_DIM), jnp.float32)

    # bidirectional ring within each graph
    src_list, dst_list = [], []
    for g in range(NUM_GRAPHS):
        base = g * N_PER_GRAPH
        for i in range(N_PER_GRAPH):
            a_node = base + i
            b_node = base + (i + 1) % N_PER_GRAPH
            src_list += [a_node, b_node]
            dst_list += [b_node, a_node]
    edge_index = jnp.array([src_list, dst_list], dtype=jnp.int32)
    edge_weight = None    # -> all ones (edge_attr is unused by the reference forward)

    params = make_params(k_params, IN_DIM, EMB_DIM, PROJ_DIM)

    z, node_emb = ginfominmax_forward(params, batch, x, edge_index,
                                      num_graphs=NUM_GRAPHS, edge_weight=edge_weight)
    jax.block_until_ready((z, node_emb))

    assert z.shape == (NUM_GRAPHS, PROJ_DIM) and z.dtype == jnp.float32
    assert node_emb.shape == (N, EMB_DIM) and node_emb.dtype == jnp.float32
    assert bool(jnp.all(jnp.isfinite(z))) and bool(jnp.all(jnp.isfinite(node_emb)))

    # correctness vs. full-f32 reference (bf16 streaming -> loose tolerance)
    z_ref, node_emb_ref = reference_forward(params, batch, x, edge_index,
                                            num_graphs=NUM_GRAPHS,
                                            edge_weight=edge_weight)
    assert bool(jnp.allclose(node_emb, node_emb_ref, rtol=8e-2, atol=8e-2)), \
        "node_emb mismatch vs. f32 reference"
    assert bool(jnp.allclose(z, z_ref, rtol=8e-2, atol=1.0)), \
        "z mismatch vs. f32 reference"

    print("KERNEL_OK")
</pallas_src>

<mosaic_0001>
module attributes {stable_mosaic.version = 11 : i64} {
  func.func private @main(%arg0: i32) attributes {dimension_semantics = [#tpu.dimension_semantics<core_parallel>], iteration_bounds = array<i64: 2>, tpu.core_type = #tpu.core_type<sc_scalar_subcore>, window_params = []} {
    return
  }
}

module attributes {stable_mosaic.version = 11 : i64} {
  func.func private @main(%arg0: i32) attributes {dimension_semantics = [#tpu.dimension_semantics<core_parallel>], iteration_bounds = array<i64: 2>, tpu.core_type = #tpu.core_type<sc_scalar_subcore>, window_params = []} {
    return
  }
}

module attributes {stable_mosaic.version = 11 : i64} {
  func.func @_gin_layer_kernel(%arg0: i32, %arg1: i32, %arg2: memref<256x256xbf16, #tpu.memory_space<vmem>>, %arg3: memref<256x128xbf16, #tpu.memory_space<vmem>>, %arg4: memref<128x128xbf16, #tpu.memory_space<vmem>>, %arg5: memref<1x128xf32, #tpu.memory_space<vmem>>, %arg6: memref<128x128xbf16, #tpu.memory_space<vmem>>, %arg7: memref<1x128xf32, #tpu.memory_space<vmem>>, %arg8: memref<256x128xbf16, #tpu.memory_space<vmem>>, %arg9: memref<256x128xf32, #tpu.memory_space<vmem>>) attributes {dimension_semantics = [#tpu.dimension_semantics<parallel>, #tpu.dimension_semantics<arbitrary>], iteration_bounds = array<i64: 2, 2>, scalar_prefetch = 0 : i64, scratch_operands = 1 : i64, tpu.core_type = #tpu.core_type<tc>, window_params = [{transform_indices = @transform_0, window_bounds = array<i64: 256, 256>}, {transform_indices = @transform_1, window_bounds = array<i64: 256, 128>}, {pipeline_mode = #tpu.pipeline_mode<synchronous>, transform_indices = @transform_2, window_bounds = array<i64: 128, 128>}, {pipeline_mode = #tpu.pipeline_mode<synchronous>, transform_indices = @transform_3, window_bounds = array<i64: 1, 128>}, {pipeline_mode = #tpu.pipeline_mode<synchronous>, transform_indices = @transform_4, window_bounds = array<i64: 128, 128>}, {pipeline_mode = #tpu.pipeline_mode<synchronous>, transform_indices = @transform_5, window_bounds = array<i64: 1, 128>}, {transform_indices = @transform_6, window_bounds = array<i64: 256, 128>}]} {
    %c0_i32 = arith.constant 0 : i32
    %0 = arith.cmpi eq, %arg1, %c0_i32 : i32
    %1 = arith.extui %0 : i1 to i32
    %c0_i32_0 = arith.constant 0 : i32
    %2 = arith.cmpi ne, %1, %c0_i32_0 : i32
    scf.if %2 {
      %cst_9 = arith.constant 0.000000e+00 : f32
      %12 = vector.broadcast %cst_9 : f32 to vector<256x128xf32>
      %c0_10 = arith.constant 0 : index
      %c0_11 = arith.constant 0 : index
      %13 = vector.load %arg9[%c0_10, %c0_11] : memref<256x128xf32, #tpu.memory_space<vmem>>, vector<256x128xf32>
      tpu.vector_store %arg9[%c0_10, %c0_11], %12 {strides = array<i32>} : memref<256x128xf32, #tpu.memory_space<vmem>>, vector<256x128xf32>,
    } else {
    }
    %c0 = arith.constant 0 : index
    %c0_1 = arith.constant 0 : index
    %3 = vector.load %arg9[%c0, %c0_1] : memref<256x128xf32, #tpu.memory_space<vmem>>, vector<256x128xf32>
    %c0_2 = arith.constant 0 : index
    %c0_3 = arith.constant 0 : index
    %4 = vector.load %arg2[%c0_2, %c0_3] : memref<256x256xbf16, #tpu.memory_space<vmem>>, vector<256x256xbf16>
    %c0_4 = arith.constant 0 : index
    %c0_5 = arith.constant 0 : index
    %5 = vector.load %arg3[%c0_4, %c0_5] : memref<256x128xbf16, #tpu.memory_space<vmem>>, vector<256x128xbf16>
    %cst = arith.constant dense<0.000000e+00> : vector<256x128xf32>
    %6 = tpu.matmul %4, %5, %cst {dimension_numbers = #tpu.dot_dimension_numbers<[1], [0], [0], [1], [0, 0, 1, 1], [], []>} : vector<256x256xbf16>, vector<256x128xbf16>, vector<256x128xf32> -> vector<256x128xf32>
    %7 = arith.addf %3, %6 : vector<256x128xf32>
    %c0_6 = arith.constant 0 : index
    %c0_7 = arith.constant 0 : index
    %8 = vector.load %arg9[%c0_6, %c0_7] : memref<256x128xf32, #tpu.memory_space<vmem>>, vector<256x128xf32>
    tpu.vector_store %arg9[%c0_6, %c0_7], %7 {strides = array<i32>} : memref<256x128xf32, #tpu.memory_space<vmem>>, vector<256x128xf32>,
    %c1_i32 = arith.constant 1 : i32
    %9 = arith.cmpi eq, %arg1, %c1_i32 : i32
    %10 = arith.extui %9 : i1 to i32
    %c0_i32_8 = arith.constant 0 : i32
    %11 = arith.cmpi ne, %10, %c0_i32_8 : i32
    scf.if %11 {
      %c0_9 = arith.constant 0 : index
      %c0_10 = arith.constant 0 : index
      %12 = vector.load %arg9[%c0_9, %c0_10] : memref<256x128xf32, #tpu.memory_space<vmem>>, vector<256x128xf32>
      %13 = arith.truncf %12 : vector<256x128xf32> to vector<256x128xbf16>
      %c0_11 = arith.constant 0 : index
      %c0_12 = arith.constant 0 : index
      %14 = vector.load %arg4[%c0_11, %c0_12] : memref<128x128xbf16, #tpu.memory_space<vmem>>, vector<128x128xbf16>
      %cst_13 = arith.constant dense<0.000000e+00> : vector<256x128xf32>
      %15 = tpu.matmul %13, %14, %cst_13 {dimension_numbers = #tpu.dot_dimension_numbers<[1], [0], [0], [1], [0, 0, 1, 1], [], []>} : vector<256x128xbf16>, vector<128x128xbf16>, vector<256x128xf32> -> vector<256x128xf32>
      %c0_14 = arith.constant 0 : index
      %c0_15 = arith.constant 0 : index
      %16 = vector.load %arg5[%c0_14, %c0_15] : memref<1x128xf32, #tpu.memory_space<vmem>>, vector<1x128xf32>
      %17 = vector.broadcast %16 : vector<1x128xf32> to vector<256x128xf32>
      %18 = arith.addf %15, %17 : vector<256x128xf32>
      %cst_16 = arith.constant 0.000000e+00 : f32
      %19 = vector.broadcast %cst_16 : f32 to vector<256x128xf32>
      %20 = arith.maximumf %18, %19 : vector<256x128xf32>
      %21 = arith.truncf %20 : vector<256x128xf32> to vector<256x128xbf16>
      %c0_17 = arith.constant 0 : index
      %c0_18 = arith.constant 0 : index
      %22 = vector.load %arg6[%c0_17, %c0_18] : memref<128x128xbf16, #tpu.memory_space<vmem>>, vector<128x128xbf16>
      %cst_19 = arith.constant dense<0.000000e+00> : vector<256x128xf32>
      %23 = tpu.matmul %21, %22, %cst_19 {dimension_numbers = #tpu.dot_dimension_numbers<[1], [0], [0], [1], [0, 0, 1, 1], [], []>} : vector<256x128xbf16>, vector<128x128xbf16>, vector<256x128xf32> -> vector<256x128xf32>
      %c0_20 = arith.constant 0 : index
      %c0_21 = arith.constant 0 : index
      %24 = vector.load %arg7[%c0_20, %c0_21] : memref<1x128xf32, #tpu.memory_space<vmem>>, vector<1x128xf32>
      %25 = vector.broadcast %24 : vector<1x128xf32> to vector<256x128xf32>
      %26 = arith.addf %23, %25 : vector<256x128xf32>
      %cst_22 = arith.constant 0.000000e+00 : f32
      %27 = vector.broadcast %cst_22 : f32 to vector<256x128xf32>
      %28 = arith.maximumf %26, %27 : vector<256x128xf32>
      %29 = arith.truncf %28 : vector<256x128xf32> to vector<256x128xbf16>
      %c0_23 = arith.constant 0 : index
      %c0_24 = arith.constant 0 : index
      %30 = vector.load %arg8[%c0_23, %c0_24] : memref<256x128xbf16, #tpu.memory_space<vmem>>, vector<256x128xbf16>
      tpu.vector_store %arg8[%c0_23, %c0_24], %29 {strides = array<i32>} : memref<256x128xbf16, #tpu.memory_space<vmem>>, vector<256x128xbf16>,
    } else {
    }
    return
  }
  func.func @transform_0(%arg0: i32, %arg1: i32) -> (i32, i32) {
    %c0_i32 = arith.constant 0 : i32
    return %arg0, %arg1 : i32, i32
  }
  func.func @transform_1(%arg0: i32, %arg1: i32) -> (i32, i32) {
    %c0_i32 = arith.constant 0 : i32
    %c0_i32_0 = arith.constant 0 : i32
    return %arg1, %c0_i32 : i32, i32
  }
  func.func @transform_2(%arg0: i32, %arg1: i32) -> (i32, i32) {
    %c0_i32 = arith.constant 0 : i32
    %c0_i32_0 = arith.constant 0 : i32
    %c0_i32_1 = arith.constant 0 : i32
    return %c0_i32, %c0_i32_0 : i32, i32
  }
  func.func @transform_3(%arg0: i32, %arg1: i32) -> (i32, i32) {
    %c0_i32 = arith.constant 0 : i32
    %c0_i32_0 = arith.constant 0 : i32
    %c0_i32_1 = arith.constant 0 : i32
    return %c0_i32, %c0_i32_0 : i32, i32
  }
  func.func @transform_4(%arg0: i32, %arg1: i32) -> (i32, i32) {
    %c0_i32 = arith.constant 0 : i32
    %c0_i32_0 = arith.constant 0 : i32
    %c0_i32_1 = arith.constant 0 : i32
    return %c0_i32, %c0_i32_0 : i32, i32
  }
  func.func @transform_5(%arg0: i32, %arg1: i32) -> (i32, i32) {
    %c0_i32 = arith.constant 0 : i32
    %c0_i32_0 = arith.constant 0 : i32
    %c0_i32_1 = arith.constant 0 : i32
    return %c0_i32, %c0_i32_0 : i32, i32
  }
  func.func @transform_6(%arg0: i32, %arg1: i32) -> (i32, i32) {
    %c0_i32 = arith.constant 0 : i32
    %c0_i32_0 = arith.constant 0 : i32
    return %arg0, %c0_i32 : i32, i32
  }
}

module attributes {stable_mosaic.version = 11 : i64} {
  func.func @_pool_proj_kernel(%arg0: i32, %arg1: memref<8x256xbf16, #tpu.memory_space<vmem>>, %arg2: memref<256x128xf32, #tpu.memory_space<vmem>>, %arg3: memref<128x128xbf16, #tpu.memory_space<vmem>>, %arg4: memref<1x128xf32, #tpu.memory_space<vmem>>, %arg5: memref<128x128xbf16, #tpu.memory_space<vmem>>, %arg6: memref<1x128xf32, #tpu.memory_space<vmem>>, %arg7: memref<8x128xf32, #tpu.memory_space<vmem>>, %arg8: memref<8x128xf32, #tpu.memory_space<vmem>>) attributes {dimension_semantics = [#tpu.dimension_semantics<arbitrary>], iteration_bounds = array<i64: 2>, scalar_prefetch = 0 : i64, scratch_operands = 1 : i64, tpu.core_type = #tpu.core_type<tc>, window_params = [{transform_indices = @transform_0, window_bounds = array<i64: 8, 256>}, {transform_indices = @transform_1, window_bounds = array<i64: 256, 128>}, {pipeline_mode = #tpu.pipeline_mode<synchronous>, transform_indices = @transform_2, window_bounds = array<i64: 128, 128>}, {pipeline_mode = #tpu.pipeline_mode<synchronous>, transform_indices = @transform_3, window_bounds = array<i64: 1, 128>}, {pipeline_mode = #tpu.pipeline_mode<synchronous>, transform_indices = @transform_4, window_bounds = array<i64: 128, 128>}, {pipeline_mode = #tpu.pipeline_mode<synchronous>, transform_indices = @transform_5, window_bounds = array<i64: 1, 128>}, {pipeline_mode = #tpu.pipeline_mode<synchronous>, transform_indices = @transform_6, window_bounds = array<i64: 8, 128>}]} {
    %c0_i32 = arith.constant 0 : i32
    %0 = arith.cmpi eq, %arg0, %c0_i32 : i32
    %1 = arith.extui %0 : i1 to i32
    %c0_i32_0 = arith.constant 0 : i32
    %2 = arith.cmpi ne, %1, %c0_i32_0 : i32
    scf.if %2 {
      %cst_9 = arith.constant 0.000000e+00 : f32
      %13 = vector.broadcast %cst_9 : f32 to vector<8x128xf32>
      %c0_10 = arith.constant 0 : index
      %c0_11 = arith.constant 0 : index
      %14 = vector.load %arg8[%c0_10, %c0_11] : memref<8x128xf32, #tpu.memory_space<vmem>>, vector<8x128xf32>
      tpu.vector_store %arg8[%c0_10, %c0_11], %13 {strides = array<i32>} : memref<8x128xf32, #tpu.memory_space<vmem>>, vector<8x128xf32>,
    } else {
    }
    %c0 = arith.constant 0 : index
    %c0_1 = arith.constant 0 : index
    %3 = vector.load %arg8[%c0, %c0_1] : memref<8x128xf32, #tpu.memory_space<vmem>>, vector<8x128xf32>
    %c0_2 = arith.constant 0 : index
    %c0_3 = arith.constant 0 : index
    %4 = vector.load %arg1[%c0_2, %c0_3] : memref<8x256xbf16, #tpu.memory_space<vmem>>, vector<8x256xbf16>
    %c0_4 = arith.constant 0 : index
    %c0_5 = arith.constant 0 : index
    %5 = vector.load %arg2[%c0_4, %c0_5] : memref<256x128xf32, #tpu.memory_space<vmem>>, vector<256x128xf32>
    %6 = arith.truncf %5 : vector<256x128xf32> to vector<256x128xbf16>
    %cst = arith.constant dense<0.000000e+00> : vector<8x128xf32>
    %7 = tpu.matmul %4, %6, %cst {dimension_numbers = #tpu.dot_dimension_numbers<[1], [0], [0], [1], [0, 0, 1, 1], [], []>} : vector<8x256xbf16>, vector<256x128xbf16>, vector<8x128xf32> -> vector<8x128xf32>
    %8 = arith.addf %3, %7 : vector<8x128xf32>
    %c0_6 = arith.constant 0 : index
    %c0_7 = arith.constant 0 : index
    %9 = vector.load %arg8[%c0_6, %c0_7] : memref<8x128xf32, #tpu.memory_space<vmem>>, vector<8x128xf32>
    tpu.vector_store %arg8[%c0_6, %c0_7], %8 {strides = array<i32>} : memref<8x128xf32, #tpu.memory_space<vmem>>, vector<8x128xf32>,
    %c1_i32 = arith.constant 1 : i32
    %10 = arith.cmpi eq, %arg0, %c1_i32 : i32
    %11 = arith.extui %10 : i1 to i32
    %c0_i32_8 = arith.constant 0 : i32
    %12 = arith.cmpi ne, %11, %c0_i32_8 : i32
    scf.if %12 {
      %c0_9 = arith.constant 0 : index
      %c0_10 = arith.constant 0 : index
      %13 = vector.load %arg8[%c0_9, %c0_10] : memref<8x128xf32, #tpu.memory_space<vmem>>, vector<8x128xf32>
      %14 = arith.truncf %13 : vector<8x128xf32> to vector<8x128xbf16>
      %c0_11 = arith.constant 0 : index
      %c0_12 = arith.constant 0 : index
      %15 = vector.load %arg3[%c0_11, %c0_12] : memref<128x128xbf16, #tpu.memory_space<vmem>>, vector<128x128xbf16>
      %cst_13 = arith.constant dense<0.000000e+00> : vector<8x128xf32>
      %16 = tpu.matmul %14, %15, %cst_13 {dimension_numbers = #tpu.dot_dimension_numbers<[1], [0], [0], [1], [0, 0, 1, 1], [], []>} : vector<8x128xbf16>, vector<128x128xbf16>, vector<8x128xf32> -> vector<8x128xf32>
      %c0_14 = arith.constant 0 : index
      %c0_15 = arith.constant 0 : index
      %17 = vector.load %arg4[%c0_14, %c0_15] : memref<1x128xf32, #tpu.memory_space<vmem>>, vector<1x128xf32>
      %18 = vector.broadcast %17 : vector<1x128xf32> to vector<8x128xf32>
      %19 = arith.addf %16, %18 : vector<8x128xf32>
      %cst_16 = arith.constant 0.000000e+00 : f32
      %20 = vector.broadcast %cst_16 : f32 to vector<8x128xf32>
      %21 = arith.maximumf %19, %20 : vector<8x128xf32>
      %22 = arith.truncf %21 : vector<8x128xf32> to vector<8x128xbf16>
      %c0_17 = arith.constant 0 : index
      %c0_18 = arith.constant 0 : index
      %23 = vector.load %arg5[%c0_17, %c0_18] : memref<128x128xbf16, #tpu.memory_space<vmem>>, vector<128x128xbf16>
      %cst_19 = arith.constant dense<0.000000e+00> : vector<8x128xf32>
      %24 = tpu.matmul %22, %23, %cst_19 {dimension_numbers = #tpu.dot_dimension_numbers<[1], [0], [0], [1], [0, 0, 1, 1], [], []>} : vector<8x128xbf16>, vector<128x128xbf16>, vector<8x128xf32> -> vector<8x128xf32>
      %c0_20 = arith.constant 0 : index
      %c0_21 = arith.constant 0 : index
      %25 = vector.load %arg6[%c0_20, %c0_21] : memref<1x128xf32, #tpu.memory_space<vmem>>, vector<1x128xf32>
      %26 = vector.broadcast %25 : vector<1x128xf32> to vector<8x128xf32>
      %27 = arith.addf %24, %26 : vector<8x128xf32>
      %c0_22 = arith.constant 0 : index
      %c0_23 = arith.constant 0 : index
      %28 = vector.load %arg7[%c0_22, %c0_23] : memref<8x128xf32, #tpu.memory_space<vmem>>, vector<8x128xf32>
      tpu.vector_store %arg7[%c0_22, %c0_23], %27 {strides = array<i32>} : memref<8x128xf32, #tpu.memory_space<vmem>>, vector<8x128xf32>,
    } else {
    }
    return
  }
  func.func @transform_0(%arg0: i32) -> (i32, i32) {
    %c0_i32 = arith.constant 0 : i32
    %c0_i32_0 = arith.constant 0 : i32
    return %c0_i32, %arg0 : i32, i32
  }
  func.func @transform_1(%arg0: i32) -> (i32, i32) {
    %c0_i32 = arith.constant 0 : i32
    %c0_i32_0 = arith.constant 0 : i32
    return %arg0, %c0_i32 : i32, i32
  }
  func.func @transform_2(%arg0: i32) -> (i32, i32) {
    %c0_i32 = arith.constant 0 : i32
    %c0_i32_0 = arith.constant 0 : i32
    %c0_i32_1 = arith.constant 0 : i32
    return %c0_i32, %c0_i32_0 : i32, i32
  }
  func.func @transform_3(%arg0: i32) -> (i32, i32) {
    %c0_i32 = arith.constant 0 : i32
    %c0_i32_0 = arith.constant 0 : i32
    %c0_i32_1 = arith.constant 0 : i32
    return %c0_i32, %c0_i32_0 : i32, i32
  }
  func.func @transform_4(%arg0: i32) -> (i32, i32) {
    %c0_i32 = arith.constant 0 : i32
    %c0_i32_0 = arith.constant 0 : i32
    %c0_i32_1 = arith.constant 0 : i32
    return %c0_i32, %c0_i32_0 : i32, i32
  }
  func.func @transform_5(%arg0: i32) -> (i32, i32) {
    %c0_i32 = arith.constant 0 : i32
    %c0_i32_0 = arith.constant 0 : i32
    %c0_i32_1 = arith.constant 0 : i32
    return %c0_i32, %c0_i32_0 : i32, i32
  }
  func.func @transform_6(%arg0: i32) -> (i32, i32) {
    %c0_i32 = arith.constant 0 : i32
    %c0_i32_0 = arith.constant 0 : i32
    %c0_i32_1 = arith.constant 0 : i32
    return %c0_i32, %c0_i32_0 : i32, i32
  }
}

module attributes {stable_mosaic.version = 11 : i64} {
  func.func @_gin_layer_kernel(%arg0: i32, %arg1: i32, %arg2: memref<256x256xbf16, #tpu.memory_space<vmem>>, %arg3: memref<256x128xbf16, #tpu.memory_space<vmem>>, %arg4: memref<128x128xbf16, #tpu.memory_space<vmem>>, %arg5: memref<1x128xf32, #tpu.memory_space<vmem>>, %arg6: memref<128x128xbf16, #tpu.memory_space<vmem>>, %arg7: memref<1x128xf32, #tpu.memory_space<vmem>>, %arg8: memref<256x128xf32, #tpu.memory_space<vmem>>, %arg9: memref<256x128xf32, #tpu.memory_space<vmem>>) attributes {dimension_semantics = [#tpu.dimension_semantics<parallel>, #tpu.dimension_semantics<arbitrary>], iteration_bounds = array<i64: 2, 2>, scalar_prefetch = 0 : i64, scratch_operands = 1 : i64, tpu.core_type = #tpu.core_type<tc>, window_params = [{transform_indices = @transform_0, window_bounds = array<i64: 256, 256>}, {transform_indices = @transform_1, window_bounds = array<i64: 256, 128>}, {pipeline_mode = #tpu.pipeline_mode<synchronous>, transform_indices = @transform_2, window_bounds = array<i64: 128, 128>}, {pipeline_mode = #tpu.pipeline_mode<synchronous>, transform_indices = @transform_3, window_bounds = array<i64: 1, 128>}, {pipeline_mode = #tpu.pipeline_mode<synchronous>, transform_indices = @transform_4, window_bounds = array<i64: 128, 128>}, {pipeline_mode = #tpu.pipeline_mode<synchronous>, transform_indices = @transform_5, window_bounds = array<i64: 1, 128>}, {transform_indices = @transform_6, window_bounds = array<i64: 256, 128>}]} {
    %c0_i32 = arith.constant 0 : i32
    %0 = arith.cmpi eq, %arg1, %c0_i32 : i32
    %1 = arith.extui %0 : i1 to i32
    %c0_i32_0 = arith.constant 0 : i32
    %2 = arith.cmpi ne, %1, %c0_i32_0 : i32
    scf.if %2 {
      %cst_9 = arith.constant 0.000000e+00 : f32
      %12 = vector.broadcast %cst_9 : f32 to vector<256x128xf32>
      %c0_10 = arith.constant 0 : index
      %c0_11 = arith.constant 0 : index
      %13 = vector.load %arg9[%c0_10, %c0_11] : memref<256x128xf32, #tpu.memory_space<vmem>>, vector<256x128xf32>
      tpu.vector_store %arg9[%c0_10, %c0_11], %12 {strides = array<i32>} : memref<256x128xf32, #tpu.memory_space<vmem>>, vector<256x128xf32>,
    } else {
    }
    %c0 = arith.constant 0 : index
    %c0_1 = arith.constant 0 : index
    %3 = vector.load %arg9[%c0, %c0_1] : memref<256x128xf32, #tpu.memory_space<vmem>>, vector<256x128xf32>
    %c0_2 = arith.constant 0 : index
    %c0_3 = arith.constant 0 : index
    %4 = vector.load %arg2[%c0_2, %c0_3] : memref<256x256xbf16, #tpu.memory_space<vmem>>, vector<256x256xbf16>
    %c0_4 = arith.constant 0 : index
    %c0_5 = arith.constant 0 : index
    %5 = vector.load %arg3[%c0_4, %c0_5] : memref<256x128xbf16, #tpu.memory_space<vmem>>, vector<256x128xbf16>
    %cst = arith.constant dense<0.000000e+00> : vector<256x128xf32>
    %6 = tpu.matmul %4, %5, %cst {dimension_numbers = #tpu.dot_dimension_numbers<[1], [0], [0], [1], [0, 0, 1, 1], [], []>} : vector<256x256xbf16>, vector<256x128xbf16>, vector<256x128xf32> -> vector<256x128xf32>
    %7 = arith.addf %3, %6 : vector<256x128xf32>
    %c0_6 = arith.constant 0 : index
    %c0_7 = arith.constant 0 : index
    %8 = vector.load %arg9[%c0_6, %c0_7] : memref<256x128xf32, #tpu.memory_space<vmem>>, vector<256x128xf32>
    tpu.vector_store %arg9[%c0_6, %c0_7], %7 {strides = array<i32>} : memref<256x128xf32, #tpu.memory_space<vmem>>, vector<256x128xf32>,
    %c1_i32 = arith.constant 1 : i32
    %9 = arith.cmpi eq, %arg1, %c1_i32 : i32
    %10 = arith.extui %9 : i1 to i32
    %c0_i32_8 = arith.constant 0 : i32
    %11 = arith.cmpi ne, %10, %c0_i32_8 : i32
    scf.if %11 {
      %c0_9 = arith.constant 0 : index
      %c0_10 = arith.constant 0 : index
      %12 = vector.load %arg9[%c0_9, %c0_10] : memref<256x128xf32, #tpu.memory_space<vmem>>, vector<256x128xf32>
      %13 = arith.truncf %12 : vector<256x128xf32> to vector<256x128xbf16>
      %c0_11 = arith.constant 0 : index
      %c0_12 = arith.constant 0 : index
      %14 = vector.load %arg4[%c0_11, %c0_12] : memref<128x128xbf16, #tpu.memory_space<vmem>>, vector<128x128xbf16>
      %cst_13 = arith.constant dense<0.000000e+00> : vector<256x128xf32>
      %15 = tpu.matmul %13, %14, %cst_13 {dimension_numbers = #tpu.dot_dimension_numbers<[1], [0], [0], [1], [0, 0, 1, 1], [], []>} : vector<256x128xbf16>, vector<128x128xbf16>, vector<256x128xf32> -> vector<256x128xf32>
      %c0_14 = arith.constant 0 : index
      %c0_15 = arith.constant 0 : index
      %16 = vector.load %arg5[%c0_14, %c0_15] : memref<1x128xf32, #tpu.memory_space<vmem>>, vector<1x128xf32>
      %17 = vector.broadcast %16 : vector<1x128xf32> to vector<256x128xf32>
      %18 = arith.addf %15, %17 : vector<256x128xf32>
      %cst_16 = arith.constant 0.000000e+00 : f32
      %19 = vector.broadcast %cst_16 : f32 to vector<256x128xf32>
      %20 = arith.maximumf %18, %19 : vector<256x128xf32>
      %21 = arith.truncf %20 : vector<256x128xf32> to vector<256x128xbf16>
      %c0_17 = arith.constant 0 : index
      %c0_18 = arith.constant 0 : index
      %22 = vector.load %arg6[%c0_17, %c0_18] : memref<128x128xbf16, #tpu.memory_space<vmem>>, vector<128x128xbf16>
      %cst_19 = arith.constant dense<0.000000e+00> : vector<256x128xf32>
      %23 = tpu.matmul %21, %22, %cst_19 {dimension_numbers = #tpu.dot_dimension_numbers<[1], [0], [0], [1], [0, 0, 1, 1], [], []>} : vector<256x128xbf16>, vector<128x128xbf16>, vector<256x128xf32> -> vector<256x128xf32>
      %c0_20 = arith.constant 0 : index
      %c0_21 = arith.constant 0 : index
      %24 = vector.load %arg7[%c0_20, %c0_21] : memref<1x128xf32, #tpu.memory_space<vmem>>, vector<1x128xf32>
      %25 = vector.broadcast %24 : vector<1x128xf32> to vector<256x128xf32>
      %26 = arith.addf %23, %25 : vector<256x128xf32>
      %cst_22 = arith.constant 0.000000e+00 : f32
      %27 = vector.broadcast %cst_22 : f32 to vector<256x128xf32>
      %28 = arith.maximumf %26, %27 : vector<256x128xf32>
      %c0_23 = arith.constant 0 : index
      %c0_24 = arith.constant 0 : index
      %29 = vector.load %arg8[%c0_23, %c0_24] : memref<256x128xf32, #tpu.memory_space<vmem>>, vector<256x128xf32>
      tpu.vector_store %arg8[%c0_23, %c0_24], %28 {strides = array<i32>} : memref<256x128xf32, #tpu.memory_space<vmem>>, vector<256x128xf32>,
    } else {
    }
    return
  }
  func.func @transform_0(%arg0: i32, %arg1: i32) -> (i32, i32) {
    %c0_i32 = arith.constant 0 : i32
    return %arg0, %arg1 : i32, i32
  }
  func.func @transform_1(%arg0: i32, %arg1: i32) -> (i32, i32) {
    %c0_i32 = arith.constant 0 : i32
    %c0_i32_0 = arith.constant 0 : i32
    return %arg1, %c0_i32 : i32, i32
  }
  func.func @transform_2(%arg0: i32, %arg1: i32) -> (i32, i32) {
    %c0_i32 = arith.constant 0 : i32
    %c0_i32_0 = arith.constant 0 : i32
    %c0_i32_1 = arith.constant 0 : i32
    return %c0_i32, %c0_i32_0 : i32, i32
  }
  func.func @transform_3(%arg0: i32, %arg1: i32) -> (i32, i32) {
    %c0_i32 = arith.constant 0 : i32
    %c0_i32_0 = arith.constant 0 : i32
    %c0_i32_1 = arith.constant 0 : i32
    return %c0_i32, %c0_i32_0 : i32, i32
  }
  func.func @transform_4(%arg0: i32, %arg1: i32) -> (i32, i32) {
    %c0_i32 = arith.constant 0 : i32
    %c0_i32_0 = arith.constant 0 : i32
    %c0_i32_1 = arith.constant 0 : i32
    return %c0_i32, %c0_i32_0 : i32, i32
  }
  func.func @transform_5(%arg0: i32, %arg1: i32) -> (i32, i32) {
    %c0_i32 = arith.constant 0 : i32
    %c0_i32_0 = arith.constant 0 : i32
    %c0_i32_1 = arith.constant 0 : i32
    return %c0_i32, %c0_i32_0 : i32, i32
  }
  func.func @transform_6(%arg0: i32, %arg1: i32) -> (i32, i32) {
    %c0_i32 = arith.constant 0 : i32
    %c0_i32_0 = arith.constant 0 : i32
    return %arg0, %c0_i32 : i32, i32
  }
}

</mosaic_0001>

<bundles_post_ra>
// kernel: ginfominmax_forward.5
= control target key start
LH: loop header
LB: loop body
LE: loop exit
PB: predicated region body
PF: predicated region fallthrough
CT: control target
= control target key end

     0   :  { %s824_s21 = smov 0   ;;  %s941_s0 = inlined_call_operand.vmem [shape: bf16[8,512], index: 0, kind: input, shape index: {}]   ;;  %s942_s1 = inlined_call_operand.vmem [shape: f32[512,128], index: 1, kind: input, shape index: {}]   ;;  %s943_s2 = inlined_call_operand.vmem [shape: bf16[128,128], index: 2, kind: input, shape index: {}]   ;;  %s944_s3 = inlined_call_operand.vmem [shape: f32[1,128], index: 3, kind: input, shape index: {}]   ;;  %s945_s4 = inlined_call_operand.vmem [shape: bf16[128,128], index: 4, kind: input, shape index: {}]   ;;  %s946_s5 = inlined_call_operand.vmem [shape: f32[1,128], index: 5, kind: input, shape index: {}]   ;;  %s947_s6 = inlined_call_operand.vmem [shape: f32[8,128], index: 6, kind: output, shape index: {}]  }
   0x1 LB: > { %s830_s22 = sadd.s32 4294967295, %s784_s21   ;;  %p640_p0 = scmp.ge.s32.totalorder %s784_s21, 1  ;;  %s784_s21 = sphi %s824_s21, %s16_s21  }
   0x2   : > { %p219_p1 = scmp.lt.s32.totalorder %s784_s21, 3 }
   0x4   : > { %p220_p2 = pnand %p640_p0, %p219_p1 }
   0x5   : > { %s641_s23 = sshll.u32 (!%p220_p2), %s830_s22, 1  ;;  %s643_s24 = sshll.u32 (!%p220_p2), %s830_s22, 5 }
   0x6   : > { %223 = sbr.rel (%p220_p2) target bundleno = 687 (0x2af), region = 44  ;;  %p250_p3 = scmp.lt.s32.totalorder (!%p220_p2), %s641_s23, 3 }
   0x7   : > { %p256_p4 = scmp.lt.s32.totalorder (!%p220_p2), %s643_s24, 63  ;;  %p645_p5 = scmp.ne.s32.totalorder (!%p220_p2), %s830_s22, 0 }
   0xb   : > { %s949_s23 = smov (!%p250_p3, %s641_s23), 3  ;;  %s951_s24 = smov (!%p256_p4, %s643_s24), 63 }
   0xc   : > { %s642_s25 = sshll.u32 %s949_s23, 2  ;;  %s644_s29 = sshll.u32 %s951_s24, 3 }
   0xd   : > { %s839_s28 = scalar_lea.vmem %s941_s0, %s642_s25  ;;  %s844_s8 = scalar_lea.vmem %s942_s1, %s644_s29 }
   0xe   : > { %265 = sbr.rel (%p645_p5) target bundleno = 21 (0x15), region = 48 }
  0x13   : > { %v786_v0 = vmov 0.0  }
  0x14   : > { %266 = vst [vmem:[#allocation2] sm:$0xff] %v786_v0 }
  0x15 PF: > { %v299_v1 = vld [vmem:[%s844_s8 + $0xf0] sm:$0xff]  ;;  %v300_v2 = vld [vmem:[%s844_s8 + $0xf8] sm:$0xff]  ;;  %v297_v6 = vld [vmem:[%s844_s8 + $0xe0] sm:$0xff]  ;;  %p648_p6 = scmp.ne.s32.totalorder %s830_s22, 1 }
  0x16   : > { %v283_v3 = vld [vmem:[%s844_s8 + $0x70] sm:$0xff]  ;;  %v316_v4 = vpack.c.bf16 %v300_v2, %v299_v1  ;;  %v284_v5 = vld [vmem:[%s844_s8 + $0x78] sm:$0xff]  ;;  %v298_v7 = vld [vmem:[%s844_s8 + $0xe8] sm:$0xff] }
  0x17   : > { %v308_v8 = vpack.c.bf16 %v284_v5, %v283_v3  ;;  %v315_v9 = vpack.c.bf16 %v298_v7, %v297_v6  ;;  %v281_v10 = vld [vmem:[%s844_s8 + $0x60] sm:$0xff]  ;;  %v282_v11 = vld [vmem:[%s844_s8 + $0x68] sm:$0xff]  ;;  %v295_v12 = vld [vmem:[%s844_s8 + $0xd0] sm:$0xff] }
  0x18   : > { %669 = vmatprep.subr.bf16.mxu0 %v316_v4  ;;  %v296_v13 = vld [vmem:[%s844_s8 + $0xd8] sm:$0xff]  ;;  %v307_v14 = vpack.c.bf16 %v282_v11, %v281_v10  ;;  %v279_v16 = vld [vmem:[%s844_s8 + $0x50] sm:$0xff]  ;;  %v293_v18 = vld [vmem:[%s844_s8 + $0xc0] sm:$0xff] }
  0x19   : > { %670 = vmatpush3.bf16.msra.mxu0 %v308_v8  ;;  %v314_v15 = vpack.c.bf16 %v296_v13, %v295_v12  ;;  %v280_v17 = vld [vmem:[%s844_s8 + $0x58] sm:$0xff]  ;;  %v294_v19 = vld [vmem:[%s844_s8 + $0xc8] sm:$0xff]  ;;  %v277_v22 = vld [vmem:[%s844_s8 + $0x40] sm:$0xff] }
  0x1a   : > { %671 = vmatprep.subr.bf16.mxu0 %v315_v9  ;;  %v306_v20 = vpack.c.bf16 %v280_v17, %v279_v16  ;;  %v313_v21 = vpack.c.bf16 %v294_v19, %v293_v18  ;;  %v278_v23 = vld [vmem:[%s844_s8 + $0x48] sm:$0xff]  ;;  %v291_v24 = vld [vmem:[%s844_s8 + $0xb0] sm:$0xff]  ;;  %v292_v25 = vld [vmem:[%s844_s8 + $0xb8] sm:$0xff] }
  0x1b   : > { %v268_v26 = vld [vmem:[%s839_s28] sm:$0xff]  ;;  %v305_v28 = vpack.c.bf16 %v278_v23, %v277_v22  ;;  %v312_v29 = vpack.c.bf16 %v292_v25, %v291_v24  ;;  %v275_v30 = vld [vmem:[%s844_s8 + $0x30] sm:$0xff]  ;;  %v276_v31 = vld [vmem:[%s844_s8 + $0x38] sm:$0xff] }
  0x1c   : > { %v647_v27 = vcombine.high %v268_v26, %v268_v26  ;;  %v289_v32 = vld [vmem:[%s844_s8 + $0xa0] sm:$0xff]  ;;  %v290_v33 = vld [vmem:[%s844_s8 + $0xa8] sm:$0xff]  ;;  %v304_v34 = vpack.c.bf16 %v276_v31, %v275_v30  ;;  %v287_v38 = vld [vmem:[%s844_s8 + $0x90] sm:$0xff]  ;;  %v646_v51 = vcombine.low %v268_v26, %v268_v26 }
  0x1d   : > { %672 = vmatpush3.bf16.msra.mxu0 %v307_v14  ;;  %v311_v35 = vpack.c.bf16 %v290_v33, %v289_v32  ;;  %v273_v36 = vld [vmem:[%s844_s8 + $0x20] sm:$0xff]  ;;  %v274_v37 = vld [vmem:[%s844_s8 + $0x28] sm:$0xff]  ;;  %v288_v39 = vld [vmem:[%s844_s8 + $0x98] sm:$0xff] }
  0x1e   : > { %673 = vmatprep.subr.bf16.mxu0 %v314_v15  ;;  %356 = vmatprep.mubr.bf16.mxu0 %v647_v27  ;;  %v303_v40 = vpack.c.bf16 %v274_v37, %v273_v36  ;;  %v310_v41 = vpack.c.bf16 %v288_v39, %v287_v38  ;;  %v271_v42 = vld [vmem:[%s844_s8 + $0x10] sm:$0xff]  ;;  %v272_v43 = vld [vmem:[%s844_s8 + $0x18] sm:$0xff]  ;;  %v285_v44 = vld [vmem:[%s844_s8 + $0x80] sm:$0xff] }
  0x1f   : > { %v286_v45 = vld [vmem:[%s844_s8 + $0x88] sm:$0xff]  ;;  %v302_v46 = vpack.c.bf16 %v272_v43, %v271_v42  ;;  %v269_v48 = vld [vmem:[%s844_s8] sm:$0xff] }
  0x20   : > { %v309_v47 = vpack.c.bf16 %v286_v45, %v285_v44  ;;  %v270_v49 = vld [vmem:[%s844_s8 + $0x8] sm:$0xff]  ;;  %v267_v53 = vld [vmem:[#allocation2] sm:$0xff] }
  0x21   : > { %674 = vmatpush3.bf16.msra.mxu0 %v306_v20  ;;  %v301_v50 = vpack.c.bf16 %v270_v49, %v269_v48 }
  0x22   : > { %675 = vmatprep.subr.bf16.mxu0 %v313_v21 }
  0x25   : > { %676 = vmatpush3.bf16.msra.mxu0 %v305_v28 }
  0x26   : > { %677 = vmatprep.subr.bf16.mxu0 %v312_v29 }
  0x29   : > { %678 = vmatpush3.bf16.msra.mxu0 %v304_v34 }
  0x2a   : > { %679 = vmatprep.subr.bf16.mxu0 %v311_v35 }
  0x2d   : > { %680 = vmatpush3.bf16.msra.mxu0 %v303_v40 }
  0x2e   : > { %681 = vmatprep.subr.bf16.mxu0 %v310_v41 }
  0x31   : > { %682 = vmatpush3.bf16.msra.mxu0 %v302_v46 }
  0x32   : > { %683 = vmatprep.subr.bf16.mxu0 %v309_v47 }
  0x35   : > { %684 = vmatpush3.bf16.msra.mxu0 %v301_v50 }
  0x38   : > { %357 = vmatmul.mubr.bf16.vlgmr.msra.gmra.mxu0 %v646_v51 }
  0xf8   : > { %v685_v52 = vpop.f32.mrf.mxu0 }
  0xfa   : > { %v686_v54 = vpop.f32.mrf.mxu0 }
  0xfb   : > { %v687_v55 = vadd.f32 %v686_v54, %v685_v52  ;;  %369 = sbr.rel (%p648_p6) target bundleno = 687 (0x2af), region = 52 }
  0xfc   : > { %v688_v56 = vpop.f32.mrf.mxu0 }
  0xfd   : > { %v364_v57 = vadd.f32 %v687_v55, %v267_v53 }
  0xfe   : > { %v689_v58 = vpop.f32.mrf.mxu0 }
  0xff   : > { %365 = vst [vmem:[#allocation2] sm:$0xff] %v364_v57 }
 0x100   : > { %v762_v59 = vld [vmem:[%s943_s2 + $0x38] sm:$0xff]   ;;  %v787_v60 = vmov 0.0   ;;  %v763_v61 = vld [vmem:[%s943_s2 + $0x30] sm:$0xff]   ;;  %vm788_vm0 = vmmov 0   ;;  %v764_v62 = vld [vmem:[%s943_s2 + $0x28] sm:$0xff]  }
 0x101   : > { %709 = vmatprep.subr.bf16.mxu0 %v787_v60  ;;  %729 = vmatprep.subr.bf16.mxu1 %v787_v60  ;;  %v770_v63 = vld [vmem:[%s945_s4 + $0x38] sm:$0xff]   ;;  %v765_v0 = vld [vmem:[%s943_s2 + $0x20] sm:$0xff]   ;;  %v771_v1 = vld [vmem:[%s945_s4 + $0x30] sm:$0xff]  }
 0x102   : > { %710 = vmatpush3.bf16.msra.mxu0 %v762_v59  ;;  %725 = vmatprep.mubr.msk.bf16.mxu0 %vm788_vm0, %v787_v60  ;;  %v766_v2 = vld [vmem:[%s943_s2 + $0x18] sm:$0xff]   ;;  %v772_v3 = vld [vmem:[%s945_s4 + $0x28] sm:$0xff]   ;;  %v767_v4 = vld [vmem:[%s943_s2 + $0x10] sm:$0xff]  }
 0x103   : > { %711 = vmatprep.subr.bf16.mxu0 %v787_v60  ;;  %745 = vmatprep.mubr.msk.bf16.mxu1 %vm788_vm0, %v787_v60  ;;  %v773_v5 = vld [vmem:[%s945_s4 + $0x20] sm:$0xff]   ;;  %v768_v6 = vld [vmem:[%s943_s2 + $0x8] sm:$0xff]   ;;  %v774_v7 = vld [vmem:[%s945_s4 + $0x18] sm:$0xff]  }
 0x104   : > { %730 = vmatpush3.bf16.msra.mxu1 %v770_v63  ;;  %v769_v8 = vld [vmem:[%s943_s2] sm:$0xff]   ;;  %v775_v10 = vld [vmem:[%s945_s4 + $0x10] sm:$0xff]   ;;  %v776_v12 = vld [vmem:[%s945_s4 + $0x8] sm:$0xff]  }
 0x105   : > { %731 = vmatprep.subr.bf16.mxu1 %v787_v60  ;;  %v777_v13 = vld [vmem:[%s945_s4] sm:$0xff]  }
 0x106   : > { %712 = vmatpush3.bf16.msra.mxu0 %v763_v61  ;;  %v370_v9 = vld [vmem:[#allocation2] sm:$0xff] }
 0x107   : > { %713 = vmatprep.subr.bf16.mxu0 %v787_v60  ;;  %v371_v11 = vpack.c.bf16 %v370_v9, %v370_v9  ;;  %v649_v14 = vld [vmem:[%s944_s3] ss:$0 sm:$0xff] }
 0x108   : > { %732 = vmatpush3.bf16.msra.mxu1 %v771_v1  ;;  %v658_v22 = vld [vmem:[%s946_s5] ss:$0 sm:$0xff] }
 0x109   : > { %733 = vmatprep.subr.bf16.mxu1 %v787_v60 }
 0x10a   : > { %714 = vmatpush3.bf16.msra.mxu0 %v764_v62 }
 0x10b   : > { %715 = vmatprep.subr.bf16.mxu0 %v787_v60 }
 0x10c   : > { %734 = vmatpush3.bf16.msra.mxu1 %v772_v3 }
 0x10d   : > { %735 = vmatprep.subr.bf16.mxu1 %v787_v60 }
 0x10e   : > { %716 = vmatpush3.bf16.msra.mxu0 %v765_v0 }
 0x10f   : > { %717 = vmatprep.subr.bf16.mxu0 %v787_v60 }
 0x110   : > { %736 = vmatpush3.bf16.msra.mxu1 %v773_v5 }
 0x111   : > { %737 = vmatprep.subr.bf16.mxu1 %v787_v60 }
 0x112   : > { %718 = vmatpush3.bf16.msra.mxu0 %v766_v2 }
 0x113   : > { %719 = vmatprep.subr.bf16.mxu0 %v787_v60 }
 0x114   : > { %738 = vmatpush3.bf16.msra.mxu1 %v774_v7 }
 0x115   : > { %739 = vmatprep.subr.bf16.mxu1 %v787_v60 }
 0x116   : > { %720 = vmatpush3.bf16.msra.mxu0 %v767_v4 }
 0x117   : > { %721 = vmatprep.subr.bf16.mxu0 %v787_v60 }
 0x118   : > { %740 = vmatpush3.bf16.msra.mxu1 %v775_v10 }
 0x119   : > { %741 = vmatprep.subr.bf16.mxu1 %v787_v60 }
 0x11a   : > { %722 = vmatpush3.bf16.msra.mxu0 %v768_v6 }
 0x11b   : > { %723 = vmatprep.subr.bf16.mxu0 %v787_v60 }
 0x11c   : > { %742 = vmatpush3.bf16.msra.mxu1 %v776_v12 }
 0x11d   : > { %743 = vmatprep.subr.bf16.mxu1 %v787_v60 }
 0x11e   : > { %724 = vmatpush3.bf16.msra.mxu0 %v769_v8 }
 0x120   : > { %744 = vmatpush3.bf16.msra.mxu1 %v777_v13 }
 0x121   : > { %726 = vmatmul.mubr.bf16.vlgmr.msra.gmra.mxu0 %v371_v11 }
 0x1e1   : > { %v477_v15 = vpop.f32.mrf.mxu0 }
 0x1e2   : > { %v478_v16 = vadd.f32 %v649_v14, %v477_v15 }
 0x1e3   : > { %v727_v17 = vpop.f32.mrf.mxu0 }
 0x1e4   : > { %v483_v18 = vmax.f32 %v478_v16, 0.0 }
 0x1e5   : > { %v480_v19 = vpop.f32.mrf.mxu0 }
 0x1e6   : > { %v484_v20 = vpack.c.bf16 %v483_v18, %v483_v18 }
 0x1e7   : > { %v728_v21 = vpop.f32.mrf.mxu0 }
 0x1e8   : > { %746 = vmatmul.mubr.bf16.vlgmr.msra.gmra.mxu1 %v484_v20 }
 0x2a8   : > { %v590_v23 = vpop.f32.mrf.mxu1 }
 0x2a9   : > { %v591_v24 = vadd.f32 %v658_v22, %v590_v23 }
 0x2aa   : > { %v747_v25 = vpop.f32.mrf.mxu1 }
 0x2ab   : > { %596 = vst [vmem:[%s947_s6] sm:$0xff] %v591_v24 }
 0x2ac   : > { %v593_v26 = vpop.f32.mrf.mxu1 }
 0x2ae   : > { %v748_v27 = vpop.f32.mrf.mxu1 }
 0x2af PF: > { %s16_s21 = sadd.s32 1, %s784_s21  }
 0x2b0   : > { %p13_p7 = scmp.ge.s32.totalorder %s16_s21, 4  }
 0x2b2   :  { %15 = sbr.rel (!%p13_p7) target bundleno = 1 (0x1), region = 81 }

// kernel: ginfominmax_forward.3
= control target key start
LH: loop header
LB: loop body
LE: loop exit
PB: predicated region body
PF: predicated region fallthrough
CT: control target
= control target key end

     0   :  { %s2659_s21 = smov 0   ;;  %s2661_s22 = smov 0   ;;  %s3013_s0 = inlined_call_operand.vmem [shape: bf16[512,512], index: 0, kind: input, shape index: {}]   ;;  %s3014_s1 = inlined_call_operand.vmem [shape: bf16[512,128], index: 1, kind: input, shape index: {}]   ;;  %s3015_s2 = inlined_call_operand.vmem [shape: bf16[128,128], index: 2, kind: input, shape index: {}]   ;;  %s3016_s3 = inlined_call_operand.vmem [shape: f32[1,128], index: 3, kind: input, shape index: {}]   ;;  %s3017_s4 = inlined_call_operand.vmem [shape: bf16[128,128], index: 4, kind: input, shape index: {}]   ;;  %s3018_s5 = inlined_call_operand.vmem [shape: f32[1,128], index: 5, kind: input, shape index: {}]   ;;  %s3019_s6 = inlined_call_operand.vmem [shape: bf16[512,128], index: 6, kind: output, shape index: {}]  }
   0x1   :  { %s2663_s23 = smov 0   ;;  %s2665_s24 = smov 0  }
   0x2   :  { %s2667_s25 = smov 0   ;;  %s2669_s26 = smov 0  }
   0x3   :  { %s2671_s27 = smov 0  }
   0x4 LB: > { %s25_s28 = sadd.s32 1, %s2613_s25  ;;  %s28_s29 = sadd.s32 1, %s2617_s26  ;;  %s2621_s27 = sphi %s2671_s27, %s16_s27   ;;  %s2617_s26 = sphi %s2669_s26, %s3025_s26   ;;  %s2613_s25 = sphi %s2667_s25, %s3024_s25   ;;  %s2609_s24 = sphi %s2665_s24, %s3023_s24   ;;  %s2605_s23 = sphi %s2663_s23, %s3022_s23   ;;  %s2601_s22 = sphi %s2661_s22, %s3021_s22   ;;  %s2597_s21 = sphi %s2659_s21, %s3020_s21  }
   0x5   : > { %p26_p0 = scmp.ge.s32.totalorder %s25_s28, 2  ;;  %p44_p1 = scmp.ne.s32.totalorder %s2601_s22, %s2597_s21 }
   0x6   : > { %p45_p2 = scmp.eq.s32.totalorder %s2621_s27, 0  ;;  %s37_s9 = sadd.s32 1, %s2601_s22 }
   0x7   : > { %s3027_s28 = smov (%p26_p0, %s25_s28), 0  ;;  %s3029_s29 = smov (!%p26_p0, %s28_s29), %s2617_s26 }
   0x8   : > { %p46_p3 = por %p45_p2, %p44_p1  ;;  %p30_p4 = scmp.ge.s32.totalorder %s3029_s29, 2 }
   0x9   : > { %s33_s30 = ssub.s32 %s2613_s25, %s3027_s28  ;;  %p1916_p6 = scmp.ge.s32.totalorder %s2621_s27, 4 }
   0xa   : > { %s3031_s29 = smov (%p30_p4, %s3029_s29), 0 }
   0xb   : > { %s32_s7 = ssub.s32 %s2617_s26, %s3031_s29  ;;  %218 = sbr.rel (%p1916_p6) target bundleno = 39 (0x27), region = 32 }
   0xc   : > { %s34_s8 = sor.u32 %s33_s30, %s32_s7 }
   0xd   : > { %p35_p5 = scmp.eq.s32.totalorder %s34_s8, 0 }
   0xf   : > { %s2710_s10 = scalar_select %p35_p5, %s2601_s22, %s37_s9  }
  0x10   : > { %221 = sbr.rel (!%p46_p3) target bundleno = 39 (0x27), region = 36  ;;  %s223_s11 = sand.u32 (%p46_p3), 1, %s2601_s22  }
  0x11   : > { %s1919_s12 = sshll.u32 (%p46_p3), %s2613_s25, 1  ;;  %s1917_s13 = sshll.u32 (%p46_p3), %s223_s11, 8 }
  0x12   : > { %s2030_s14 = sshll.u32 (%p46_p3), %s2617_s26, 7  ;;  %s2724_s20 = scalar_lea.vmem (%p46_p3), [#allocation3], %s1917_s13 }
  0x13   : > { %s229_s15 = sadd.s32 (%p46_p3), %s2030_s14, %s1919_s12 }
  0x14   : > { %s1921_s16 = sshll.u32 (%p46_p3), %s229_s15, 2 }
  0x15   : > { %s2719_s19 = scalar_lea.vmem %s3013_s0, %s1921_s16 }
  0x16   : > { %v322_v0 = vld [vmem:[%s2719_s19] sm:$0xff]  ;;  %v324_v1 = vld [vmem:[%s2719_s19 + $0x10] sm:$0xff] }
  0x17   : > { %v326_v2 = vld [vmem:[%s2719_s19 + $0x20] sm:$0xff]  ;;  %323 = vst [vmem:[%s2724_s20] sm:$0xff] %v322_v0  ;;  %325 = vst [vmem:[%s2724_s20 + $0x8] sm:$0xff] %v324_v1  ;;  %v328_v3 = vld [vmem:[%s2719_s19 + $0x30] sm:$0xff] }
  0x18   : > { %327 = vst [vmem:[%s2724_s20 + $0x10] sm:$0xff] %v326_v2  ;;  %v330_v4 = vld [vmem:[%s2719_s19 + $0x40] sm:$0xff]  ;;  %v332_v5 = vld [vmem:[%s2719_s19 + $0x50] sm:$0xff]  ;;  %329 = vst [vmem:[%s2724_s20 + $0x18] sm:$0xff] %v328_v3 }
  0x19   : > { %331 = vst [vmem:[%s2724_s20 + $0x20] sm:$0xff] %v330_v4  ;;  %333 = vst [vmem:[%s2724_s20 + $0x28] sm:$0xff] %v332_v5  ;;  %v334_v6 = vld [vmem:[%s2719_s19 + $0x60] sm:$0xff]  ;;  %v336_v7 = vld [vmem:[%s2719_s19 + $0x70] sm:$0xff] }
  0x1a   : > { %v338_v8 = vld [vmem:[%s2719_s19 + $0x80] sm:$0xff]  ;;  %335 = vst [vmem:[%s2724_s20 + $0x30] sm:$0xff] %v334_v6  ;;  %337 = vst [vmem:[%s2724_s20 + $0x38] sm:$0xff] %v336_v7  ;;  %v340_v9 = vld [vmem:[%s2719_s19 + $0x90] sm:$0xff] }
  0x1b   : > { %339 = vst [vmem:[%s2724_s20 + $0x40] sm:$0xff] %v338_v8  ;;  %v342_v10 = vld [vmem:[%s2719_s19 + $0xa0] sm:$0xff]  ;;  %v344_v11 = vld [vmem:[%s2719_s19 + $0xb0] sm:$0xff]  ;;  %341 = vst [vmem:[%s2724_s20 + $0x48] sm:$0xff] %v340_v9 }
  0x1c   : > { %343 = vst [vmem:[%s2724_s20 + $0x50] sm:$0xff] %v342_v10  ;;  %345 = vst [vmem:[%s2724_s20 + $0x58] sm:$0xff] %v344_v11  ;;  %v346_v12 = vld [vmem:[%s2719_s19 + $0xc0] sm:$0xff]  ;;  %v348_v13 = vld [vmem:[%s2719_s19 + $0xd0] sm:$0xff] }
  0x1d   : > { %v350_v14 = vld [vmem:[%s2719_s19 + $0xe0] sm:$0xff]  ;;  %347 = vst [vmem:[%s2724_s20 + $0x60] sm:$0xff] %v346_v12  ;;  %349 = vst [vmem:[%s2724_s20 + $0x68] sm:$0xff] %v348_v13  ;;  %v352_v15 = vld [vmem:[%s2719_s19 + $0xf0] sm:$0xff] }
  0x1e   : > { %351 = vst [vmem:[%s2724_s20 + $0x70] sm:$0xff] %v350_v14  ;;  %v354_v16 = vld [vmem:[%s2719_s19 + $0x100] sm:$0xff]  ;;  %v356_v17 = vld [vmem:[%s2719_s19 + $0x110] sm:$0xff]  ;;  %353 = vst [vmem:[%s2724_s20 + $0x78] sm:$0xff] %v352_v15 }
  0x1f   : > { %355 = vst [vmem:[%s2724_s20 + $0x80] sm:$0xff] %v354_v16  ;;  %357 = vst [vmem:[%s2724_s20 + $0x88] sm:$0xff] %v356_v17  ;;  %v358_v18 = vld [vmem:[%s2719_s19 + $0x120] sm:$0xff]  ;;  %v360_v19 = vld [vmem:[%s2719_s19 + $0x130] sm:$0xff] }
  0x20   : > { %v362_v20 = vld [vmem:[%s2719_s19 + $0x140] sm:$0xff]  ;;  %359 = vst [vmem:[%s2724_s20 + $0x90] sm:$0xff] %v358_v18  ;;  %361 = vst [vmem:[%s2724_s20 + $0x98] sm:$0xff] %v360_v19  ;;  %v364_v21 = vld [vmem:[%s2719_s19 + $0x150] sm:$0xff] }
  0x21   : > { %363 = vst [vmem:[%s2724_s20 + $0xa0] sm:$0xff] %v362_v20  ;;  %v366_v22 = vld [vmem:[%s2719_s19 + $0x160] sm:$0xff]  ;;  %v368_v23 = vld [vmem:[%s2719_s19 + $0x170] sm:$0xff]  ;;  %365 = vst [vmem:[%s2724_s20 + $0xa8] sm:$0xff] %v364_v21 }
  0x22   : > { %367 = vst [vmem:[%s2724_s20 + $0xb0] sm:$0xff] %v366_v22  ;;  %369 = vst [vmem:[%s2724_s20 + $0xb8] sm:$0xff] %v368_v23  ;;  %v370_v24 = vld [vmem:[%s2719_s19 + $0x180] sm:$0xff]  ;;  %v372_v25 = vld [vmem:[%s2719_s19 + $0x190] sm:$0xff] }
  0x23   : > { %v374_v26 = vld [vmem:[%s2719_s19 + $0x1a0] sm:$0xff]  ;;  %371 = vst [vmem:[%s2724_s20 + $0xc0] sm:$0xff] %v370_v24  ;;  %373 = vst [vmem:[%s2724_s20 + $0xc8] sm:$0xff] %v372_v25  ;;  %v376_v27 = vld [vmem:[%s2719_s19 + $0x1b0] sm:$0xff] }
  0x24   : > { %375 = vst [vmem:[%s2724_s20 + $0xd0] sm:$0xff] %v374_v26  ;;  %v378_v28 = vld [vmem:[%s2719_s19 + $0x1c0] sm:$0xff]  ;;  %v380_v29 = vld [vmem:[%s2719_s19 + $0x1d0] sm:$0xff]  ;;  %377 = vst [vmem:[%s2724_s20 + $0xd8] sm:$0xff] %v376_v27 }
  0x25   : > { %379 = vst [vmem:[%s2724_s20 + $0xe0] sm:$0xff] %v378_v28  ;;  %381 = vst [vmem:[%s2724_s20 + $0xe8] sm:$0xff] %v380_v29  ;;  %v382_v30 = vld [vmem:[%s2719_s19 + $0x1e0] sm:$0xff]  ;;  %v384_v31 = vld [vmem:[%s2719_s19 + $0x1f0] sm:$0xff] }
  0x26   : > { %383 = vst [vmem:[%s2724_s20 + $0xf0] sm:$0xff] %v382_v30  ;;  %385 = vst [vmem:[%s2724_s20 + $0xf8] sm:$0xff] %v384_v31 }
  0x27 PF: > { %p1922_p7 = scmp.ge.s32.totalorder %s2621_s27, 1  ;;  %p399_p8 = scmp.lt.s32.totalorder %s2621_s27, 5 }
  0x29   : > { %p400_p9 = pnand %p1922_p7, %p399_p8 }
  0x2a   : > { %s406_s30 = sand.u32 (!%p400_p9), 1, %s2597_s21   ;;  %s1924_s7 = sshll.u32 (!%p400_p9), %s2605_s23, 5 }
  0x2b   : > { %403 = sbr.rel (%p400_p9) target bundleno = 867 (0x363), region = 78  ;;  %s1923_s8 = sshll.u32 (!%p400_p9), %s406_s30, 8 }
  0x2c   : > { %p443_p10 = scmp.lt.s32.totalorder (!%p400_p9), %s1924_s7, 63  ;;  %s1926_s9 = sshll.u32 (!%p400_p9), %s2609_s24, 5 }
  0x2d   : > { %p449_p11 = scmp.lt.s32.totalorder (!%p400_p9), %s1926_s9, 63  ;;  %s2802_s21 = scalar_lea.vmem (!%p400_p9), [#allocation3], %s1923_s8 }
  0x2e   : > { %p1928_p12 = scmp.ne.s32.totalorder (!%p400_p9), %s2605_s23, 0 }
  0x30   : > { %s3033_s7 = smov (!%p443_p10, %s1924_s7), 63  ;;  %s3035_s9 = smov (!%p449_p11, %s1926_s9), 63 }
  0x31   : > { %s1925_s11 = sshll.u32 %s3033_s7, 2  ;;  %s1927_s15 = sshll.u32 %s3035_s9, 2 }
  0x32   : > { %s2795_s14 = scalar_lea.vmem %s3014_s1, %s1925_s11  ;;  %s2800_s18 = scalar_lea.vmem %s3019_s6, %s1927_s15 }
  0x33   : > { %458 = sbr.rel (%p1928_p12) target bundleno = 73 (0x49), region = 86 }
  0x38   : > { %v2623_v32 = vmov 0.0  }
  0x39   : > { %459 = vst [vmem:[#allocation2 + $0xb0] sm:$0xff] %v2623_v32  ;;  %460 = vst [vmem:[#allocation2] sm:$0xff] %v2623_v32 }
  0x3a   : > { %461 = vst [vmem:[#allocation2 + $0xd8] sm:$0xff] %v2623_v32  ;;  %462 = vst [vmem:[#allocation2 + $0x18] sm:$0xff] %v2623_v32 }
  0x3b   : > { %463 = vst [vmem:[#allocation2 + $0x50] sm:$0xff] %v2623_v32  ;;  %464 = vst [vmem:[#allocation2 + $0x68] sm:$0xff] %v2623_v32 }
  0x3c   : > { %465 = vst [vmem:[#allocation2 + $0x30] sm:$0xff] %v2623_v32  ;;  %466 = vst [vmem:[#allocation2 + $0x48] sm:$0xff] %v2623_v32 }
  0x3d   : > { %467 = vst [vmem:[#allocation2 + $0x80] sm:$0xff] %v2623_v32  ;;  %468 = vst [vmem:[#allocation2 + $0x88] sm:$0xff] %v2623_v32 }
  0x3e   : > { %469 = vst [vmem:[#allocation2 + $0xe8] sm:$0xff] %v2623_v32  ;;  %470 = vst [vmem:[#allocation2 + $0xb8] sm:$0xff] %v2623_v32 }
  0x3f   : > { %471 = vst [vmem:[#allocation2 + $0x60] sm:$0xff] %v2623_v32  ;;  %472 = vst [vmem:[#allocation2 + $0xf0] sm:$0xff] %v2623_v32 }
  0x40   : > { %473 = vst [vmem:[#allocation2 + $0x8] sm:$0xff] %v2623_v32  ;;  %474 = vst [vmem:[#allocation2 + $0x78] sm:$0xff] %v2623_v32 }
  0x41   : > { %475 = vst [vmem:[#allocation2 + $0x38] sm:$0xff] %v2623_v32  ;;  %476 = vst [vmem:[#allocation2 + $0x58] sm:$0xff] %v2623_v32 }
  0x42   : > { %477 = vst [vmem:[#allocation2 + $0x40] sm:$0xff] %v2623_v32  ;;  %478 = vst [vmem:[#allocation2 + $0xc8] sm:$0xff] %v2623_v32 }
  0x43   : > { %479 = vst [vmem:[#allocation2 + $0xe0] sm:$0xff] %v2623_v32  ;;  %480 = vst [vmem:[#allocation2 + $0x90] sm:$0xff] %v2623_v32 }
  0x44   : > { %481 = vst [vmem:[#allocation2 + $0x70] sm:$0xff] %v2623_v32  ;;  %482 = vst [vmem:[#allocation2 + $0xc0] sm:$0xff] %v2623_v32 }
  0x45   : > { %483 = vst [vmem:[#allocation2 + $0xa8] sm:$0xff] %v2623_v32  ;;  %484 = vst [vmem:[#allocation2 + $0xd0] sm:$0xff] %v2623_v32 }
  0x46   : > { %485 = vst [vmem:[#allocation2 + $0x10] sm:$0xff] %v2623_v32  ;;  %486 = vst [vmem:[#allocation2 + $0x28] sm:$0xff] %v2623_v32 }
  0x47   : > { %487 = vst [vmem:[#allocation2 + $0xa0] sm:$0xff] %v2623_v32  ;;  %488 = vst [vmem:[#allocation2 + $0xf8] sm:$0xff] %v2623_v32 }
  0x48   : > { %489 = vst [vmem:[#allocation2 + $0x20] sm:$0xff] %v2623_v32  ;;  %490 = vst [vmem:[#allocation2 + $0x98] sm:$0xff] %v2623_v32 }
  0x49 PF: > { %v2487_v33 = vld [vmem:[%s2795_s14 + $0x78] sm:$0xff]   ;;  %v2489_v35 = vld [vmem:[%s2795_s14 + $0x70] sm:$0xff]   ;;  %v2491_v37 = vld [vmem:[%s2795_s14 + $0x68] sm:$0xff]   ;;  %p1977_p13 = scmp.ne.s32.totalorder %s2605_s23, 1 }
  0x4a   : > { %v2488_v34 = vld [vmem:[%s2795_s14 + $0x38] sm:$0xff]   ;;  %2158 = vmatprep.subr.bf16.mxu0 %v2487_v33  ;;  %2414 = vmatprep.subr.bf16.mxu1 %v2487_v33  ;;  %v2490_v36 = vld [vmem:[%s2795_s14 + $0x30] sm:$0xff]   ;;  %v2492_v38 = vld [vmem:[%s2795_s14 + $0x28] sm:$0xff]  }
  0x4b   : > { %2159 = vmatpush3.bf16.msra.mxu0 %v2488_v34  ;;  %2422 = vmatpush3.bf16.msra.mxu1 %v2488_v34  ;;  %v2493_v39 = vld [vmem:[%s2795_s14 + $0x60] sm:$0xff]   ;;  %v2495_v41 = vld [vmem:[%s2795_s14 + $0x58] sm:$0xff]   ;;  %v2497_v43 = vld [vmem:[%s2795_s14 + $0x50] sm:$0xff]  }
  0x4c   : > { %2160 = vmatprep.subr.bf16.mxu0 %v2489_v35  ;;  %2415 = vmatprep.subr.bf16.mxu1 %v2489_v35  ;;  %v2494_v40 = vld [vmem:[%s2795_s14 + $0x20] sm:$0xff]   ;;  %v2496_v42 = vld [vmem:[%s2795_s14 + $0x18] sm:$0xff]   ;;  %v2498_v46 = vld [vmem:[%s2795_s14 + $0x10] sm:$0xff]  }
  0x4d   : > { %v2505_v44 = vld [vmem:[%s2802_s21 + $0x4] ss:$8 sps:$4 sm:$0xff]   ;;  %v2503_v51 = vld [vmem:[%s2802_s21] ss:$8 sps:$4 sm:$0xff]   ;;  %v2509_v53 = vld [vmem:[%s2802_s21 + $0x14] ss:$8 sps:$4 sm:$0xff]  }
  0x4e   : > { %v2508_v45 = vld [vmem:[%s2802_s21 + $0x84] ss:$8 sps:$4 sm:$0xff]   ;;  %875 = vmatprep.mubr.bf16.mxu0 %v2505_v44  ;;  %v2506_v52 = vld [vmem:[%s2802_s21 + $0x80] ss:$8 sps:$4 sm:$0xff]   ;;  %v2511_v54 = vld [vmem:[%s2802_s21 + $0x94] ss:$8 sps:$4 sm:$0xff]  }
  0x4f   : > { %2161 = vmatpush3.bf16.msra.mxu0 %v2490_v36  ;;  %2423 = vmatpush3.bf16.msra.mxu1 %v2490_v36  ;;  %v2499_v47 = vld [vmem:[%s2795_s14 + $0x48] sm:$0xff]   ;;  %v2501_v49 = vld [vmem:[%s2795_s14 + $0x40] sm:$0xff]   ;;  %v2513_v55 = vld [vmem:[%s2802_s21 + $0x10] ss:$8 sps:$4 sm:$0xff]  }
  0x50   : > { %2162 = vmatprep.subr.bf16.mxu0 %v2491_v37  ;;  %2416 = vmatprep.subr.bf16.mxu1 %v2491_v37  ;;  %v2500_v48 = vld [vmem:[%s2795_s14 + $0x8] sm:$0xff]   ;;  %v2502_v50 = vld [vmem:[%s2795_s14] sm:$0xff]   ;;  %v2514_v56 = vld [vmem:[%s2802_s21 + $0x90] ss:$8 sps:$4 sm:$0xff]  }
  0x51   : > { %939 = vmatprep.mubr.bf16.mxu1 %v2508_v45  ;;  %v2515_v57 = vld [vmem:[%s2802_s21 + $0x24] ss:$8 sps:$4 sm:$0xff]   ;;  %v2519_v59 = vld [vmem:[%s2802_s21 + $0x20] ss:$8 sps:$4 sm:$0xff]   ;;  %v2521_v61 = vld [vmem:[%s2802_s21 + $0x34] ss:$8 sps:$4 sm:$0xff]  }
  0x52   : > { %v2517_v58 = vld [vmem:[%s2802_s21 + $0xa4] ss:$8 sps:$4 sm:$0xff]   ;;  %v2520_v60 = vld [vmem:[%s2802_s21 + $0xa0] ss:$8 sps:$4 sm:$0xff]   ;;  %v2523_v62 = vld [vmem:[%s2802_s21 + $0xb4] ss:$8 sps:$4 sm:$0xff]  }
  0x53   : > { %2163 = vmatpush3.bf16.msra.mxu0 %v2492_v38  ;;  %2424 = vmatpush3.bf16.msra.mxu1 %v2492_v38  ;;  %v2525_v63 = vld [vmem:[%s2802_s21 + $0x30] ss:$8 sps:$4 sm:$0xff]   ;;  %v2527_v1 = vld [vmem:[%s2802_s21 + $0x44] ss:$8 sps:$4 sm:$0xff]   ;;  %v2531_v3 = vld [vmem:[%s2802_s21 + $0x40] ss:$8 sps:$4 sm:$0xff]  }
  0x54   : > { %2164 = vmatprep.subr.bf16.mxu0 %v2493_v39  ;;  %2417 = vmatprep.subr.bf16.mxu1 %v2493_v39  ;;  %v2526_v0 = vld [vmem:[%s2802_s21 + $0xb0] ss:$8 sps:$4 sm:$0xff]   ;;  %v2529_v2 = vld [vmem:[%s2802_s21 + $0xc4] ss:$8 sps:$4 sm:$0xff]   ;;  %v2532_v4 = vld [vmem:[%s2802_s21 + $0xc0] ss:$8 sps:$4 sm:$0xff]  }
  0x55   : > { %v2533_v5 = vld [vmem:[%s2802_s21 + $0x54] ss:$8 sps:$4 sm:$0xff]   ;;  %v2537_v7 = vld [vmem:[%s2802_s21 + $0x50] ss:$8 sps:$4 sm:$0xff]   ;;  %v2539_v9 = vld [vmem:[%s2802_s21 + $0x64] ss:$8 sps:$4 sm:$0xff]  }
  0x56   : > { %v2535_v6 = vld [vmem:[%s2802_s21 + $0xd4] ss:$8 sps:$4 sm:$0xff]   ;;  %v2538_v8 = vld [vmem:[%s2802_s21 + $0xd0] ss:$8 sps:$4 sm:$0xff]   ;;  %v2541_v10 = vld [vmem:[%s2802_s21 + $0xe4] ss:$8 sps:$4 sm:$0xff]  }
  0x57   : > { %2165 = vmatpush3.bf16.msra.mxu0 %v2494_v40  ;;  %2425 = vmatpush3.bf16.msra.mxu1 %v2494_v40  ;;  %v2543_v11 = vld [vmem:[%s2802_s21 + $0x60] ss:$8 sps:$4 sm:$0xff]   ;;  %v2545_v13 = vld [vmem:[%s2802_s21 + $0x74] ss:$8 sps:$4 sm:$0xff]   ;;  %v2549_v15 = vld [vmem:[%s2802_s21 + $0x70] ss:$8 sps:$4 sm:$0xff]  }
  0x58   : > { %2166 = vmatprep.subr.bf16.mxu0 %v2495_v41  ;;  %2418 = vmatprep.subr.bf16.mxu1 %v2495_v41  ;;  %v2544_v12 = vld [vmem:[%s2802_s21 + $0xe0] ss:$8 sps:$4 sm:$0xff]   ;;  %v2547_v14 = vld [vmem:[%s2802_s21 + $0xf4] ss:$8 sps:$4 sm:$0xff]   ;;  %v2550_v16 = vld [vmem:[%s2802_s21 + $0xf0] ss:$8 sps:$4 sm:$0xff]  }
  0x59   : > { %v491_v19 = vld [vmem:[#allocation2 + $0xb0] sm:$0xff]  ;;  %v507_v21 = vld [vmem:[#allocation2 + $0x38] sm:$0xff]  ;;  %v492_v29 = vld [vmem:[#allocation2] sm:$0xff] }
  0x5a   : > { %v508_v31 = vld [vmem:[#allocation2 + $0x58] sm:$0xff]  ;;  %v509_v41 = vld [vmem:[#allocation2 + $0x40] sm:$0xff] }
  0x5b   : > { %2167 = vmatpush3.bf16.msra.mxu0 %v2496_v42  ;;  %2426 = vmatpush3.bf16.msra.mxu1 %v2496_v42  ;;  %v493_v39 = vld [vmem:[#allocation2 + $0xd8] sm:$0xff] }
  0x5c   : > { %2168 = vmatprep.subr.bf16.mxu0 %v2497_v43  ;;  %2419 = vmatprep.subr.bf16.mxu1 %v2497_v43 }
  0x5f   : > { %2169 = vmatpush3.bf16.msra.mxu0 %v2498_v46  ;;  %2427 = vmatpush3.bf16.msra.mxu1 %v2498_v46 }
  0x60   : > { %2170 = vmatprep.subr.bf16.mxu0 %v2499_v47  ;;  %2420 = vmatprep.subr.bf16.mxu1 %v2499_v47 }
  0x63   : > { %2171 = vmatpush3.bf16.msra.mxu0 %v2500_v48  ;;  %2428 = vmatpush3.bf16.msra.mxu1 %v2500_v48 }
  0x64   : > { %2172 = vmatprep.subr.bf16.mxu0 %v2501_v49  ;;  %2421 = vmatprep.subr.bf16.mxu1 %v2501_v49  ;;  %v494_v49 = vld [vmem:[#allocation2 + $0x18] sm:$0xff] }
  0x67   : > { %2173 = vmatpush3.bf16.msra.mxu0 %v2502_v50  ;;  %2429 = vmatpush3.bf16.msra.mxu1 %v2502_v50 }
  0x6a   : > { %876 = vmatmul.mubr.bf16.vlgmr.msra.gmra.mxu0 %v2503_v51  ;;  %940 = vmatmul.mubr.bf16.vlgmr.msra.gmra.mxu1 %v2506_v52  ;;  %v510_v51 = vld [vmem:[#allocation2 + $0xc8] sm:$0xff] }
  0x6b   : > { %883 = vmatprep.mubr.bf16.mxu0 %v2509_v53  ;;  %947 = vmatprep.mubr.bf16.mxu1 %v2511_v54 }
  0x72   : > { %884 = vmatmul.mubr.bf16.gmra.mxu0 %v2513_v55  ;;  %948 = vmatmul.mubr.bf16.gmra.mxu1 %v2514_v56 }
  0x73   : > { %891 = vmatprep.mubr.bf16.mxu0 %v2515_v57  ;;  %955 = vmatprep.mubr.bf16.mxu1 %v2517_v58 }
  0x7a   : > { %892 = vmatmul.mubr.bf16.gmra.mxu0 %v2519_v59  ;;  %956 = vmatmul.mubr.bf16.gmra.mxu1 %v2520_v60  ;;  %v495_v59 = vld [vmem:[#allocation2 + $0x50] sm:$0xff] }
  0x7b   : > { %899 = vmatprep.mubr.bf16.mxu0 %v2521_v61  ;;  %963 = vmatprep.mubr.bf16.mxu1 %v2523_v62  ;;  %v511_v61 = vld [vmem:[#allocation2 + $0xe0] sm:$0xff] }
  0x82   : > { %900 = vmatmul.mubr.bf16.gmra.mxu0 %v2525_v63  ;;  %964 = vmatmul.mubr.bf16.gmra.mxu1 %v2526_v0 }
  0x83   : > { %907 = vmatprep.mubr.bf16.mxu0 %v2527_v1  ;;  %971 = vmatprep.mubr.bf16.mxu1 %v2529_v2 }
  0x8a   : > { %908 = vmatmul.mubr.bf16.gmra.mxu0 %v2531_v3  ;;  %972 = vmatmul.mubr.bf16.gmra.mxu1 %v2532_v4 }
  0x8b   : > { %915 = vmatprep.mubr.bf16.mxu0 %v2533_v5  ;;  %979 = vmatprep.mubr.bf16.mxu1 %v2535_v6  ;;  %v496_v5 = vld [vmem:[#allocation2 + $0x68] sm:$0xff] }
  0x92   : > { %916 = vmatmul.mubr.bf16.gmra.mxu0 %v2537_v7  ;;  %980 = vmatmul.mubr.bf16.gmra.mxu1 %v2538_v8  ;;  %v512_v7 = vld [vmem:[#allocation2 + $0x90] sm:$0xff] }
  0x93   : > { %923 = vmatprep.mubr.bf16.mxu0 %v2539_v9  ;;  %987 = vmatprep.mubr.bf16.mxu1 %v2541_v10 }
  0x9a   : > { %924 = vmatmul.mubr.bf16.gmra.mxu0 %v2543_v11  ;;  %988 = vmatmul.mubr.bf16.gmra.mxu1 %v2544_v12 }
  0x9b   : > { %931 = vmatprep.mubr.bf16.mxu0 %v2545_v13  ;;  %995 = vmatprep.mubr.bf16.mxu1 %v2547_v14 }
  0xa2   : > { %932 = vmatmul.mubr.bf16.gmra.mxu0 %v2549_v15  ;;  %996 = vmatmul.mubr.bf16.gmra.mxu1 %v2550_v16  ;;  %v497_v15 = vld [vmem:[#allocation2 + $0x30] sm:$0xff] }
 0x12a   : > { %v2174_v17 = vpop.f32.mrf.mxu0  ;;  %v2222_v18 = vpop.f32.mrf.mxu1 }
 0x12c   : > { %v2175_v20 = vpop.f32.mrf.mxu0  ;;  %v2223_v22 = vpop.f32.mrf.mxu1 }
 0x12d   : > { %v2176_v23 = vadd.f32 %v2175_v20, %v2174_v17  ;;  %v2224_v24 = vadd.f32 %v2223_v22, %v2222_v18  ;;  %v513_v17 = vld [vmem:[#allocation2 + $0x70] sm:$0xff] }
 0x12e   : > { %v2177_v25 = vpop.f32.mrf.mxu0  ;;  %v2225_v26 = vpop.f32.mrf.mxu1 }
 0x12f   : > { %v1004_v27 = vadd.f32 %v2176_v23, %v491_v19  ;;  %v1020_v28 = vadd.f32 %v2224_v24, %v507_v21 }
 0x130   : > { %v2178_v30 = vpop.f32.mrf.mxu0  ;;  %v2226_v32 = vpop.f32.mrf.mxu1 }
 0x131   : > { %1036 = vst [vmem:[#allocation2 + $0xb0] sm:$0xff] %v1004_v27  ;;  %1052 = vst [vmem:[#allocation2 + $0x38] sm:$0xff] %v1020_v28  ;;  %v2179_v33 = vadd.f32 %v2178_v30, %v2177_v25  ;;  %v2227_v34 = vadd.f32 %v2226_v32, %v2225_v26  ;;  %v498_v25 = vld [vmem:[#allocation2 + $0x48] sm:$0xff]  ;;  %v514_v27 = vld [vmem:[#allocation2 + $0xc0] sm:$0xff] }
 0x132   : > { %v2180_v35 = vpop.f32.mrf.mxu0  ;;  %v2228_v36 = vpop.f32.mrf.mxu1 }
 0x133   : > { %v1005_v37 = vadd.f32 %v2179_v33, %v492_v29  ;;  %v1021_v38 = vadd.f32 %v2227_v34, %v508_v31 }
 0x134   : > { %v2181_v40 = vpop.f32.mrf.mxu0  ;;  %v2229_v42 = vpop.f32.mrf.mxu1 }
 0x135   : > { %1037 = vst [vmem:[#allocation2] sm:$0xff] %v1005_v37  ;;  %1053 = vst [vmem:[#allocation2 + $0x58] sm:$0xff] %v1021_v38  ;;  %v2182_v43 = vadd.f32 %v2181_v40, %v2180_v35  ;;  %v2230_v44 = vadd.f32 %v2229_v42, %v2228_v36  ;;  %v499_v35 = vld [vmem:[#allocation2 + $0x80] sm:$0xff]  ;;  %v515_v37 = vld [vmem:[#allocation2 + $0xa8] sm:$0xff] }
 0x136   : > { %v2183_v45 = vpop.f32.mrf.mxu0  ;;  %v2231_v46 = vpop.f32.mrf.mxu1 }
 0x137   : > { %v1006_v47 = vadd.f32 %v2182_v43, %v493_v39  ;;  %v1022_v48 = vadd.f32 %v2230_v44, %v509_v41 }
 0x138   : > { %v2184_v50 = vpop.f32.mrf.mxu0  ;;  %v2232_v52 = vpop.f32.mrf.mxu1 }
 0x139   : > { %1038 = vst [vmem:[#allocation2 + $0xd8] sm:$0xff] %v1006_v47  ;;  %1054 = vst [vmem:[#allocation2 + $0x40] sm:$0xff] %v1022_v48  ;;  %v2185_v53 = vadd.f32 %v2184_v50, %v2183_v45  ;;  %v2233_v54 = vadd.f32 %v2232_v52, %v2231_v46  ;;  %v500_v45 = vld [vmem:[#allocation2 + $0x88] sm:$0xff]  ;;  %v516_v47 = vld [vmem:[#allocation2 + $0xd0] sm:$0xff] }
 0x13a   : > { %v2186_v55 = vpop.f32.mrf.mxu0  ;;  %v2234_v56 = vpop.f32.mrf.mxu1 }
 0x13b   : > { %v1007_v57 = vadd.f32 %v2185_v53, %v494_v49  ;;  %v1023_v58 = vadd.f32 %v2233_v54, %v510_v51 }
 0x13c   : > { %v2187_v60 = vpop.f32.mrf.mxu0  ;;  %v2235_v62 = vpop.f32.mrf.mxu1 }
 0x13d   : > { %1039 = vst [vmem:[#allocation2 + $0x18] sm:$0xff] %v1007_v57  ;;  %1055 = vst [vmem:[#allocation2 + $0xc8] sm:$0xff] %v1023_v58  ;;  %v2188_v63 = vadd.f32 %v2187_v60, %v2186_v55  ;;  %v2236_v0 = vadd.f32 %v2235_v62, %v2234_v56  ;;  %v501_v55 = vld [vmem:[#allocation2 + $0xe8] sm:$0xff]  ;;  %v517_v57 = vld [vmem:[#allocation2 + $0x10] sm:$0xff] }
 0x13e   : > { %v2189_v1 = vpop.f32.mrf.mxu0  ;;  %v2237_v2 = vpop.f32.mrf.mxu1 }
 0x13f   : > { %v1008_v3 = vadd.f32 %v2188_v63, %v495_v59  ;;  %v1024_v4 = vadd.f32 %v2236_v0, %v511_v61 }
 0x140   : > { %v2190_v6 = vpop.f32.mrf.mxu0  ;;  %v2238_v8 = vpop.f32.mrf.mxu1 }
 0x141   : > { %1040 = vst [vmem:[#allocation2 + $0x50] sm:$0xff] %v1008_v3  ;;  %1056 = vst [vmem:[#allocation2 + $0xe0] sm:$0xff] %v1024_v4  ;;  %v2191_v9 = vadd.f32 %v2190_v6, %v2189_v1  ;;  %v2239_v10 = vadd.f32 %v2238_v8, %v2237_v2  ;;  %v502_v1 = vld [vmem:[#allocation2 + $0xb8] sm:$0xff]  ;;  %v518_v3 = vld [vmem:[#allocation2 + $0x28] sm:$0xff] }
 0x142   : > { %v2192_v11 = vpop.f32.mrf.mxu0  ;;  %v2240_v12 = vpop.f32.mrf.mxu1 }
 0x143   : > { %v1009_v13 = vadd.f32 %v2191_v9, %v496_v5  ;;  %v1025_v14 = vadd.f32 %v2239_v10, %v512_v7 }
 0x144   : > { %v2193_v16 = vpop.f32.mrf.mxu0  ;;  %v2241_v18 = vpop.f32.mrf.mxu1 }
 0x145   : > { %1041 = vst [vmem:[#allocation2 + $0x68] sm:$0xff] %v1009_v13  ;;  %1057 = vst [vmem:[#allocation2 + $0x90] sm:$0xff] %v1025_v14  ;;  %v2194_v19 = vadd.f32 %v2193_v16, %v2192_v11  ;;  %v2242_v20 = vadd.f32 %v2241_v18, %v2240_v12  ;;  %v503_v11 = vld [vmem:[#allocation2 + $0x60] sm:$0xff] }
 0x146   : > { %v2195_v21 = vpop.f32.mrf.mxu0  ;;  %v2243_v22 = vpop.f32.mrf.mxu1  ;;  %v519_v13 = vld [vmem:[#allocation2 + $0xa0] sm:$0xff] }
 0x147   : > { %v1010_v23 = vadd.f32 %v2194_v19, %v497_v15  ;;  %v1026_v24 = vadd.f32 %v2242_v20, %v513_v17 }
 0x148   : > { %v2196_v26 = vpop.f32.mrf.mxu0  ;;  %v2244_v28 = vpop.f32.mrf.mxu1 }
 0x149   : > { %1042 = vst [vmem:[#allocation2 + $0x30] sm:$0xff] %v1010_v23  ;;  %1058 = vst [vmem:[#allocation2 + $0x70] sm:$0xff] %v1026_v24  ;;  %v2197_v29 = vadd.f32 %v2196_v26, %v2195_v21  ;;  %v2245_v30 = vadd.f32 %v2244_v28, %v2243_v22  ;;  %v504_v21 = vld [vmem:[#allocation2 + $0xf0] sm:$0xff]  ;;  %v520_v23 = vld [vmem:[#allocation2 + $0xf8] sm:$0xff] }
 0x14a   : > { %v2198_v31 = vpop.f32.mrf.mxu0  ;;  %v2246_v32 = vpop.f32.mrf.mxu1 }
 0x14b   : > { %v1011_v33 = vadd.f32 %v2197_v29, %v498_v25  ;;  %v1027_v34 = vadd.f32 %v2245_v30, %v514_v27 }
 0x14c   : > { %v2199_v36 = vpop.f32.mrf.mxu0  ;;  %v2247_v38 = vpop.f32.mrf.mxu1 }
 0x14d   : > { %1043 = vst [vmem:[#allocation2 + $0x48] sm:$0xff] %v1011_v33  ;;  %1059 = vst [vmem:[#allocation2 + $0xc0] sm:$0xff] %v1027_v34  ;;  %v2200_v39 = vadd.f32 %v2199_v36, %v2198_v31  ;;  %v2248_v40 = vadd.f32 %v2247_v38, %v2246_v32  ;;  %v505_v31 = vld [vmem:[#allocation2 + $0x8] sm:$0xff]  ;;  %v521_v33 = vld [vmem:[#allocation2 + $0x20] sm:$0xff] }
 0x14e   : > { %v2201_v41 = vpop.f32.mrf.mxu0  ;;  %v2249_v42 = vpop.f32.mrf.mxu1 }
 0x14f   : > { %v1012_v43 = vadd.f32 %v2200_v39, %v499_v35  ;;  %v1028_v44 = vadd.f32 %v2248_v40, %v515_v37 }
 0x150   : > { %v2202_v46 = vpop.f32.mrf.mxu0  ;;  %v2250_v48 = vpop.f32.mrf.mxu1 }
 0x151   : > { %1044 = vst [vmem:[#allocation2 + $0x80] sm:$0xff] %v1012_v43  ;;  %1060 = vst [vmem:[#allocation2 + $0xa8] sm:$0xff] %v1028_v44  ;;  %v2203_v49 = vadd.f32 %v2202_v46, %v2201_v41  ;;  %v2251_v50 = vadd.f32 %v2250_v48, %v2249_v42  ;;  %v506_v41 = vld [vmem:[#allocation2 + $0x78] sm:$0xff] }
 0x152   : > { %v2204_v51 = vpop.f32.mrf.mxu0  ;;  %v2252_v52 = vpop.f32.mrf.mxu1  ;;  %v522_v43 = vld [vmem:[#allocation2 + $0x98] sm:$0xff] }
 0x153   : > { %v1013_v53 = vadd.f32 %v2203_v49, %v500_v45  ;;  %v1029_v54 = vadd.f32 %v2251_v50, %v516_v47 }
 0x154   : > { %v2205_v56 = vpop.f32.mrf.mxu0  ;;  %v2253_v58 = vpop.f32.mrf.mxu1 }
 0x155   : > { %1045 = vst [vmem:[#allocation2 + $0x88] sm:$0xff] %v1013_v53  ;;  %1061 = vst [vmem:[#allocation2 + $0xd0] sm:$0xff] %v1029_v54  ;;  %v2206_v59 = vadd.f32 %v2205_v56, %v2204_v51  ;;  %v2254_v60 = vadd.f32 %v2253_v58, %v2252_v52 }
 0x156   : > { %v2207_v61 = vpop.f32.mrf.mxu0  ;;  %v2255_v62 = vpop.f32.mrf.mxu1 }
 0x157   : > { %v1014_v63 = vadd.f32 %v2206_v59, %v501_v55  ;;  %v1030_v0 = vadd.f32 %v2254_v60, %v517_v57 }
 0x158   : > { %v2208_v2 = vpop.f32.mrf.mxu0  ;;  %v2256_v4 = vpop.f32.mrf.mxu1 }
 0x159   : > { %1046 = vst [vmem:[#allocation2 + $0xe8] sm:$0xff] %v1014_v63  ;;  %1062 = vst [vmem:[#allocation2 + $0x10] sm:$0xff] %v1030_v0  ;;  %v2209_v5 = vadd.f32 %v2208_v2, %v2207_v61  ;;  %v2257_v6 = vadd.f32 %v2256_v4, %v2255_v62 }
 0x15a   : > { %v2210_v7 = vpop.f32.mrf.mxu0  ;;  %v2258_v8 = vpop.f32.mrf.mxu1 }
 0x15b   : > { %v1015_v9 = vadd.f32 %v2209_v5, %v502_v1  ;;  %v1031_v10 = vadd.f32 %v2257_v6, %v518_v3 }
 0x15c   : > { %v2211_v12 = vpop.f32.mrf.mxu0  ;;  %v2259_v14 = vpop.f32.mrf.mxu1 }
 0x15d   : > { %1047 = vst [vmem:[#allocation2 + $0xb8] sm:$0xff] %v1015_v9  ;;  %1063 = vst [vmem:[#allocation2 + $0x28] sm:$0xff] %v1031_v10  ;;  %v2212_v15 = vadd.f32 %v2211_v12, %v2210_v7  ;;  %v2260_v16 = vadd.f32 %v2259_v14, %v2258_v8 }
 0x15e   : > { %v2213_v17 = vpop.f32.mrf.mxu0  ;;  %v2261_v18 = vpop.f32.mrf.mxu1 }
 0x15f   : > { %v1016_v19 = vadd.f32 %v2212_v15, %v503_v11  ;;  %v1032_v20 = vadd.f32 %v2260_v16, %v519_v13 }
 0x160   : > { %v2214_v22 = vpop.f32.mrf.mxu0  ;;  %v2262_v24 = vpop.f32.mrf.mxu1 }
 0x161   : > { %1048 = vst [vmem:[#allocation2 + $0x60] sm:$0xff] %v1016_v19  ;;  %1064 = vst [vmem:[#allocation2 + $0xa0] sm:$0xff] %v1032_v20  ;;  %v2215_v25 = vadd.f32 %v2214_v22, %v2213_v17  ;;  %v2263_v26 = vadd.f32 %v2262_v24, %v2261_v18 }
 0x162   : > { %v2216_v27 = vpop.f32.mrf.mxu0  ;;  %v2264_v28 = vpop.f32.mrf.mxu1 }
 0x163   : > { %v1017_v29 = vadd.f32 %v2215_v25, %v504_v21  ;;  %v1033_v30 = vadd.f32 %v2263_v26, %v520_v23 }
 0x164   : > { %v2217_v32 = vpop.f32.mrf.mxu0  ;;  %v2265_v34 = vpop.f32.mrf.mxu1 }
 0x165   : > { %1049 = vst [vmem:[#allocation2 + $0xf0] sm:$0xff] %v1017_v29  ;;  %1065 = vst [vmem:[#allocation2 + $0xf8] sm:$0xff] %v1033_v30  ;;  %v2218_v35 = vadd.f32 %v2217_v32, %v2216_v27  ;;  %v2266_v36 = vadd.f32 %v2265_v34, %v2264_v28 }
 0x166   : > { %v2219_v37 = vpop.f32.mrf.mxu0  ;;  %v2267_v38 = vpop.f32.mrf.mxu1 }
 0x167   : > { %v1018_v39 = vadd.f32 %v2218_v35, %v505_v31  ;;  %v1034_v40 = vadd.f32 %v2266_v36, %v521_v33 }
 0x168   : > { %v2220_v42 = vpop.f32.mrf.mxu0  ;;  %v2268_v44 = vpop.f32.mrf.mxu1 }
 0x169   : > { %1050 = vst [vmem:[#allocation2 + $0x8] sm:$0xff] %v1018_v39  ;;  %1066 = vst [vmem:[#allocation2 + $0x20] sm:$0xff] %v1034_v40  ;;  %v2221_v45 = vadd.f32 %v2220_v42, %v2219_v37  ;;  %v2269_v46 = vadd.f32 %v2268_v44, %v2267_v38  ;;  %1071 = sbr.rel (%p1977_p13) target bundleno = 867 (0x363), region = 90 }
 0x16b   : > { %v1019_v47 = vadd.f32 %v2221_v45, %v506_v41  ;;  %v1035_v48 = vadd.f32 %v2269_v46, %v522_v43 }
 0x16d   : > { %1051 = vst [vmem:[#allocation2 + $0x78] sm:$0xff] %v1019_v47  ;;  %1067 = vst [vmem:[#allocation2 + $0x98] sm:$0xff] %v1035_v48 }
 0x16e   : > { %v2551_v49 = vld [vmem:[%s3015_s2 + $0x38] sm:$0xff]   ;;  %v2552_v50 = vld [vmem:[%s3015_s2 + $0x30] sm:$0xff]   ;;  %v2553_v51 = vld [vmem:[%s3015_s2 + $0x28] sm:$0xff]  }
 0x16f   : > { %2318 = vmatprep.subr.bf16.mxu0 %v2551_v49  ;;  %v2554_v52 = vld [vmem:[%s3015_s2 + $0x20] sm:$0xff]   ;;  %v1072_v53 = vld [vmem:[#allocation2 + $0xb0] sm:$0xff]  ;;  %v2555_v56 = vld [vmem:[%s3015_s2 + $0x18] sm:$0xff]  }
 0x170   : > { %2319 = vmatpush3.bf16.msra.mxu0 %v2551_v49  ;;  %v1073_v54 = vld [vmem:[#allocation2] sm:$0xff]  ;;  %v2556_v57 = vld [vmem:[%s3015_s2 + $0x10] sm:$0xff]   ;;  %v2557_v58 = vld [vmem:[%s3015_s2 + $0x8] sm:$0xff]  }
 0x171   : > { %2320 = vmatprep.subr.bf16.mxu0 %v2552_v50  ;;  %v1104_v55 = vpack.c.bf16 %v1073_v54, %v1072_v53  ;;  %v2559_v59 = vld [vmem:[%s3017_s4 + $0x38] sm:$0xff]   ;;  %v2560_v60 = vld [vmem:[%s3017_s4 + $0x30] sm:$0xff]   ;;  %v2558_v61 = vld [vmem:[%s3015_s2] sm:$0xff]  }
 0x172   : > { %2366 = vmatprep.subr.bf16.mxu1 %v2559_v59  ;;  %v2561_v62 = vld [vmem:[%s3017_s4 + $0x28] sm:$0xff]   ;;  %v1074_v63 = vld [vmem:[#allocation2 + $0xd8] sm:$0xff]  ;;  %v2562_v1 = vld [vmem:[%s3017_s4 + $0x20] sm:$0xff]  }
 0x173   : > { %2334 = vmatprep.mubr.bf16.mxu0 %v1104_v55  ;;  %2367 = vmatpush3.bf16.msra.mxu1 %v2559_v59  ;;  %v1075_v0 = vld [vmem:[#allocation2 + $0x18] sm:$0xff]  ;;  %v1076_v2 = vld [vmem:[#allocation2 + $0x50] sm:$0xff]  ;;  %v1077_v3 = vld [vmem:[#allocation2 + $0x68] sm:$0xff] }
 0x174   : > { %2321 = vmatpush3.bf16.msra.mxu0 %v2552_v50  ;;  %2368 = vmatprep.subr.bf16.mxu1 %v2560_v60  ;;  %v1105_v4 = vpack.c.bf16 %v1075_v0, %v1074_v63  ;;  %v1106_v5 = vpack.c.bf16 %v1077_v3, %v1076_v2  ;;  %v2563_v6 = vld [vmem:[%s3017_s4 + $0x18] sm:$0xff]   ;;  %v1078_v7 = vld [vmem:[#allocation2 + $0x30] sm:$0xff]  ;;  %v1079_v8 = vld [vmem:[#allocation2 + $0x48] sm:$0xff] }
 0x175   : > { %2322 = vmatprep.subr.bf16.mxu0 %v2553_v51  ;;  %v1080_v9 = vld [vmem:[#allocation2 + $0x80] sm:$0xff]  ;;  %v1081_v10 = vld [vmem:[#allocation2 + $0x88] sm:$0xff]  ;;  %v1107_v11 = vpack.c.bf16 %v1079_v8, %v1078_v7  ;;  %v1083_v14 = vld [vmem:[#allocation2 + $0xb8] sm:$0xff] }
 0x176   : > { %v1108_v12 = vpack.c.bf16 %v1081_v10, %v1080_v9  ;;  %v1082_v13 = vld [vmem:[#allocation2 + $0xe8] sm:$0xff]  ;;  %v1084_v15 = vld [vmem:[#allocation2 + $0x60] sm:$0xff]  ;;  %v1085_v16 = vld [vmem:[#allocation2 + $0xf0] sm:$0xff] }
 0x177   : > { %2369 = vmatpush3.bf16.msra.mxu1 %v2560_v60  ;;  %v1109_v17 = vpack.c.bf16 %v1083_v14, %v1082_v13  ;;  %v1110_v18 = vpack.c.bf16 %v1085_v16, %v1084_v15  ;;  %v1086_v19 = vld [vmem:[#allocation2 + $0x8] sm:$0xff]  ;;  %v1087_v20 = vld [vmem:[#allocation2 + $0x78] sm:$0xff]  ;;  %v1090_v25 = vld [vmem:[#allocation2 + $0x40] sm:$0xff] }
 0x178   : > { %2323 = vmatpush3.bf16.msra.mxu0 %v2553_v51  ;;  %2370 = vmatprep.subr.bf16.mxu1 %v2561_v62  ;;  %v1088_v21 = vld [vmem:[#allocation2 + $0x38] sm:$0xff]  ;;  %v1111_v23 = vpack.c.bf16 %v1087_v20, %v1086_v19  ;;  %v1091_v26 = vld [vmem:[#allocation2 + $0xc8] sm:$0xff]  ;;  %v1092_v27 = vld [vmem:[#allocation2 + $0xe0] sm:$0xff] }
 0x179   : > { %2324 = vmatprep.subr.bf16.mxu0 %v2554_v52  ;;  %v1089_v22 = vld [vmem:[#allocation2 + $0x58] sm:$0xff]  ;;  %v1093_v28 = vld [vmem:[#allocation2 + $0x90] sm:$0xff]  ;;  %v1113_v29 = vpack.c.bf16 %v1091_v26, %v1090_v25  ;;  %v1095_v32 = vld [vmem:[#allocation2 + $0xc0] sm:$0xff] }
 0x17a   : > { %v1112_v24 = vpack.c.bf16 %v1089_v22, %v1088_v21  ;;  %v1114_v30 = vpack.c.bf16 %v1093_v28, %v1092_v27  ;;  %v1094_v31 = vld [vmem:[#allocation2 + $0x70] sm:$0xff]  ;;  %v1096_v33 = vld [vmem:[#allocation2 + $0xa8] sm:$0xff]  ;;  %v1100_v39 = vld [vmem:[#allocation2 + $0xa0] sm:$0xff] }
 0x17b   : > { %2371 = vmatpush3.bf16.msra.mxu1 %v2561_v62  ;;  %v1097_v34 = vld [vmem:[#allocation2 + $0xd0] sm:$0xff]  ;;  %v1115_v35 = vpack.c.bf16 %v1095_v32, %v1094_v31  ;;  %v1099_v38 = vld [vmem:[#allocation2 + $0x28] sm:$0xff]  ;;  %v1101_v40 = vld [vmem:[#allocation2 + $0xf8] sm:$0xff] }
 0x17c   : > { %2325 = vmatpush3.bf16.msra.mxu0 %v2554_v52  ;;  %2372 = vmatprep.subr.bf16.mxu1 %v2562_v1  ;;  %v1116_v36 = vpack.c.bf16 %v1097_v34, %v1096_v33  ;;  %v1098_v37 = vld [vmem:[#allocation2 + $0x10] sm:$0xff]  ;;  %v1118_v42 = vpack.c.bf16 %v1101_v40, %v1100_v39  ;;  %v1102_v43 = vld [vmem:[#allocation2 + $0x20] sm:$0xff]  ;;  %v1103_v44 = vld [vmem:[#allocation2 + $0x98] sm:$0xff] }
 0x17d   : > { %2326 = vmatprep.subr.bf16.mxu0 %v2555_v56  ;;  %v1117_v41 = vpack.c.bf16 %v1099_v38, %v1098_v37  ;;  %v1119_v45 = vpack.c.bf16 %v1103_v44, %v1102_v43  ;;  %v2564_v46 = vld [vmem:[%s3017_s4 + $0x10] sm:$0xff]   ;;  %v2565_v47 = vld [vmem:[%s3017_s4 + $0x8] sm:$0xff]   ;;  %v2566_v48 = vld [vmem:[%s3017_s4] sm:$0xff]  }
 0x17e   : > { %v2905_v51 = vld [vmem:[%s3016_s3] ss:$0 sm:$0xff] }
 0x17f   : > { %2373 = vmatpush3.bf16.msra.mxu1 %v2562_v1 }
 0x180   : > { %2327 = vmatpush3.bf16.msra.mxu0 %v2555_v56  ;;  %2374 = vmatprep.subr.bf16.mxu1 %v2563_v6 }
 0x181   : > { %2328 = vmatprep.subr.bf16.mxu0 %v2556_v57 }
 0x183   : > { %2375 = vmatpush3.bf16.msra.mxu1 %v2563_v6 }
 0x184   : > { %2329 = vmatpush3.bf16.msra.mxu0 %v2556_v57  ;;  %2376 = vmatprep.subr.bf16.mxu1 %v2564_v46 }
 0x185   : > { %2330 = vmatprep.subr.bf16.mxu0 %v2557_v58 }
 0x187   : > { %2377 = vmatpush3.bf16.msra.mxu1 %v2564_v46 }
 0x188   : > { %2331 = vmatpush3.bf16.msra.mxu0 %v2557_v58  ;;  %2378 = vmatprep.subr.bf16.mxu1 %v2565_v47 }
 0x189   : > { %2332 = vmatprep.subr.bf16.mxu0 %v2558_v61 }
 0x18b   : > { %2379 = vmatpush3.bf16.msra.mxu1 %v2565_v47 }
 0x18c   : > { %2333 = vmatpush3.bf16.msra.mxu0 %v2558_v61  ;;  %2380 = vmatprep.subr.bf16.mxu1 %v2566_v48 }
 0x18f   : > { %2335 = vmatmul.mubr.bf16.vlgmr.msra.gmra.mxu0 %v1105_v4  ;;  %2381 = vmatpush3.bf16.msra.mxu1 %v2566_v48 }
 0x190   : > { %2338 = vmatprep.mubr.bf16.mxu0 %v1106_v5 }
 0x197   : > { %2339 = vmatmul.mubr.bf16.gmra.mxu0 %v1107_v11 }
 0x198   : > { %2342 = vmatprep.mubr.bf16.mxu0 %v1108_v12 }
 0x19f   : > { %2343 = vmatmul.mubr.bf16.gmra.mxu0 %v1109_v17 }
 0x1a0   : > { %2346 = vmatprep.mubr.bf16.mxu0 %v1110_v18 }
 0x1a7   : > { %2347 = vmatmul.mubr.bf16.gmra.mxu0 %v1111_v23 }
 0x1a8   : > { %2350 = vmatprep.mubr.bf16.mxu0 %v1112_v24 }
 0x1af   : > { %2351 = vmatmul.mubr.bf16.gmra.mxu0 %v1113_v29 }
 0x1b0   : > { %2354 = vmatprep.mubr.bf16.mxu0 %v1114_v30 }
 0x1b7   : > { %2355 = vmatmul.mubr.bf16.gmra.mxu0 %v1115_v35 }
 0x1b8   : > { %2358 = vmatprep.mubr.bf16.mxu0 %v1116_v36 }
 0x1bf   : > { %2359 = vmatmul.mubr.bf16.gmra.mxu0 %v1117_v41 }
 0x1c0   : > { %2362 = vmatprep.mubr.bf16.mxu0 %v1118_v42 }
 0x1c7   : > { %2363 = vmatmul.mubr.bf16.gmra.mxu0 %v1119_v45 }
 0x24f   : > { %v2336_v49 = vpop.f32.mrf.mxu0 }
 0x250   : > { %v1234_v55 = vadd.f32 %v2336_v49, %v2905_v51 }
 0x251   : > { %v1225_v50 = vpop.f32.mrf.mxu0 }
 0x252   : > { %v1226_v53 = vadd.f32 %v2905_v51, %v1225_v50  ;;  %v1354_v62 = vmax.f32 %v1234_v55, 0.0 }
 0x253   : > { %v2337_v52 = vpop.f32.mrf.mxu0 }
 0x254   : > { %v1237_v54 = vadd.f32 %v2337_v52, %v2905_v51  ;;  %v1352_v60 = vmax.f32 %v1226_v53, 0.0 }
 0x255   : > { %v1228_v56 = vpop.f32.mrf.mxu0 }
 0x256   : > { %v1229_v57 = vadd.f32 %v2905_v51, %v1228_v56  ;;  %v1355_v58 = vmax.f32 %v1237_v54, 0.0 }
 0x257   : > { %v2340_v59 = vpop.f32.mrf.mxu0 }
 0x258   : > { %v1353_v61 = vmax.f32 %v1229_v57, 0.0  ;;  %v1385_v1 = vpack.c.bf16 %v1355_v58, %v1354_v62  ;;  %v1250_v5 = vadd.f32 %v2340_v59, %v2905_v51 }
 0x259   : > { %v1241_v63 = vpop.f32.mrf.mxu0 }
 0x25a   : > { %v1384_v0 = vpack.c.bf16 %v1353_v61, %v1352_v60  ;;  %v1242_v3 = vadd.f32 %v2905_v51, %v1241_v63  ;;  %v1358_v12 = vmax.f32 %v1250_v5, 0.0 }
 0x25b   : > { %v2341_v2 = vpop.f32.mrf.mxu0 }
 0x25c   : > { %v1253_v4 = vadd.f32 %v2341_v2, %v2905_v51  ;;  %2382 = vmatprep.mubr.bf16.mxu1 %v1384_v0  ;;  %v1356_v10 = vmax.f32 %v1242_v3, 0.0 }
 0x25d   : > { %v1244_v6 = vpop.f32.mrf.mxu0  ;;  %2383 = vmatmul.mubr.bf16.vlgmr.msra.gmra.mxu1 %v1385_v1 }
 0x25e   : > { %v1245_v7 = vadd.f32 %v2905_v51, %v1244_v6  ;;  %v1359_v8 = vmax.f32 %v1253_v4, 0.0 }
 0x25f   : > { %v2344_v9 = vpop.f32.mrf.mxu0 }
 0x260   : > { %v1357_v11 = vmax.f32 %v1245_v7, 0.0  ;;  %v1387_v15 = vpack.c.bf16 %v1359_v8, %v1358_v12  ;;  %v1266_v19 = vadd.f32 %v2344_v9, %v2905_v51 }
 0x261   : > { %v1257_v13 = vpop.f32.mrf.mxu0 }
 0x262   : > { %v1386_v14 = vpack.c.bf16 %v1357_v11, %v1356_v10  ;;  %v1258_v17 = vadd.f32 %v2905_v51, %v1257_v13  ;;  %v1362_v26 = vmax.f32 %v1266_v19, 0.0 }
 0x263   : > { %v2345_v16 = vpop.f32.mrf.mxu0 }
 0x264   : > { %v1269_v18 = vadd.f32 %v2345_v16, %v2905_v51  ;;  %2386 = vmatprep.mubr.bf16.mxu1 %v1386_v14  ;;  %v1360_v24 = vmax.f32 %v1258_v17, 0.0 }
 0x265   : > { %v1260_v20 = vpop.f32.mrf.mxu0  ;;  %2387 = vmatmul.mubr.bf16.gmra.mxu1 %v1387_v15 }
 0x266   : > { %v1261_v21 = vadd.f32 %v2905_v51, %v1260_v20  ;;  %v1363_v22 = vmax.f32 %v1269_v18, 0.0 }
 0x267   : > { %v2348_v23 = vpop.f32.mrf.mxu0 }
 0x268   : > { %v1361_v25 = vmax.f32 %v1261_v21, 0.0  ;;  %v1389_v29 = vpack.c.bf16 %v1363_v22, %v1362_v26  ;;  %v1282_v33 = vadd.f32 %v2348_v23, %v2905_v51 }
 0x269   : > { %v1273_v27 = vpop.f32.mrf.mxu0 }
 0x26a   : > { %v1388_v28 = vpack.c.bf16 %v1361_v25, %v1360_v24  ;;  %v1274_v31 = vadd.f32 %v2905_v51, %v1273_v27  ;;  %v1366_v40 = vmax.f32 %v1282_v33, 0.0 }
 0x26b   : > { %v2349_v30 = vpop.f32.mrf.mxu0 }
 0x26c   : > { %v1285_v32 = vadd.f32 %v2349_v30, %v2905_v51  ;;  %2390 = vmatprep.mubr.bf16.mxu1 %v1388_v28  ;;  %v1364_v38 = vmax.f32 %v1274_v31, 0.0 }
 0x26d   : > { %v1276_v34 = vpop.f32.mrf.mxu0  ;;  %2391 = vmatmul.mubr.bf16.gmra.mxu1 %v1389_v29 }
 0x26e   : > { %v1277_v35 = vadd.f32 %v2905_v51, %v1276_v34  ;;  %v1367_v36 = vmax.f32 %v1285_v32, 0.0 }
 0x26f   : > { %v2352_v37 = vpop.f32.mrf.mxu0 }
 0x270   : > { %v1365_v39 = vmax.f32 %v1277_v35, 0.0  ;;  %v1391_v43 = vpack.c.bf16 %v1367_v36, %v1366_v40  ;;  %v1298_v47 = vadd.f32 %v2352_v37, %v2905_v51  ;;  %v2942_v36 = vld [vmem:[%s3018_s5] ss:$0 sm:$0xff] }
 0x271   : > { %v1289_v41 = vpop.f32.mrf.mxu0 }
 0x272   : > { %v1390_v42 = vpack.c.bf16 %v1365_v39, %v1364_v38  ;;  %v1290_v45 = vadd.f32 %v2905_v51, %v1289_v41  ;;  %v1370_v55 = vmax.f32 %v1298_v47, 0.0 }
 0x273   : > { %v2353_v44 = vpop.f32.mrf.mxu0 }
 0x274   : > { %v1301_v46 = vadd.f32 %v2353_v44, %v2905_v51  ;;  %2394 = vmatprep.mubr.bf16.mxu1 %v1390_v42  ;;  %v1368_v53 = vmax.f32 %v1290_v45, 0.0 }
 0x275   : > { %v1292_v48 = vpop.f32.mrf.mxu0  ;;  %2395 = vmatmul.mubr.bf16.gmra.mxu1 %v1391_v43 }
 0x276   : > { %v1293_v49 = vadd.f32 %v2905_v51, %v1292_v48  ;;  %v1371_v50 = vmax.f32 %v1301_v46, 0.0 }
 0x277   : > { %v2356_v52 = vpop.f32.mrf.mxu0 }
 0x278   : > { %v1369_v54 = vmax.f32 %v1293_v49, 0.0  ;;  %v1393_v58 = vpack.c.bf16 %v1371_v50, %v1370_v55  ;;  %v1314_v62 = vadd.f32 %v2356_v52, %v2905_v51 }
 0x279   : > { %v1305_v56 = vpop.f32.mrf.mxu0 }
 0x27a   : > { %v1392_v57 = vpack.c.bf16 %v1369_v54, %v1368_v53  ;;  %v1306_v60 = vadd.f32 %v2905_v51, %v1305_v56  ;;  %v1374_v5 = vmax.f32 %v1314_v62, 0.0 }
 0x27b   : > { %v2357_v59 = vpop.f32.mrf.mxu0 }
 0x27c   : > { %v1317_v61 = vadd.f32 %v2357_v59, %v2905_v51  ;;  %2398 = vmatprep.mubr.bf16.mxu1 %v1392_v57  ;;  %v1372_v3 = vmax.f32 %v1306_v60, 0.0 }
 0x27d   : > { %v1308_v63 = vpop.f32.mrf.mxu0  ;;  %2399 = vmatmul.mubr.bf16.gmra.mxu1 %v1393_v58 }
 0x27e   : > { %v1309_v0 = vadd.f32 %v2905_v51, %v1308_v63  ;;  %v1375_v1 = vmax.f32 %v1317_v61, 0.0 }
 0x27f   : > { %v2360_v2 = vpop.f32.mrf.mxu0 }
 0x280   : > { %v1373_v4 = vmax.f32 %v1309_v0, 0.0  ;;  %v1395_v8 = vpack.c.bf16 %v1375_v1, %v1374_v5  ;;  %v1330_v12 = vadd.f32 %v2360_v2, %v2905_v51 }
 0x281   : > { %v1321_v6 = vpop.f32.mrf.mxu0 }
 0x282   : > { %v1394_v7 = vpack.c.bf16 %v1373_v4, %v1372_v3  ;;  %v1322_v10 = vadd.f32 %v2905_v51, %v1321_v6  ;;  %v1378_v19 = vmax.f32 %v1330_v12, 0.0 }
 0x283   : > { %v2361_v9 = vpop.f32.mrf.mxu0 }
 0x284   : > { %v1333_v11 = vadd.f32 %v2361_v9, %v2905_v51  ;;  %2402 = vmatprep.mubr.bf16.mxu1 %v1394_v7  ;;  %v1376_v17 = vmax.f32 %v1322_v10, 0.0 }
 0x285   : > { %v1324_v13 = vpop.f32.mrf.mxu0  ;;  %2403 = vmatmul.mubr.bf16.gmra.mxu1 %v1395_v8 }
 0x286   : > { %v1325_v14 = vadd.f32 %v2905_v51, %v1324_v13  ;;  %v1379_v15 = vmax.f32 %v1333_v11, 0.0 }
 0x287   : > { %v2364_v16 = vpop.f32.mrf.mxu0 }
 0x288   : > { %v1377_v18 = vmax.f32 %v1325_v14, 0.0  ;;  %v1397_v22 = vpack.c.bf16 %v1379_v15, %v1378_v19  ;;  %v1346_v26 = vadd.f32 %v2364_v16, %v2905_v51 }
 0x289   : > { %v1337_v20 = vpop.f32.mrf.mxu0 }
 0x28a   : > { %v1396_v21 = vpack.c.bf16 %v1377_v18, %v1376_v17  ;;  %v1338_v24 = vadd.f32 %v2905_v51, %v1337_v20  ;;  %v1382_v32 = vmax.f32 %v1346_v26, 0.0 }
 0x28b   : > { %v2365_v23 = vpop.f32.mrf.mxu0 }
 0x28c   : > { %v1349_v25 = vadd.f32 %v2365_v23, %v2905_v51  ;;  %2406 = vmatprep.mubr.bf16.mxu1 %v1396_v21  ;;  %v1380_v30 = vmax.f32 %v1338_v24, 0.0 }
 0x28d   : > { %v1340_v27 = vpop.f32.mrf.mxu0  ;;  %2407 = vmatmul.mubr.bf16.gmra.mxu1 %v1397_v22 }
 0x28e   : > { %v1341_v28 = vadd.f32 %v2905_v51, %v1340_v27  ;;  %v1383_v29 = vmax.f32 %v1349_v25, 0.0 }
 0x290   : > { %v1381_v31 = vmax.f32 %v1341_v28, 0.0  ;;  %v1399_v34 = vpack.c.bf16 %v1383_v29, %v1382_v32 }
 0x292   : > { %v1398_v33 = vpack.c.bf16 %v1381_v31, %v1380_v30 }
 0x294   : > { %2410 = vmatprep.mubr.bf16.mxu1 %v1398_v33 }
 0x295   : > { %2411 = vmatmul.mubr.bf16.gmra.mxu1 %v1399_v34 }
 0x31d   : > { %v2384_v35 = vpop.f32.mrf.mxu1 }
 0x31e   : > { %v1514_v38 = vadd.f32 %v2384_v35, %v2942_v36 }
 0x31f   : > { %v1505_v37 = vpop.f32.mrf.mxu1 }
 0x320   : > { %v1506_v51 = vadd.f32 %v2942_v36, %v1505_v37  ;;  %v1634_v42 = vmax.f32 %v1514_v38, 0.0 }
 0x321   : > { %v2385_v39 = vpop.f32.mrf.mxu1 }
 0x322   : > { %v1517_v40 = vadd.f32 %v2385_v39, %v2942_v36  ;;  %v1632_v46 = vmax.f32 %v1506_v51, 0.0 }
 0x323   : > { %v1508_v41 = vpop.f32.mrf.mxu1 }
 0x324   : > { %v1635_v43 = vmax.f32 %v1517_v40, 0.0  ;;  %v1509_v44 = vadd.f32 %v2942_v36, %v1508_v41 }
 0x325   : > { %v2388_v45 = vpop.f32.mrf.mxu1 }
 0x326   : > { %v2071_v47 = vpack.c.bf16 %v1635_v43, %v1634_v42  ;;  %v1633_v48 = vmax.f32 %v1509_v44, 0.0  ;;  %v1530_v52 = vadd.f32 %v2388_v45, %v2942_v36 }
 0x327   : > { %v1521_v49 = vpop.f32.mrf.mxu1 }
 0x328   : > { %2143 = vst [vmem:[%s2800_s18 + $0x8] sm:$0xff] %v2071_v47   ;;  %v2066_v50 = vpack.c.bf16 %v1633_v48, %v1632_v46  ;;  %v1522_v54 = vadd.f32 %v2942_v36, %v1521_v49  ;;  %v1638_v57 = vmax.f32 %v1530_v52, 0.0 }
 0x329   : > { %v2389_v53 = vpop.f32.mrf.mxu1 }
 0x32a   : > { %2067 = vst [vmem:[%s2800_s18] sm:$0xff] %v2066_v50   ;;  %v1533_v55 = vadd.f32 %v2389_v53, %v2942_v36  ;;  %v1636_v61 = vmax.f32 %v1522_v54, 0.0 }
 0x32b   : > { %v1524_v56 = vpop.f32.mrf.mxu1 }
 0x32c   : > { %v1639_v58 = vmax.f32 %v1533_v55, 0.0  ;;  %v1525_v59 = vadd.f32 %v2942_v36, %v1524_v56 }
 0x32d   : > { %v2392_v60 = vpop.f32.mrf.mxu1 }
 0x32e   : > { %v2081_v62 = vpack.c.bf16 %v1639_v58, %v1638_v57  ;;  %v1637_v63 = vmax.f32 %v1525_v59, 0.0  ;;  %v1546_v2 = vadd.f32 %v2392_v60, %v2942_v36 }
 0x32f   : > { %v1537_v0 = vpop.f32.mrf.mxu1 }
 0x330   : > { %2145 = vst [vmem:[%s2800_s18 + $0x18] sm:$0xff] %v2081_v62   ;;  %v2076_v1 = vpack.c.bf16 %v1637_v63, %v1636_v61  ;;  %v1538_v4 = vadd.f32 %v2942_v36, %v1537_v0  ;;  %v1642_v7 = vmax.f32 %v1546_v2, 0.0 }
 0x331   : > { %v2393_v3 = vpop.f32.mrf.mxu1 }
 0x332   : > { %2144 = vst [vmem:[%s2800_s18 + $0x10] sm:$0xff] %v2076_v1   ;;  %v1549_v5 = vadd.f32 %v2393_v3, %v2942_v36  ;;  %v1640_v11 = vmax.f32 %v1538_v4, 0.0 }
 0x333   : > { %v1540_v6 = vpop.f32.mrf.mxu1 }
 0x334   : > { %v1643_v8 = vmax.f32 %v1549_v5, 0.0  ;;  %v1541_v9 = vadd.f32 %v2942_v36, %v1540_v6 }
 0x335   : > { %v2396_v10 = vpop.f32.mrf.mxu1 }
 0x336   : > { %v2091_v12 = vpack.c.bf16 %v1643_v8, %v1642_v7  ;;  %v1641_v13 = vmax.f32 %v1541_v9, 0.0  ;;  %v1562_v16 = vadd.f32 %v2396_v10, %v2942_v36 }
 0x337   : > { %v1553_v14 = vpop.f32.mrf.mxu1 }
 0x338   : > { %2147 = vst [vmem:[%s2800_s18 + $0x28] sm:$0xff] %v2091_v12   ;;  %v2086_v15 = vpack.c.bf16 %v1641_v13, %v1640_v11  ;;  %v1554_v18 = vadd.f32 %v2942_v36, %v1553_v14  ;;  %v1646_v21 = vmax.f32 %v1562_v16, 0.0 }
 0x339   : > { %v2397_v17 = vpop.f32.mrf.mxu1 }
 0x33a   : > { %2146 = vst [vmem:[%s2800_s18 + $0x20] sm:$0xff] %v2086_v15   ;;  %v1565_v19 = vadd.f32 %v2397_v17, %v2942_v36  ;;  %v1644_v25 = vmax.f32 %v1554_v18, 0.0 }
 0x33b   : > { %v1556_v20 = vpop.f32.mrf.mxu1 }
 0x33c   : > { %v1647_v22 = vmax.f32 %v1565_v19, 0.0  ;;  %v1557_v23 = vadd.f32 %v2942_v36, %v1556_v20 }
 0x33d   : > { %v2400_v24 = vpop.f32.mrf.mxu1 }
 0x33e   : > { %v2101_v26 = vpack.c.bf16 %v1647_v22, %v1646_v21  ;;  %v1645_v27 = vmax.f32 %v1557_v23, 0.0  ;;  %v1578_v30 = vadd.f32 %v2400_v24, %v2942_v36 }
 0x33f   : > { %v1569_v28 = vpop.f32.mrf.mxu1 }
 0x340   : > { %2149 = vst [vmem:[%s2800_s18 + $0x38] sm:$0xff] %v2101_v26   ;;  %v2096_v29 = vpack.c.bf16 %v1645_v27, %v1644_v25  ;;  %v1570_v32 = vadd.f32 %v2942_v36, %v1569_v28  ;;  %v1650_v35 = vmax.f32 %v1578_v30, 0.0 }
 0x341   : > { %v2401_v31 = vpop.f32.mrf.mxu1 }
 0x342   : > { %2148 = vst [vmem:[%s2800_s18 + $0x30] sm:$0xff] %v2096_v29   ;;  %v1581_v33 = vadd.f32 %v2401_v31, %v2942_v36  ;;  %v1648_v51 = vmax.f32 %v1570_v32, 0.0 }
 0x343   : > { %v1572_v34 = vpop.f32.mrf.mxu1 }
 0x344   : > { %v1651_v37 = vmax.f32 %v1581_v33, 0.0  ;;  %v1573_v38 = vadd.f32 %v2942_v36, %v1572_v34 }
 0x345   : > { %v2404_v39 = vpop.f32.mrf.mxu1 }
 0x346   : > { %v2111_v40 = vpack.c.bf16 %v1651_v37, %v1650_v35  ;;  %v1649_v41 = vmax.f32 %v1573_v38, 0.0  ;;  %v1594_v44 = vadd.f32 %v2404_v39, %v2942_v36 }
 0x347   : > { %v1585_v42 = vpop.f32.mrf.mxu1 }
 0x348   : > { %2151 = vst [vmem:[%s2800_s18 + $0x48] sm:$0xff] %v2111_v40   ;;  %v2106_v43 = vpack.c.bf16 %v1649_v41, %v1648_v51  ;;  %v1586_v46 = vadd.f32 %v2942_v36, %v1585_v42  ;;  %v1654_v49 = vmax.f32 %v1594_v44, 0.0 }
 0x349   : > { %v2405_v45 = vpop.f32.mrf.mxu1 }
 0x34a   : > { %2150 = vst [vmem:[%s2800_s18 + $0x40] sm:$0xff] %v2106_v43   ;;  %v1597_v47 = vadd.f32 %v2405_v45, %v2942_v36  ;;  %v1652_v54 = vmax.f32 %v1586_v46, 0.0 }
 0x34b   : > { %v1588_v48 = vpop.f32.mrf.mxu1 }
 0x34c   : > { %v1655_v50 = vmax.f32 %v1597_v47, 0.0  ;;  %v1589_v52 = vadd.f32 %v2942_v36, %v1588_v48 }
 0x34d   : > { %v2408_v53 = vpop.f32.mrf.mxu1 }
 0x34e   : > { %v2121_v55 = vpack.c.bf16 %v1655_v50, %v1654_v49  ;;  %v1653_v56 = vmax.f32 %v1589_v52, 0.0  ;;  %v1610_v59 = vadd.f32 %v2408_v53, %v2942_v36 }
 0x34f   : > { %v1601_v57 = vpop.f32.mrf.mxu1 }
 0x350   : > { %2153 = vst [vmem:[%s2800_s18 + $0x58] sm:$0xff] %v2121_v55   ;;  %v2116_v58 = vpack.c.bf16 %v1653_v56, %v1652_v54  ;;  %v1602_v61 = vadd.f32 %v2942_v36, %v1601_v57  ;;  %v1658_v0 = vmax.f32 %v1610_v59, 0.0 }
 0x351   : > { %v2409_v60 = vpop.f32.mrf.mxu1 }
 0x352   : > { %2152 = vst [vmem:[%s2800_s18 + $0x50] sm:$0xff] %v2116_v58   ;;  %v1613_v62 = vadd.f32 %v2409_v60, %v2942_v36  ;;  %v1656_v4 = vmax.f32 %v1602_v61, 0.0 }
 0x353   : > { %v1604_v63 = vpop.f32.mrf.mxu1 }
 0x354   : > { %v1659_v1 = vmax.f32 %v1613_v62, 0.0  ;;  %v1605_v2 = vadd.f32 %v2942_v36, %v1604_v63 }
 0x355   : > { %v2412_v3 = vpop.f32.mrf.mxu1 }
 0x356   : > { %v2131_v5 = vpack.c.bf16 %v1659_v1, %v1658_v0  ;;  %v1657_v6 = vmax.f32 %v1605_v2, 0.0  ;;  %v1626_v9 = vadd.f32 %v2412_v3, %v2942_v36 }
 0x357   : > { %v1617_v7 = vpop.f32.mrf.mxu1 }
 0x358   : > { %2155 = vst [vmem:[%s2800_s18 + $0x68] sm:$0xff] %v2131_v5   ;;  %v2126_v8 = vpack.c.bf16 %v1657_v6, %v1656_v4  ;;  %v1618_v11 = vadd.f32 %v2942_v36, %v1617_v7  ;;  %v1662_v14 = vmax.f32 %v1626_v9, 0.0 }
 0x359   : > { %v2413_v10 = vpop.f32.mrf.mxu1 }
 0x35a   : > { %2154 = vst [vmem:[%s2800_s18 + $0x60] sm:$0xff] %v2126_v8   ;;  %v1629_v12 = vadd.f32 %v2413_v10, %v2942_v36  ;;  %v1660_v17 = vmax.f32 %v1618_v11, 0.0 }
 0x35b   : > { %v1620_v13 = vpop.f32.mrf.mxu1 }
 0x35c   : > { %v1663_v15 = vmax.f32 %v1629_v12, 0.0  ;;  %v1621_v16 = vadd.f32 %v2942_v36, %v1620_v13 }
 0x35e   : > { %v2141_v18 = vpack.c.bf16 %v1663_v15, %v1662_v14  ;;  %v1661_v19 = vmax.f32 %v1621_v16, 0.0 }
 0x360   : > { %2157 = vst [vmem:[%s2800_s18 + $0x78] sm:$0xff] %v2141_v18   ;;  %v2136_v20 = vpack.c.bf16 %v1661_v19, %v1660_v17 }
 0x362   : > { %2156 = vst [vmem:[%s2800_s18 + $0x70] sm:$0xff] %v2136_v20  }
 0x363 PF: > { %s16_s27 = sadd.s32 1, %s2621_s27   ;;  %s3020_s21 = smov %s2601_s22 }
 0x364   : > { %p13_p0 = scmp.ge.s32.totalorder %s16_s27, 6   ;;  %s3021_s22 = smov %s2710_s10 }
 0x365   : > { %s3022_s23 = smov %s2613_s25  ;;  %s3023_s24 = smov %s2617_s26 }
 0x366   : > { %s3024_s25 = smov %s3027_s28  ;;  %s3025_s26 = smov %s3031_s29 }
 0x367   :  { %15 = sbr.rel (!%p13_p0) target bundleno = 4 (0x4), region = 128 }

// kernel: ginfominmax_forward.4
= control target key start
LH: loop header
LB: loop body
LE: loop exit
PB: predicated region body
PF: predicated region fallthrough
CT: control target
= control target key end

     0   :  { %s2372_s21 = smov 0   ;;  %s2374_s22 = smov 0   ;;  %s2742_s0 = inlined_call_operand.vmem [shape: bf16[512,512], index: 0, kind: input, shape index: {}]   ;;  %s2743_s1 = inlined_call_operand.vmem [shape: bf16[512,128], index: 1, kind: input, shape index: {}]   ;;  %s2744_s2 = inlined_call_operand.vmem [shape: bf16[128,128], index: 2, kind: input, shape index: {}]   ;;  %s2745_s3 = inlined_call_operand.vmem [shape: f32[1,128], index: 3, kind: input, shape index: {}]   ;;  %s2746_s4 = inlined_call_operand.vmem [shape: bf16[128,128], index: 4, kind: input, shape index: {}]   ;;  %s2747_s5 = inlined_call_operand.vmem [shape: f32[1,128], index: 5, kind: input, shape index: {}]   ;;  %s2748_s6 = inlined_call_operand.vmem [shape: f32[512,128], index: 6, kind: output, shape index: {}]  }
   0x1   :  { %s2376_s23 = smov 0   ;;  %s2378_s24 = smov 0  }
   0x2   :  { %s2380_s25 = smov 0   ;;  %s2382_s26 = smov 0  }
   0x3   :  { %s2384_s27 = smov 0  }
   0x4 LB: > { %s25_s28 = sadd.s32 1, %s2326_s25  ;;  %s28_s29 = sadd.s32 1, %s2330_s26  ;;  %s2334_s27 = sphi %s2384_s27, %s16_s27   ;;  %s2330_s26 = sphi %s2382_s26, %s2754_s26   ;;  %s2326_s25 = sphi %s2380_s25, %s2753_s25   ;;  %s2322_s24 = sphi %s2378_s24, %s2752_s24   ;;  %s2318_s23 = sphi %s2376_s23, %s2751_s23   ;;  %s2314_s22 = sphi %s2374_s22, %s2750_s22   ;;  %s2310_s21 = sphi %s2372_s21, %s2749_s21  }
   0x5   : > { %p26_p0 = scmp.ge.s32.totalorder %s25_s28, 2  ;;  %p44_p1 = scmp.ne.s32.totalorder %s2314_s22, %s2310_s21 }
   0x6   : > { %p45_p2 = scmp.eq.s32.totalorder %s2334_s27, 0  ;;  %s37_s9 = sadd.s32 1, %s2314_s22 }
   0x7   : > { %s2756_s28 = smov (%p26_p0, %s25_s28), 0  ;;  %s2758_s29 = smov (!%p26_p0, %s28_s29), %s2330_s26 }
   0x8   : > { %p46_p3 = por %p45_p2, %p44_p1  ;;  %p30_p4 = scmp.ge.s32.totalorder %s2758_s29, 2 }
   0x9   : > { %s33_s30 = ssub.s32 %s2326_s25, %s2756_s28  ;;  %p1788_p6 = scmp.ge.s32.totalorder %s2334_s27, 4 }
   0xa   : > { %s2760_s29 = smov (%p30_p4, %s2758_s29), 0 }
   0xb   : > { %s32_s7 = ssub.s32 %s2330_s26, %s2760_s29  ;;  %218 = sbr.rel (%p1788_p6) target bundleno = 39 (0x27), region = 32 }
   0xc   : > { %s34_s8 = sor.u32 %s33_s30, %s32_s7 }
   0xd   : > { %p35_p5 = scmp.eq.s32.totalorder %s34_s8, 0 }
   0xf   : > { %s2423_s10 = scalar_select %p35_p5, %s2314_s22, %s37_s9  }
  0x10   : > { %221 = sbr.rel (!%p46_p3) target bundleno = 39 (0x27), region = 36  ;;  %s223_s11 = sand.u32 (%p46_p3), 1, %s2314_s22  }
  0x11   : > { %s1791_s12 = sshll.u32 (%p46_p3), %s2326_s25, 1  ;;  %s1789_s13 = sshll.u32 (%p46_p3), %s223_s11, 8 }
  0x12   : > { %s1870_s14 = sshll.u32 (%p46_p3), %s2330_s26, 7  ;;  %s2437_s20 = scalar_lea.vmem (%p46_p3), [#allocation3], %s1789_s13 }
  0x13   : > { %s229_s15 = sadd.s32 (%p46_p3), %s1870_s14, %s1791_s12 }
  0x14   : > { %s1793_s16 = sshll.u32 (%p46_p3), %s229_s15, 2 }
  0x15   : > { %s2432_s19 = scalar_lea.vmem %s2742_s0, %s1793_s16 }
  0x16   : > { %v322_v0 = vld [vmem:[%s2432_s19] sm:$0xff]  ;;  %v324_v1 = vld [vmem:[%s2432_s19 + $0x10] sm:$0xff] }
  0x17   : > { %v326_v2 = vld [vmem:[%s2432_s19 + $0x20] sm:$0xff]  ;;  %323 = vst [vmem:[%s2437_s20] sm:$0xff] %v322_v0  ;;  %325 = vst [vmem:[%s2437_s20 + $0x8] sm:$0xff] %v324_v1  ;;  %v328_v3 = vld [vmem:[%s2432_s19 + $0x30] sm:$0xff] }
  0x18   : > { %327 = vst [vmem:[%s2437_s20 + $0x10] sm:$0xff] %v326_v2  ;;  %v330_v4 = vld [vmem:[%s2432_s19 + $0x40] sm:$0xff]  ;;  %v332_v5 = vld [vmem:[%s2432_s19 + $0x50] sm:$0xff]  ;;  %329 = vst [vmem:[%s2437_s20 + $0x18] sm:$0xff] %v328_v3 }
  0x19   : > { %331 = vst [vmem:[%s2437_s20 + $0x20] sm:$0xff] %v330_v4  ;;  %333 = vst [vmem:[%s2437_s20 + $0x28] sm:$0xff] %v332_v5  ;;  %v334_v6 = vld [vmem:[%s2432_s19 + $0x60] sm:$0xff]  ;;  %v336_v7 = vld [vmem:[%s2432_s19 + $0x70] sm:$0xff] }
  0x1a   : > { %v338_v8 = vld [vmem:[%s2432_s19 + $0x80] sm:$0xff]  ;;  %335 = vst [vmem:[%s2437_s20 + $0x30] sm:$0xff] %v334_v6  ;;  %337 = vst [vmem:[%s2437_s20 + $0x38] sm:$0xff] %v336_v7  ;;  %v340_v9 = vld [vmem:[%s2432_s19 + $0x90] sm:$0xff] }
  0x1b   : > { %339 = vst [vmem:[%s2437_s20 + $0x40] sm:$0xff] %v338_v8  ;;  %v342_v10 = vld [vmem:[%s2432_s19 + $0xa0] sm:$0xff]  ;;  %v344_v11 = vld [vmem:[%s2432_s19 + $0xb0] sm:$0xff]  ;;  %341 = vst [vmem:[%s2437_s20 + $0x48] sm:$0xff] %v340_v9 }
  0x1c   : > { %343 = vst [vmem:[%s2437_s20 + $0x50] sm:$0xff] %v342_v10  ;;  %345 = vst [vmem:[%s2437_s20 + $0x58] sm:$0xff] %v344_v11  ;;  %v346_v12 = vld [vmem:[%s2432_s19 + $0xc0] sm:$0xff]  ;;  %v348_v13 = vld [vmem:[%s2432_s19 + $0xd0] sm:$0xff] }
  0x1d   : > { %v350_v14 = vld [vmem:[%s2432_s19 + $0xe0] sm:$0xff]  ;;  %347 = vst [vmem:[%s2437_s20 + $0x60] sm:$0xff] %v346_v12  ;;  %349 = vst [vmem:[%s2437_s20 + $0x68] sm:$0xff] %v348_v13  ;;  %v352_v15 = vld [vmem:[%s2432_s19 + $0xf0] sm:$0xff] }
  0x1e   : > { %351 = vst [vmem:[%s2437_s20 + $0x70] sm:$0xff] %v350_v14  ;;  %v354_v16 = vld [vmem:[%s2432_s19 + $0x100] sm:$0xff]  ;;  %v356_v17 = vld [vmem:[%s2432_s19 + $0x110] sm:$0xff]  ;;  %353 = vst [vmem:[%s2437_s20 + $0x78] sm:$0xff] %v352_v15 }
  0x1f   : > { %355 = vst [vmem:[%s2437_s20 + $0x80] sm:$0xff] %v354_v16  ;;  %357 = vst [vmem:[%s2437_s20 + $0x88] sm:$0xff] %v356_v17  ;;  %v358_v18 = vld [vmem:[%s2432_s19 + $0x120] sm:$0xff]  ;;  %v360_v19 = vld [vmem:[%s2432_s19 + $0x130] sm:$0xff] }
  0x20   : > { %v362_v20 = vld [vmem:[%s2432_s19 + $0x140] sm:$0xff]  ;;  %359 = vst [vmem:[%s2437_s20 + $0x90] sm:$0xff] %v358_v18  ;;  %361 = vst [vmem:[%s2437_s20 + $0x98] sm:$0xff] %v360_v19  ;;  %v364_v21 = vld [vmem:[%s2432_s19 + $0x150] sm:$0xff] }
  0x21   : > { %363 = vst [vmem:[%s2437_s20 + $0xa0] sm:$0xff] %v362_v20  ;;  %v366_v22 = vld [vmem:[%s2432_s19 + $0x160] sm:$0xff]  ;;  %v368_v23 = vld [vmem:[%s2432_s19 + $0x170] sm:$0xff]  ;;  %365 = vst [vmem:[%s2437_s20 + $0xa8] sm:$0xff] %v364_v21 }
  0x22   : > { %367 = vst [vmem:[%s2437_s20 + $0xb0] sm:$0xff] %v366_v22  ;;  %369 = vst [vmem:[%s2437_s20 + $0xb8] sm:$0xff] %v368_v23  ;;  %v370_v24 = vld [vmem:[%s2432_s19 + $0x180] sm:$0xff]  ;;  %v372_v25 = vld [vmem:[%s2432_s19 + $0x190] sm:$0xff] }
  0x23   : > { %v374_v26 = vld [vmem:[%s2432_s19 + $0x1a0] sm:$0xff]  ;;  %371 = vst [vmem:[%s2437_s20 + $0xc0] sm:$0xff] %v370_v24  ;;  %373 = vst [vmem:[%s2437_s20 + $0xc8] sm:$0xff] %v372_v25  ;;  %v376_v27 = vld [vmem:[%s2432_s19 + $0x1b0] sm:$0xff] }
  0x24   : > { %375 = vst [vmem:[%s2437_s20 + $0xd0] sm:$0xff] %v374_v26  ;;  %v378_v28 = vld [vmem:[%s2432_s19 + $0x1c0] sm:$0xff]  ;;  %v380_v29 = vld [vmem:[%s2432_s19 + $0x1d0] sm:$0xff]  ;;  %377 = vst [vmem:[%s2437_s20 + $0xd8] sm:$0xff] %v376_v27 }
  0x25   : > { %379 = vst [vmem:[%s2437_s20 + $0xe0] sm:$0xff] %v378_v28  ;;  %381 = vst [vmem:[%s2437_s20 + $0xe8] sm:$0xff] %v380_v29  ;;  %v382_v30 = vld [vmem:[%s2432_s19 + $0x1e0] sm:$0xff]  ;;  %v384_v31 = vld [vmem:[%s2432_s19 + $0x1f0] sm:$0xff] }
  0x26   : > { %383 = vst [vmem:[%s2437_s20 + $0xf0] sm:$0xff] %v382_v30  ;;  %385 = vst [vmem:[%s2437_s20 + $0xf8] sm:$0xff] %v384_v31 }
  0x27 PF: > { %p1794_p7 = scmp.ge.s32.totalorder %s2334_s27, 1  ;;  %p399_p8 = scmp.lt.s32.totalorder %s2334_s27, 5 }
  0x29   : > { %p400_p9 = pnand %p1794_p7, %p399_p8 }
  0x2a   : > { %s406_s30 = sand.u32 (!%p400_p9), 1, %s2310_s21   ;;  %s1796_s7 = sshll.u32 (!%p400_p9), %s2318_s23, 5 }
  0x2b   : > { %403 = sbr.rel (%p400_p9) target bundleno = 865 (0x361), region = 78  ;;  %s1795_s8 = sshll.u32 (!%p400_p9), %s406_s30, 8 }
  0x2c   : > { %p443_p10 = scmp.lt.s32.totalorder (!%p400_p9), %s1796_s7, 63  ;;  %s1798_s9 = sshll.u32 (!%p400_p9), %s2322_s24, 5 }
  0x2d   : > { %p449_p11 = scmp.lt.s32.totalorder (!%p400_p9), %s1798_s9, 63  ;;  %s2515_s21 = scalar_lea.vmem (!%p400_p9), [#allocation3], %s1795_s8 }
  0x2e   : > { %p1800_p12 = scmp.ne.s32.totalorder (!%p400_p9), %s2318_s23, 0 }
  0x30   : > { %s2762_s7 = smov (!%p443_p10, %s1796_s7), 63  ;;  %s2764_s9 = smov (!%p449_p11, %s1798_s9), 63 }
  0x31   : > { %s1797_s11 = sshll.u32 %s2762_s7, 2  ;;  %s1799_s15 = sshll.u32 %s2764_s9, 3 }
  0x32   : > { %s2508_s14 = scalar_lea.vmem %s2743_s1, %s1797_s11  ;;  %s2513_s18 = scalar_lea.vmem %s2748_s6, %s1799_s15 }
  0x33   : > { %458 = sbr.rel (%p1800_p12) target bundleno = 73 (0x49), region = 86 }
  0x38   : > { %v2336_v32 = vmov 0.0  }
  0x39   : > { %459 = vst [vmem:[#allocation2 + $0xb0] sm:$0xff] %v2336_v32  ;;  %460 = vst [vmem:[#allocation2] sm:$0xff] %v2336_v32 }
  0x3a   : > { %461 = vst [vmem:[#allocation2 + $0xd8] sm:$0xff] %v2336_v32  ;;  %462 = vst [vmem:[#allocation2 + $0x18] sm:$0xff] %v2336_v32 }
  0x3b   : > { %463 = vst [vmem:[#allocation2 + $0x50] sm:$0xff] %v2336_v32  ;;  %464 = vst [vmem:[#allocation2 + $0x68] sm:$0xff] %v2336_v32 }
  0x3c   : > { %465 = vst [vmem:[#allocation2 + $0x30] sm:$0xff] %v2336_v32  ;;  %466 = vst [vmem:[#allocation2 + $0x48] sm:$0xff] %v2336_v32 }
  0x3d   : > { %467 = vst [vmem:[#allocation2 + $0x80] sm:$0xff] %v2336_v32  ;;  %468 = vst [vmem:[#allocation2 + $0x88] sm:$0xff] %v2336_v32 }
  0x3e   : > { %469 = vst [vmem:[#allocation2 + $0xe8] sm:$0xff] %v2336_v32  ;;  %470 = vst [vmem:[#allocation2 + $0xb8] sm:$0xff] %v2336_v32 }
  0x3f   : > { %471 = vst [vmem:[#allocation2 + $0x60] sm:$0xff] %v2336_v32  ;;  %472 = vst [vmem:[#allocation2 + $0xf0] sm:$0xff] %v2336_v32 }
  0x40   : > { %473 = vst [vmem:[#allocation2 + $0x8] sm:$0xff] %v2336_v32  ;;  %474 = vst [vmem:[#allocation2 + $0x78] sm:$0xff] %v2336_v32 }
  0x41   : > { %475 = vst [vmem:[#allocation2 + $0x38] sm:$0xff] %v2336_v32  ;;  %476 = vst [vmem:[#allocation2 + $0x58] sm:$0xff] %v2336_v32 }
  0x42   : > { %477 = vst [vmem:[#allocation2 + $0x40] sm:$0xff] %v2336_v32  ;;  %478 = vst [vmem:[#allocation2 + $0xc8] sm:$0xff] %v2336_v32 }
  0x43   : > { %479 = vst [vmem:[#allocation2 + $0xe0] sm:$0xff] %v2336_v32  ;;  %480 = vst [vmem:[#allocation2 + $0x90] sm:$0xff] %v2336_v32 }
  0x44   : > { %481 = vst [vmem:[#allocation2 + $0x70] sm:$0xff] %v2336_v32  ;;  %482 = vst [vmem:[#allocation2 + $0xc0] sm:$0xff] %v2336_v32 }
  0x45   : > { %483 = vst [vmem:[#allocation2 + $0xa8] sm:$0xff] %v2336_v32  ;;  %484 = vst [vmem:[#allocation2 + $0xd0] sm:$0xff] %v2336_v32 }
  0x46   : > { %485 = vst [vmem:[#allocation2 + $0x10] sm:$0xff] %v2336_v32  ;;  %486 = vst [vmem:[#allocation2 + $0x28] sm:$0xff] %v2336_v32 }
  0x47   : > { %487 = vst [vmem:[#allocation2 + $0xa0] sm:$0xff] %v2336_v32  ;;  %488 = vst [vmem:[#allocation2 + $0xf8] sm:$0xff] %v2336_v32 }
  0x48   : > { %489 = vst [vmem:[#allocation2 + $0x20] sm:$0xff] %v2336_v32  ;;  %490 = vst [vmem:[#allocation2 + $0x98] sm:$0xff] %v2336_v32 }
  0x49 PF: > { %v2200_v33 = vld [vmem:[%s2508_s14 + $0x78] sm:$0xff]   ;;  %v2202_v35 = vld [vmem:[%s2508_s14 + $0x70] sm:$0xff]   ;;  %v2204_v37 = vld [vmem:[%s2508_s14 + $0x68] sm:$0xff]   ;;  %p1849_p13 = scmp.ne.s32.totalorder %s2318_s23, 1 }
  0x4a   : > { %v2201_v34 = vld [vmem:[%s2508_s14 + $0x38] sm:$0xff]   ;;  %1871 = vmatprep.subr.bf16.mxu0 %v2200_v33  ;;  %2127 = vmatprep.subr.bf16.mxu1 %v2200_v33  ;;  %v2203_v36 = vld [vmem:[%s2508_s14 + $0x30] sm:$0xff]   ;;  %v2205_v38 = vld [vmem:[%s2508_s14 + $0x28] sm:$0xff]  }
  0x4b   : > { %1872 = vmatpush3.bf16.msra.mxu0 %v2201_v34  ;;  %2135 = vmatpush3.bf16.msra.mxu1 %v2201_v34  ;;  %v2206_v39 = vld [vmem:[%s2508_s14 + $0x60] sm:$0xff]   ;;  %v2208_v41 = vld [vmem:[%s2508_s14 + $0x58] sm:$0xff]   ;;  %v2210_v43 = vld [vmem:[%s2508_s14 + $0x50] sm:$0xff]  }
  0x4c   : > { %1873 = vmatprep.subr.bf16.mxu0 %v2202_v35  ;;  %2128 = vmatprep.subr.bf16.mxu1 %v2202_v35  ;;  %v2207_v40 = vld [vmem:[%s2508_s14 + $0x20] sm:$0xff]   ;;  %v2209_v42 = vld [vmem:[%s2508_s14 + $0x18] sm:$0xff]   ;;  %v2211_v46 = vld [vmem:[%s2508_s14 + $0x10] sm:$0xff]  }
  0x4d   : > { %v2218_v44 = vld [vmem:[%s2515_s21 + $0x4] ss:$8 sps:$4 sm:$0xff]   ;;  %v2216_v51 = vld [vmem:[%s2515_s21] ss:$8 sps:$4 sm:$0xff]   ;;  %v2222_v53 = vld [vmem:[%s2515_s21 + $0x14] ss:$8 sps:$4 sm:$0xff]  }
  0x4e   : > { %v2221_v45 = vld [vmem:[%s2515_s21 + $0x84] ss:$8 sps:$4 sm:$0xff]   ;;  %875 = vmatprep.mubr.bf16.mxu0 %v2218_v44  ;;  %v2219_v52 = vld [vmem:[%s2515_s21 + $0x80] ss:$8 sps:$4 sm:$0xff]   ;;  %v2224_v54 = vld [vmem:[%s2515_s21 + $0x94] ss:$8 sps:$4 sm:$0xff]  }
  0x4f   : > { %1874 = vmatpush3.bf16.msra.mxu0 %v2203_v36  ;;  %2136 = vmatpush3.bf16.msra.mxu1 %v2203_v36  ;;  %v2212_v47 = vld [vmem:[%s2508_s14 + $0x48] sm:$0xff]   ;;  %v2214_v49 = vld [vmem:[%s2508_s14 + $0x40] sm:$0xff]   ;;  %v2226_v55 = vld [vmem:[%s2515_s21 + $0x10] ss:$8 sps:$4 sm:$0xff]  }
  0x50   : > { %1875 = vmatprep.subr.bf16.mxu0 %v2204_v37  ;;  %2129 = vmatprep.subr.bf16.mxu1 %v2204_v37  ;;  %v2213_v48 = vld [vmem:[%s2508_s14 + $0x8] sm:$0xff]   ;;  %v2215_v50 = vld [vmem:[%s2508_s14] sm:$0xff]   ;;  %v2227_v56 = vld [vmem:[%s2515_s21 + $0x90] ss:$8 sps:$4 sm:$0xff]  }
  0x51   : > { %939 = vmatprep.mubr.bf16.mxu1 %v2221_v45  ;;  %v2228_v57 = vld [vmem:[%s2515_s21 + $0x24] ss:$8 sps:$4 sm:$0xff]   ;;  %v2232_v59 = vld [vmem:[%s2515_s21 + $0x20] ss:$8 sps:$4 sm:$0xff]   ;;  %v2234_v61 = vld [vmem:[%s2515_s21 + $0x34] ss:$8 sps:$4 sm:$0xff]  }
  0x52   : > { %v2230_v58 = vld [vmem:[%s2515_s21 + $0xa4] ss:$8 sps:$4 sm:$0xff]   ;;  %v2233_v60 = vld [vmem:[%s2515_s21 + $0xa0] ss:$8 sps:$4 sm:$0xff]   ;;  %v2236_v62 = vld [vmem:[%s2515_s21 + $0xb4] ss:$8 sps:$4 sm:$0xff]  }
  0x53   : > { %1876 = vmatpush3.bf16.msra.mxu0 %v2205_v38  ;;  %2137 = vmatpush3.bf16.msra.mxu1 %v2205_v38  ;;  %v2238_v63 = vld [vmem:[%s2515_s21 + $0x30] ss:$8 sps:$4 sm:$0xff]   ;;  %v2240_v1 = vld [vmem:[%s2515_s21 + $0x44] ss:$8 sps:$4 sm:$0xff]   ;;  %v2244_v3 = vld [vmem:[%s2515_s21 + $0x40] ss:$8 sps:$4 sm:$0xff]  }
  0x54   : > { %1877 = vmatprep.subr.bf16.mxu0 %v2206_v39  ;;  %2130 = vmatprep.subr.bf16.mxu1 %v2206_v39  ;;  %v2239_v0 = vld [vmem:[%s2515_s21 + $0xb0] ss:$8 sps:$4 sm:$0xff]   ;;  %v2242_v2 = vld [vmem:[%s2515_s21 + $0xc4] ss:$8 sps:$4 sm:$0xff]   ;;  %v2245_v4 = vld [vmem:[%s2515_s21 + $0xc0] ss:$8 sps:$4 sm:$0xff]  }
  0x55   : > { %v2246_v5 = vld [vmem:[%s2515_s21 + $0x54] ss:$8 sps:$4 sm:$0xff]   ;;  %v2250_v7 = vld [vmem:[%s2515_s21 + $0x50] ss:$8 sps:$4 sm:$0xff]   ;;  %v2252_v9 = vld [vmem:[%s2515_s21 + $0x64] ss:$8 sps:$4 sm:$0xff]  }
  0x56   : > { %v2248_v6 = vld [vmem:[%s2515_s21 + $0xd4] ss:$8 sps:$4 sm:$0xff]   ;;  %v2251_v8 = vld [vmem:[%s2515_s21 + $0xd0] ss:$8 sps:$4 sm:$0xff]   ;;  %v2254_v10 = vld [vmem:[%s2515_s21 + $0xe4] ss:$8 sps:$4 sm:$0xff]  }
  0x57   : > { %1878 = vmatpush3.bf16.msra.mxu0 %v2207_v40  ;;  %2138 = vmatpush3.bf16.msra.mxu1 %v2207_v40  ;;  %v2256_v11 = vld [vmem:[%s2515_s21 + $0x60] ss:$8 sps:$4 sm:$0xff]   ;;  %v2258_v13 = vld [vmem:[%s2515_s21 + $0x74] ss:$8 sps:$4 sm:$0xff]   ;;  %v2262_v15 = vld [vmem:[%s2515_s21 + $0x70] ss:$8 sps:$4 sm:$0xff]  }
  0x58   : > { %1879 = vmatprep.subr.bf16.mxu0 %v2208_v41  ;;  %2131 = vmatprep.subr.bf16.mxu1 %v2208_v41  ;;  %v2257_v12 = vld [vmem:[%s2515_s21 + $0xe0] ss:$8 sps:$4 sm:$0xff]   ;;  %v2260_v14 = vld [vmem:[%s2515_s21 + $0xf4] ss:$8 sps:$4 sm:$0xff]   ;;  %v2263_v16 = vld [vmem:[%s2515_s21 + $0xf0] ss:$8 sps:$4 sm:$0xff]  }
  0x59   : > { %v491_v19 = vld [vmem:[#allocation2 + $0xb0] sm:$0xff]  ;;  %v507_v21 = vld [vmem:[#allocation2 + $0x38] sm:$0xff]  ;;  %v492_v29 = vld [vmem:[#allocation2] sm:$0xff] }
  0x5a   : > { %v508_v31 = vld [vmem:[#allocation2 + $0x58] sm:$0xff]  ;;  %v509_v41 = vld [vmem:[#allocation2 + $0x40] sm:$0xff] }
  0x5b   : > { %1880 = vmatpush3.bf16.msra.mxu0 %v2209_v42  ;;  %2139 = vmatpush3.bf16.msra.mxu1 %v2209_v42  ;;  %v493_v39 = vld [vmem:[#allocation2 + $0xd8] sm:$0xff] }
  0x5c   : > { %1881 = vmatprep.subr.bf16.mxu0 %v2210_v43  ;;  %2132 = vmatprep.subr.bf16.mxu1 %v2210_v43 }
  0x5f   : > { %1882 = vmatpush3.bf16.msra.mxu0 %v2211_v46  ;;  %2140 = vmatpush3.bf16.msra.mxu1 %v2211_v46 }
  0x60   : > { %1883 = vmatprep.subr.bf16.mxu0 %v2212_v47  ;;  %2133 = vmatprep.subr.bf16.mxu1 %v2212_v47 }
  0x63   : > { %1884 = vmatpush3.bf16.msra.mxu0 %v2213_v48  ;;  %2141 = vmatpush3.bf16.msra.mxu1 %v2213_v48 }
  0x64   : > { %1885 = vmatprep.subr.bf16.mxu0 %v2214_v49  ;;  %2134 = vmatprep.subr.bf16.mxu1 %v2214_v49  ;;  %v494_v49 = vld [vmem:[#allocation2 + $0x18] sm:$0xff] }
  0x67   : > { %1886 = vmatpush3.bf16.msra.mxu0 %v2215_v50  ;;  %2142 = vmatpush3.bf16.msra.mxu1 %v2215_v50 }
  0x6a   : > { %876 = vmatmul.mubr.bf16.vlgmr.msra.gmra.mxu0 %v2216_v51  ;;  %940 = vmatmul.mubr.bf16.vlgmr.msra.gmra.mxu1 %v2219_v52  ;;  %v510_v51 = vld [vmem:[#allocation2 + $0xc8] sm:$0xff] }
  0x6b   : > { %883 = vmatprep.mubr.bf16.mxu0 %v2222_v53  ;;  %947 = vmatprep.mubr.bf16.mxu1 %v2224_v54 }
  0x72   : > { %884 = vmatmul.mubr.bf16.gmra.mxu0 %v2226_v55  ;;  %948 = vmatmul.mubr.bf16.gmra.mxu1 %v2227_v56 }
  0x73   : > { %891 = vmatprep.mubr.bf16.mxu0 %v2228_v57  ;;  %955 = vmatprep.mubr.bf16.mxu1 %v2230_v58 }
  0x7a   : > { %892 = vmatmul.mubr.bf16.gmra.mxu0 %v2232_v59  ;;  %956 = vmatmul.mubr.bf16.gmra.mxu1 %v2233_v60  ;;  %v495_v59 = vld [vmem:[#allocation2 + $0x50] sm:$0xff] }
  0x7b   : > { %899 = vmatprep.mubr.bf16.mxu0 %v2234_v61  ;;  %963 = vmatprep.mubr.bf16.mxu1 %v2236_v62  ;;  %v511_v61 = vld [vmem:[#allocation2 + $0xe0] sm:$0xff] }
  0x82   : > { %900 = vmatmul.mubr.bf16.gmra.mxu0 %v2238_v63  ;;  %964 = vmatmul.mubr.bf16.gmra.mxu1 %v2239_v0 }
  0x83   : > { %907 = vmatprep.mubr.bf16.mxu0 %v2240_v1  ;;  %971 = vmatprep.mubr.bf16.mxu1 %v2242_v2 }
  0x8a   : > { %908 = vmatmul.mubr.bf16.gmra.mxu0 %v2244_v3  ;;  %972 = vmatmul.mubr.bf16.gmra.mxu1 %v2245_v4 }
  0x8b   : > { %915 = vmatprep.mubr.bf16.mxu0 %v2246_v5  ;;  %979 = vmatprep.mubr.bf16.mxu1 %v2248_v6  ;;  %v496_v5 = vld [vmem:[#allocation2 + $0x68] sm:$0xff] }
  0x92   : > { %916 = vmatmul.mubr.bf16.gmra.mxu0 %v2250_v7  ;;  %980 = vmatmul.mubr.bf16.gmra.mxu1 %v2251_v8  ;;  %v512_v7 = vld [vmem:[#allocation2 + $0x90] sm:$0xff] }
  0x93   : > { %923 = vmatprep.mubr.bf16.mxu0 %v2252_v9  ;;  %987 = vmatprep.mubr.bf16.mxu1 %v2254_v10 }
  0x9a   : > { %924 = vmatmul.mubr.bf16.gmra.mxu0 %v2256_v11  ;;  %988 = vmatmul.mubr.bf16.gmra.mxu1 %v2257_v12 }
  0x9b   : > { %931 = vmatprep.mubr.bf16.mxu0 %v2258_v13  ;;  %995 = vmatprep.mubr.bf16.mxu1 %v2260_v14 }
  0xa2   : > { %932 = vmatmul.mubr.bf16.gmra.mxu0 %v2262_v15  ;;  %996 = vmatmul.mubr.bf16.gmra.mxu1 %v2263_v16  ;;  %v497_v15 = vld [vmem:[#allocation2 + $0x30] sm:$0xff] }
 0x12a   : > { %v1887_v17 = vpop.f32.mrf.mxu0  ;;  %v1935_v18 = vpop.f32.mrf.mxu1 }
 0x12c   : > { %v1888_v20 = vpop.f32.mrf.mxu0  ;;  %v1936_v22 = vpop.f32.mrf.mxu1 }
 0x12d   : > { %v1889_v23 = vadd.f32 %v1888_v20, %v1887_v17  ;;  %v1937_v24 = vadd.f32 %v1936_v22, %v1935_v18  ;;  %v513_v17 = vld [vmem:[#allocation2 + $0x70] sm:$0xff] }
 0x12e   : > { %v1890_v25 = vpop.f32.mrf.mxu0  ;;  %v1938_v26 = vpop.f32.mrf.mxu1 }
 0x12f   : > { %v1004_v27 = vadd.f32 %v1889_v23, %v491_v19  ;;  %v1020_v28 = vadd.f32 %v1937_v24, %v507_v21 }
 0x130   : > { %v1891_v30 = vpop.f32.mrf.mxu0  ;;  %v1939_v32 = vpop.f32.mrf.mxu1 }
 0x131   : > { %1036 = vst [vmem:[#allocation2 + $0xb0] sm:$0xff] %v1004_v27  ;;  %1052 = vst [vmem:[#allocation2 + $0x38] sm:$0xff] %v1020_v28  ;;  %v1892_v33 = vadd.f32 %v1891_v30, %v1890_v25  ;;  %v1940_v34 = vadd.f32 %v1939_v32, %v1938_v26  ;;  %v498_v25 = vld [vmem:[#allocation2 + $0x48] sm:$0xff]  ;;  %v514_v27 = vld [vmem:[#allocation2 + $0xc0] sm:$0xff] }
 0x132   : > { %v1893_v35 = vpop.f32.mrf.mxu0  ;;  %v1941_v36 = vpop.f32.mrf.mxu1 }
 0x133   : > { %v1005_v37 = vadd.f32 %v1892_v33, %v492_v29  ;;  %v1021_v38 = vadd.f32 %v1940_v34, %v508_v31 }
 0x134   : > { %v1894_v40 = vpop.f32.mrf.mxu0  ;;  %v1942_v42 = vpop.f32.mrf.mxu1 }
 0x135   : > { %1037 = vst [vmem:[#allocation2] sm:$0xff] %v1005_v37  ;;  %1053 = vst [vmem:[#allocation2 + $0x58] sm:$0xff] %v1021_v38  ;;  %v1895_v43 = vadd.f32 %v1894_v40, %v1893_v35  ;;  %v1943_v44 = vadd.f32 %v1942_v42, %v1941_v36  ;;  %v499_v35 = vld [vmem:[#allocation2 + $0x80] sm:$0xff]  ;;  %v515_v37 = vld [vmem:[#allocation2 + $0xa8] sm:$0xff] }
 0x136   : > { %v1896_v45 = vpop.f32.mrf.mxu0  ;;  %v1944_v46 = vpop.f32.mrf.mxu1 }
 0x137   : > { %v1006_v47 = vadd.f32 %v1895_v43, %v493_v39  ;;  %v1022_v48 = vadd.f32 %v1943_v44, %v509_v41 }
 0x138   : > { %v1897_v50 = vpop.f32.mrf.mxu0  ;;  %v1945_v52 = vpop.f32.mrf.mxu1 }
 0x139   : > { %1038 = vst [vmem:[#allocation2 + $0xd8] sm:$0xff] %v1006_v47  ;;  %1054 = vst [vmem:[#allocation2 + $0x40] sm:$0xff] %v1022_v48  ;;  %v1898_v53 = vadd.f32 %v1897_v50, %v1896_v45  ;;  %v1946_v54 = vadd.f32 %v1945_v52, %v1944_v46  ;;  %v500_v45 = vld [vmem:[#allocation2 + $0x88] sm:$0xff]  ;;  %v516_v47 = vld [vmem:[#allocation2 + $0xd0] sm:$0xff] }
 0x13a   : > { %v1899_v55 = vpop.f32.mrf.mxu0  ;;  %v1947_v56 = vpop.f32.mrf.mxu1 }
 0x13b   : > { %v1007_v57 = vadd.f32 %v1898_v53, %v494_v49  ;;  %v1023_v58 = vadd.f32 %v1946_v54, %v510_v51 }
 0x13c   : > { %v1900_v60 = vpop.f32.mrf.mxu0  ;;  %v1948_v62 = vpop.f32.mrf.mxu1 }
 0x13d   : > { %1039 = vst [vmem:[#allocation2 + $0x18] sm:$0xff] %v1007_v57  ;;  %1055 = vst [vmem:[#allocation2 + $0xc8] sm:$0xff] %v1023_v58  ;;  %v1901_v63 = vadd.f32 %v1900_v60, %v1899_v55  ;;  %v1949_v0 = vadd.f32 %v1948_v62, %v1947_v56  ;;  %v501_v55 = vld [vmem:[#allocation2 + $0xe8] sm:$0xff]  ;;  %v517_v57 = vld [vmem:[#allocation2 + $0x10] sm:$0xff] }
 0x13e   : > { %v1902_v1 = vpop.f32.mrf.mxu0  ;;  %v1950_v2 = vpop.f32.mrf.mxu1 }
 0x13f   : > { %v1008_v3 = vadd.f32 %v1901_v63, %v495_v59  ;;  %v1024_v4 = vadd.f32 %v1949_v0, %v511_v61 }
 0x140   : > { %v1903_v6 = vpop.f32.mrf.mxu0  ;;  %v1951_v8 = vpop.f32.mrf.mxu1 }
 0x141   : > { %1040 = vst [vmem:[#allocation2 + $0x50] sm:$0xff] %v1008_v3  ;;  %1056 = vst [vmem:[#allocation2 + $0xe0] sm:$0xff] %v1024_v4  ;;  %v1904_v9 = vadd.f32 %v1903_v6, %v1902_v1  ;;  %v1952_v10 = vadd.f32 %v1951_v8, %v1950_v2  ;;  %v502_v1 = vld [vmem:[#allocation2 + $0xb8] sm:$0xff]  ;;  %v518_v3 = vld [vmem:[#allocation2 + $0x28] sm:$0xff] }
 0x142   : > { %v1905_v11 = vpop.f32.mrf.mxu0  ;;  %v1953_v12 = vpop.f32.mrf.mxu1 }
 0x143   : > { %v1009_v13 = vadd.f32 %v1904_v9, %v496_v5  ;;  %v1025_v14 = vadd.f32 %v1952_v10, %v512_v7 }
 0x144   : > { %v1906_v16 = vpop.f32.mrf.mxu0  ;;  %v1954_v18 = vpop.f32.mrf.mxu1 }
 0x145   : > { %1041 = vst [vmem:[#allocation2 + $0x68] sm:$0xff] %v1009_v13  ;;  %1057 = vst [vmem:[#allocation2 + $0x90] sm:$0xff] %v1025_v14  ;;  %v1907_v19 = vadd.f32 %v1906_v16, %v1905_v11  ;;  %v1955_v20 = vadd.f32 %v1954_v18, %v1953_v12  ;;  %v503_v11 = vld [vmem:[#allocation2 + $0x60] sm:$0xff] }
 0x146   : > { %v1908_v21 = vpop.f32.mrf.mxu0  ;;  %v1956_v22 = vpop.f32.mrf.mxu1  ;;  %v519_v13 = vld [vmem:[#allocation2 + $0xa0] sm:$0xff] }
 0x147   : > { %v1010_v23 = vadd.f32 %v1907_v19, %v497_v15  ;;  %v1026_v24 = vadd.f32 %v1955_v20, %v513_v17 }
 0x148   : > { %v1909_v26 = vpop.f32.mrf.mxu0  ;;  %v1957_v28 = vpop.f32.mrf.mxu1 }
 0x149   : > { %1042 = vst [vmem:[#allocation2 + $0x30] sm:$0xff] %v1010_v23  ;;  %1058 = vst [vmem:[#allocation2 + $0x70] sm:$0xff] %v1026_v24  ;;  %v1910_v29 = vadd.f32 %v1909_v26, %v1908_v21  ;;  %v1958_v30 = vadd.f32 %v1957_v28, %v1956_v22  ;;  %v504_v21 = vld [vmem:[#allocation2 + $0xf0] sm:$0xff]  ;;  %v520_v23 = vld [vmem:[#allocation2 + $0xf8] sm:$0xff] }
 0x14a   : > { %v1911_v31 = vpop.f32.mrf.mxu0  ;;  %v1959_v32 = vpop.f32.mrf.mxu1 }
 0x14b   : > { %v1011_v33 = vadd.f32 %v1910_v29, %v498_v25  ;;  %v1027_v34 = vadd.f32 %v1958_v30, %v514_v27 }
 0x14c   : > { %v1912_v36 = vpop.f32.mrf.mxu0  ;;  %v1960_v38 = vpop.f32.mrf.mxu1 }
 0x14d   : > { %1043 = vst [vmem:[#allocation2 + $0x48] sm:$0xff] %v1011_v33  ;;  %1059 = vst [vmem:[#allocation2 + $0xc0] sm:$0xff] %v1027_v34  ;;  %v1913_v39 = vadd.f32 %v1912_v36, %v1911_v31  ;;  %v1961_v40 = vadd.f32 %v1960_v38, %v1959_v32  ;;  %v505_v31 = vld [vmem:[#allocation2 + $0x8] sm:$0xff]  ;;  %v521_v33 = vld [vmem:[#allocation2 + $0x20] sm:$0xff] }
 0x14e   : > { %v1914_v41 = vpop.f32.mrf.mxu0  ;;  %v1962_v42 = vpop.f32.mrf.mxu1 }
 0x14f   : > { %v1012_v43 = vadd.f32 %v1913_v39, %v499_v35  ;;  %v1028_v44 = vadd.f32 %v1961_v40, %v515_v37 }
 0x150   : > { %v1915_v46 = vpop.f32.mrf.mxu0  ;;  %v1963_v48 = vpop.f32.mrf.mxu1 }
 0x151   : > { %1044 = vst [vmem:[#allocation2 + $0x80] sm:$0xff] %v1012_v43  ;;  %1060 = vst [vmem:[#allocation2 + $0xa8] sm:$0xff] %v1028_v44  ;;  %v1916_v49 = vadd.f32 %v1915_v46, %v1914_v41  ;;  %v1964_v50 = vadd.f32 %v1963_v48, %v1962_v42  ;;  %v506_v41 = vld [vmem:[#allocation2 + $0x78] sm:$0xff] }
 0x152   : > { %v1917_v51 = vpop.f32.mrf.mxu0  ;;  %v1965_v52 = vpop.f32.mrf.mxu1  ;;  %v522_v43 = vld [vmem:[#allocation2 + $0x98] sm:$0xff] }
 0x153   : > { %v1013_v53 = vadd.f32 %v1916_v49, %v500_v45  ;;  %v1029_v54 = vadd.f32 %v1964_v50, %v516_v47 }
 0x154   : > { %v1918_v56 = vpop.f32.mrf.mxu0  ;;  %v1966_v58 = vpop.f32.mrf.mxu1 }
 0x155   : > { %1045 = vst [vmem:[#allocation2 + $0x88] sm:$0xff] %v1013_v53  ;;  %1061 = vst [vmem:[#allocation2 + $0xd0] sm:$0xff] %v1029_v54  ;;  %v1919_v59 = vadd.f32 %v1918_v56, %v1917_v51  ;;  %v1967_v60 = vadd.f32 %v1966_v58, %v1965_v52 }
 0x156   : > { %v1920_v61 = vpop.f32.mrf.mxu0  ;;  %v1968_v62 = vpop.f32.mrf.mxu1 }
 0x157   : > { %v1014_v63 = vadd.f32 %v1919_v59, %v501_v55  ;;  %v1030_v0 = vadd.f32 %v1967_v60, %v517_v57 }
 0x158   : > { %v1921_v2 = vpop.f32.mrf.mxu0  ;;  %v1969_v4 = vpop.f32.mrf.mxu1 }
 0x159   : > { %1046 = vst [vmem:[#allocation2 + $0xe8] sm:$0xff] %v1014_v63  ;;  %1062 = vst [vmem:[#allocation2 + $0x10] sm:$0xff] %v1030_v0  ;;  %v1922_v5 = vadd.f32 %v1921_v2, %v1920_v61  ;;  %v1970_v6 = vadd.f32 %v1969_v4, %v1968_v62 }
 0x15a   : > { %v1923_v7 = vpop.f32.mrf.mxu0  ;;  %v1971_v8 = vpop.f32.mrf.mxu1 }
 0x15b   : > { %v1015_v9 = vadd.f32 %v1922_v5, %v502_v1  ;;  %v1031_v10 = vadd.f32 %v1970_v6, %v518_v3 }
 0x15c   : > { %v1924_v12 = vpop.f32.mrf.mxu0  ;;  %v1972_v14 = vpop.f32.mrf.mxu1 }
 0x15d   : > { %1047 = vst [vmem:[#allocation2 + $0xb8] sm:$0xff] %v1015_v9  ;;  %1063 = vst [vmem:[#allocation2 + $0x28] sm:$0xff] %v1031_v10  ;;  %v1925_v15 = vadd.f32 %v1924_v12, %v1923_v7  ;;  %v1973_v16 = vadd.f32 %v1972_v14, %v1971_v8 }
 0x15e   : > { %v1926_v17 = vpop.f32.mrf.mxu0  ;;  %v1974_v18 = vpop.f32.mrf.mxu1 }
 0x15f   : > { %v1016_v19 = vadd.f32 %v1925_v15, %v503_v11  ;;  %v1032_v20 = vadd.f32 %v1973_v16, %v519_v13 }
 0x160   : > { %v1927_v22 = vpop.f32.mrf.mxu0  ;;  %v1975_v24 = vpop.f32.mrf.mxu1 }
 0x161   : > { %1048 = vst [vmem:[#allocation2 + $0x60] sm:$0xff] %v1016_v19  ;;  %1064 = vst [vmem:[#allocation2 + $0xa0] sm:$0xff] %v1032_v20  ;;  %v1928_v25 = vadd.f32 %v1927_v22, %v1926_v17  ;;  %v1976_v26 = vadd.f32 %v1975_v24, %v1974_v18 }
 0x162   : > { %v1929_v27 = vpop.f32.mrf.mxu0  ;;  %v1977_v28 = vpop.f32.mrf.mxu1 }
 0x163   : > { %v1017_v29 = vadd.f32 %v1928_v25, %v504_v21  ;;  %v1033_v30 = vadd.f32 %v1976_v26, %v520_v23 }
 0x164   : > { %v1930_v32 = vpop.f32.mrf.mxu0  ;;  %v1978_v34 = vpop.f32.mrf.mxu1 }
 0x165   : > { %1049 = vst [vmem:[#allocation2 + $0xf0] sm:$0xff] %v1017_v29  ;;  %1065 = vst [vmem:[#allocation2 + $0xf8] sm:$0xff] %v1033_v30  ;;  %v1931_v35 = vadd.f32 %v1930_v32, %v1929_v27  ;;  %v1979_v36 = vadd.f32 %v1978_v34, %v1977_v28 }
 0x166   : > { %v1932_v37 = vpop.f32.mrf.mxu0  ;;  %v1980_v38 = vpop.f32.mrf.mxu1 }
 0x167   : > { %v1018_v39 = vadd.f32 %v1931_v35, %v505_v31  ;;  %v1034_v40 = vadd.f32 %v1979_v36, %v521_v33 }
 0x168   : > { %v1933_v42 = vpop.f32.mrf.mxu0  ;;  %v1981_v44 = vpop.f32.mrf.mxu1 }
 0x169   : > { %1050 = vst [vmem:[#allocation2 + $0x8] sm:$0xff] %v1018_v39  ;;  %1066 = vst [vmem:[#allocation2 + $0x20] sm:$0xff] %v1034_v40  ;;  %v1934_v45 = vadd.f32 %v1933_v42, %v1932_v37  ;;  %v1982_v46 = vadd.f32 %v1981_v44, %v1980_v38  ;;  %1071 = sbr.rel (%p1849_p13) target bundleno = 865 (0x361), region = 90 }
 0x16b   : > { %v1019_v47 = vadd.f32 %v1934_v45, %v506_v41  ;;  %v1035_v48 = vadd.f32 %v1982_v46, %v522_v43 }
 0x16d   : > { %1051 = vst [vmem:[#allocation2 + $0x78] sm:$0xff] %v1019_v47  ;;  %1067 = vst [vmem:[#allocation2 + $0x98] sm:$0xff] %v1035_v48 }
 0x16e   : > { %v2264_v49 = vld [vmem:[%s2744_s2 + $0x38] sm:$0xff]   ;;  %v2265_v50 = vld [vmem:[%s2744_s2 + $0x30] sm:$0xff]   ;;  %v2266_v51 = vld [vmem:[%s2744_s2 + $0x28] sm:$0xff]  }
 0x16f   : > { %2031 = vmatprep.subr.bf16.mxu0 %v2264_v49  ;;  %v2267_v52 = vld [vmem:[%s2744_s2 + $0x20] sm:$0xff]   ;;  %v1072_v53 = vld [vmem:[#allocation2 + $0xb0] sm:$0xff]  ;;  %v2268_v56 = vld [vmem:[%s2744_s2 + $0x18] sm:$0xff]  }
 0x170   : > { %2032 = vmatpush3.bf16.msra.mxu0 %v2264_v49  ;;  %v1073_v54 = vld [vmem:[#allocation2] sm:$0xff]  ;;  %v2269_v57 = vld [vmem:[%s2744_s2 + $0x10] sm:$0xff]   ;;  %v2270_v58 = vld [vmem:[%s2744_s2 + $0x8] sm:$0xff]  }
 0x171   : > { %2033 = vmatprep.subr.bf16.mxu0 %v2265_v50  ;;  %v1104_v55 = vpack.c.bf16 %v1073_v54, %v1072_v53  ;;  %v2272_v59 = vld [vmem:[%s2746_s4 + $0x38] sm:$0xff]   ;;  %v2273_v60 = vld [vmem:[%s2746_s4 + $0x30] sm:$0xff]   ;;  %v2271_v61 = vld [vmem:[%s2744_s2] sm:$0xff]  }
 0x172   : > { %2079 = vmatprep.subr.bf16.mxu1 %v2272_v59  ;;  %v2274_v62 = vld [vmem:[%s2746_s4 + $0x28] sm:$0xff]   ;;  %v1074_v63 = vld [vmem:[#allocation2 + $0xd8] sm:$0xff]  ;;  %v2275_v1 = vld [vmem:[%s2746_s4 + $0x20] sm:$0xff]  }
 0x173   : > { %2047 = vmatprep.mubr.bf16.mxu0 %v1104_v55  ;;  %2080 = vmatpush3.bf16.msra.mxu1 %v2272_v59  ;;  %v1075_v0 = vld [vmem:[#allocation2 + $0x18] sm:$0xff]  ;;  %v1076_v2 = vld [vmem:[#allocation2 + $0x50] sm:$0xff]  ;;  %v1077_v3 = vld [vmem:[#allocation2 + $0x68] sm:$0xff] }
 0x174   : > { %2034 = vmatpush3.bf16.msra.mxu0 %v2265_v50  ;;  %2081 = vmatprep.subr.bf16.mxu1 %v2273_v60  ;;  %v1105_v4 = vpack.c.bf16 %v1075_v0, %v1074_v63  ;;  %v1106_v5 = vpack.c.bf16 %v1077_v3, %v1076_v2  ;;  %v2276_v6 = vld [vmem:[%s2746_s4 + $0x18] sm:$0xff]   ;;  %v1078_v7 = vld [vmem:[#allocation2 + $0x30] sm:$0xff]  ;;  %v1079_v8 = vld [vmem:[#allocation2 + $0x48] sm:$0xff] }
 0x175   : > { %2035 = vmatprep.subr.bf16.mxu0 %v2266_v51  ;;  %v1080_v9 = vld [vmem:[#allocation2 + $0x80] sm:$0xff]  ;;  %v1081_v10 = vld [vmem:[#allocation2 + $0x88] sm:$0xff]  ;;  %v1107_v11 = vpack.c.bf16 %v1079_v8, %v1078_v7  ;;  %v1083_v14 = vld [vmem:[#allocation2 + $0xb8] sm:$0xff] }
 0x176   : > { %v1108_v12 = vpack.c.bf16 %v1081_v10, %v1080_v9  ;;  %v1082_v13 = vld [vmem:[#allocation2 + $0xe8] sm:$0xff]  ;;  %v1084_v15 = vld [vmem:[#allocation2 + $0x60] sm:$0xff]  ;;  %v1085_v16 = vld [vmem:[#allocation2 + $0xf0] sm:$0xff] }
 0x177   : > { %2082 = vmatpush3.bf16.msra.mxu1 %v2273_v60  ;;  %v1109_v17 = vpack.c.bf16 %v1083_v14, %v1082_v13  ;;  %v1110_v18 = vpack.c.bf16 %v1085_v16, %v1084_v15  ;;  %v1086_v19 = vld [vmem:[#allocation2 + $0x8] sm:$0xff]  ;;  %v1087_v20 = vld [vmem:[#allocation2 + $0x78] sm:$0xff]  ;;  %v1090_v25 = vld [vmem:[#allocation2 + $0x40] sm:$0xff] }
 0x178   : > { %2036 = vmatpush3.bf16.msra.mxu0 %v2266_v51  ;;  %2083 = vmatprep.subr.bf16.mxu1 %v2274_v62  ;;  %v1088_v21 = vld [vmem:[#allocation2 + $0x38] sm:$0xff]  ;;  %v1111_v23 = vpack.c.bf16 %v1087_v20, %v1086_v19  ;;  %v1091_v26 = vld [vmem:[#allocation2 + $0xc8] sm:$0xff]  ;;  %v1092_v27 = vld [vmem:[#allocation2 + $0xe0] sm:$0xff] }
 0x179   : > { %2037 = vmatprep.subr.bf16.mxu0 %v2267_v52  ;;  %v1089_v22 = vld [vmem:[#allocation2 + $0x58] sm:$0xff]  ;;  %v1093_v28 = vld [vmem:[#allocation2 + $0x90] sm:$0xff]  ;;  %v1113_v29 = vpack.c.bf16 %v1091_v26, %v1090_v25  ;;  %v1095_v32 = vld [vmem:[#allocation2 + $0xc0] sm:$0xff] }
 0x17a   : > { %v1112_v24 = vpack.c.bf16 %v1089_v22, %v1088_v21  ;;  %v1114_v30 = vpack.c.bf16 %v1093_v28, %v1092_v27  ;;  %v1094_v31 = vld [vmem:[#allocation2 + $0x70] sm:$0xff]  ;;  %v1096_v33 = vld [vmem:[#allocation2 + $0xa8] sm:$0xff]  ;;  %v1100_v39 = vld [vmem:[#allocation2 + $0xa0] sm:$0xff] }
 0x17b   : > { %2084 = vmatpush3.bf16.msra.mxu1 %v2274_v62  ;;  %v1097_v34 = vld [vmem:[#allocation2 + $0xd0] sm:$0xff]  ;;  %v1115_v35 = vpack.c.bf16 %v1095_v32, %v1094_v31  ;;  %v1099_v38 = vld [vmem:[#allocation2 + $0x28] sm:$0xff]  ;;  %v1101_v40 = vld [vmem:[#allocation2 + $0xf8] sm:$0xff] }
 0x17c   : > { %2038 = vmatpush3.bf16.msra.mxu0 %v2267_v52  ;;  %2085 = vmatprep.subr.bf16.mxu1 %v2275_v1  ;;  %v1116_v36 = vpack.c.bf16 %v1097_v34, %v1096_v33  ;;  %v1098_v37 = vld [vmem:[#allocation2 + $0x10] sm:$0xff]  ;;  %v1118_v42 = vpack.c.bf16 %v1101_v40, %v1100_v39  ;;  %v1102_v43 = vld [vmem:[#allocation2 + $0x20] sm:$0xff]  ;;  %v1103_v44 = vld [vmem:[#allocation2 + $0x98] sm:$0xff] }
 0x17d   : > { %2039 = vmatprep.subr.bf16.mxu0 %v2268_v56  ;;  %v1117_v41 = vpack.c.bf16 %v1099_v38, %v1098_v37  ;;  %v1119_v45 = vpack.c.bf16 %v1103_v44, %v1102_v43  ;;  %v2277_v46 = vld [vmem:[%s2746_s4 + $0x10] sm:$0xff]   ;;  %v2278_v47 = vld [vmem:[%s2746_s4 + $0x8] sm:$0xff]   ;;  %v2279_v48 = vld [vmem:[%s2746_s4] sm:$0xff]  }
 0x17e   : > { %v2618_v51 = vld [vmem:[%s2745_s3] ss:$0 sm:$0xff] }
 0x17f   : > { %2086 = vmatpush3.bf16.msra.mxu1 %v2275_v1 }
 0x180   : > { %2040 = vmatpush3.bf16.msra.mxu0 %v2268_v56  ;;  %2087 = vmatprep.subr.bf16.mxu1 %v2276_v6 }
 0x181   : > { %2041 = vmatprep.subr.bf16.mxu0 %v2269_v57 }
 0x183   : > { %2088 = vmatpush3.bf16.msra.mxu1 %v2276_v6 }
 0x184   : > { %2042 = vmatpush3.bf16.msra.mxu0 %v2269_v57  ;;  %2089 = vmatprep.subr.bf16.mxu1 %v2277_v46 }
 0x185   : > { %2043 = vmatprep.subr.bf16.mxu0 %v2270_v58 }
 0x187   : > { %2090 = vmatpush3.bf16.msra.mxu1 %v2277_v46 }
 0x188   : > { %2044 = vmatpush3.bf16.msra.mxu0 %v2270_v58  ;;  %2091 = vmatprep.subr.bf16.mxu1 %v2278_v47 }
 0x189   : > { %2045 = vmatprep.subr.bf16.mxu0 %v2271_v61 }
 0x18b   : > { %2092 = vmatpush3.bf16.msra.mxu1 %v2278_v47 }
 0x18c   : > { %2046 = vmatpush3.bf16.msra.mxu0 %v2271_v61  ;;  %2093 = vmatprep.subr.bf16.mxu1 %v2279_v48 }
 0x18f   : > { %2048 = vmatmul.mubr.bf16.vlgmr.msra.gmra.mxu0 %v1105_v4  ;;  %2094 = vmatpush3.bf16.msra.mxu1 %v2279_v48 }
 0x190   : > { %2051 = vmatprep.mubr.bf16.mxu0 %v1106_v5 }
 0x197   : > { %2052 = vmatmul.mubr.bf16.gmra.mxu0 %v1107_v11 }
 0x198   : > { %2055 = vmatprep.mubr.bf16.mxu0 %v1108_v12 }
 0x19f   : > { %2056 = vmatmul.mubr.bf16.gmra.mxu0 %v1109_v17 }
 0x1a0   : > { %2059 = vmatprep.mubr.bf16.mxu0 %v1110_v18 }
 0x1a7   : > { %2060 = vmatmul.mubr.bf16.gmra.mxu0 %v1111_v23 }
 0x1a8   : > { %2063 = vmatprep.mubr.bf16.mxu0 %v1112_v24 }
 0x1af   : > { %2064 = vmatmul.mubr.bf16.gmra.mxu0 %v1113_v29 }
 0x1b0   : > { %2067 = vmatprep.mubr.bf16.mxu0 %v1114_v30 }
 0x1b7   : > { %2068 = vmatmul.mubr.bf16.gmra.mxu0 %v1115_v35 }
 0x1b8   : > { %2071 = vmatprep.mubr.bf16.mxu0 %v1116_v36 }
 0x1bf   : > { %2072 = vmatmul.mubr.bf16.gmra.mxu0 %v1117_v41 }
 0x1c0   : > { %2075 = vmatprep.mubr.bf16.mxu0 %v1118_v42 }
 0x1c7   : > { %2076 = vmatmul.mubr.bf16.gmra.mxu0 %v1119_v45 }
 0x24f   : > { %v2049_v49 = vpop.f32.mrf.mxu0 }
 0x250   : > { %v1234_v55 = vadd.f32 %v2049_v49, %v2618_v51 }
 0x251   : > { %v1225_v50 = vpop.f32.mrf.mxu0 }
 0x252   : > { %v1226_v53 = vadd.f32 %v2618_v51, %v1225_v50  ;;  %v1354_v62 = vmax.f32 %v1234_v55, 0.0 }
 0x253   : > { %v2050_v52 = vpop.f32.mrf.mxu0 }
 0x254   : > { %v1237_v54 = vadd.f32 %v2050_v52, %v2618_v51  ;;  %v1352_v60 = vmax.f32 %v1226_v53, 0.0 }
 0x255   : > { %v1228_v56 = vpop.f32.mrf.mxu0 }
 0x256   : > { %v1229_v57 = vadd.f32 %v2618_v51, %v1228_v56  ;;  %v1355_v58 = vmax.f32 %v1237_v54, 0.0 }
 0x257   : > { %v2053_v59 = vpop.f32.mrf.mxu0 }
 0x258   : > { %v1353_v61 = vmax.f32 %v1229_v57, 0.0  ;;  %v1385_v1 = vpack.c.bf16 %v1355_v58, %v1354_v62  ;;  %v1250_v5 = vadd.f32 %v2053_v59, %v2618_v51 }
 0x259   : > { %v1241_v63 = vpop.f32.mrf.mxu0 }
 0x25a   : > { %v1384_v0 = vpack.c.bf16 %v1353_v61, %v1352_v60  ;;  %v1242_v3 = vadd.f32 %v2618_v51, %v1241_v63  ;;  %v1358_v12 = vmax.f32 %v1250_v5, 0.0 }
 0x25b   : > { %v2054_v2 = vpop.f32.mrf.mxu0 }
 0x25c   : > { %v1253_v4 = vadd.f32 %v2054_v2, %v2618_v51  ;;  %2095 = vmatprep.mubr.bf16.mxu1 %v1384_v0  ;;  %v1356_v10 = vmax.f32 %v1242_v3, 0.0 }
 0x25d   : > { %v1244_v6 = vpop.f32.mrf.mxu0  ;;  %2096 = vmatmul.mubr.bf16.vlgmr.msra.gmra.mxu1 %v1385_v1 }
 0x25e   : > { %v1245_v7 = vadd.f32 %v2618_v51, %v1244_v6  ;;  %v1359_v8 = vmax.f32 %v1253_v4, 0.0 }
 0x25f   : > { %v2057_v9 = vpop.f32.mrf.mxu0 }
 0x260   : > { %v1357_v11 = vmax.f32 %v1245_v7, 0.0  ;;  %v1387_v15 = vpack.c.bf16 %v1359_v8, %v1358_v12  ;;  %v1266_v19 = vadd.f32 %v2057_v9, %v2618_v51 }
 0x261   : > { %v1257_v13 = vpop.f32.mrf.mxu0 }
 0x262   : > { %v1386_v14 = vpack.c.bf16 %v1357_v11, %v1356_v10  ;;  %v1258_v17 = vadd.f32 %v2618_v51, %v1257_v13  ;;  %v1362_v26 = vmax.f32 %v1266_v19, 0.0 }
 0x263   : > { %v2058_v16 = vpop.f32.mrf.mxu0 }
 0x264   : > { %v1269_v18 = vadd.f32 %v2058_v16, %v2618_v51  ;;  %2099 = vmatprep.mubr.bf16.mxu1 %v1386_v14  ;;  %v1360_v24 = vmax.f32 %v1258_v17, 0.0 }
 0x265   : > { %v1260_v20 = vpop.f32.mrf.mxu0  ;;  %2100 = vmatmul.mubr.bf16.gmra.mxu1 %v1387_v15 }
 0x266   : > { %v1261_v21 = vadd.f32 %v2618_v51, %v1260_v20  ;;  %v1363_v22 = vmax.f32 %v1269_v18, 0.0 }
 0x267   : > { %v2061_v23 = vpop.f32.mrf.mxu0 }
 0x268   : > { %v1361_v25 = vmax.f32 %v1261_v21, 0.0  ;;  %v1389_v29 = vpack.c.bf16 %v1363_v22, %v1362_v26  ;;  %v1282_v33 = vadd.f32 %v2061_v23, %v2618_v51 }
 0x269   : > { %v1273_v27 = vpop.f32.mrf.mxu0 }
 0x26a   : > { %v1388_v28 = vpack.c.bf16 %v1361_v25, %v1360_v24  ;;  %v1274_v31 = vadd.f32 %v2618_v51, %v1273_v27  ;;  %v1366_v40 = vmax.f32 %v1282_v33, 0.0 }
 0x26b   : > { %v2062_v30 = vpop.f32.mrf.mxu0 }
 0x26c   : > { %v1285_v32 = vadd.f32 %v2062_v30, %v2618_v51  ;;  %2103 = vmatprep.mubr.bf16.mxu1 %v1388_v28  ;;  %v1364_v38 = vmax.f32 %v1274_v31, 0.0 }
 0x26d   : > { %v1276_v34 = vpop.f32.mrf.mxu0  ;;  %2104 = vmatmul.mubr.bf16.gmra.mxu1 %v1389_v29 }
 0x26e   : > { %v1277_v35 = vadd.f32 %v2618_v51, %v1276_v34  ;;  %v1367_v36 = vmax.f32 %v1285_v32, 0.0 }
 0x26f   : > { %v2065_v37 = vpop.f32.mrf.mxu0 }
 0x270   : > { %v1365_v39 = vmax.f32 %v1277_v35, 0.0  ;;  %v1391_v43 = vpack.c.bf16 %v1367_v36, %v1366_v40  ;;  %v1298_v47 = vadd.f32 %v2065_v37, %v2618_v51  ;;  %v2655_v35 = vld [vmem:[%s2747_s5] ss:$0 sm:$0xff] }
 0x271   : > { %v1289_v41 = vpop.f32.mrf.mxu0 }
 0x272   : > { %v1390_v42 = vpack.c.bf16 %v1365_v39, %v1364_v38  ;;  %v1290_v45 = vadd.f32 %v2618_v51, %v1289_v41  ;;  %v1370_v55 = vmax.f32 %v1298_v47, 0.0 }
 0x273   : > { %v2066_v44 = vpop.f32.mrf.mxu0 }
 0x274   : > { %v1301_v46 = vadd.f32 %v2066_v44, %v2618_v51  ;;  %2107 = vmatprep.mubr.bf16.mxu1 %v1390_v42  ;;  %v1368_v53 = vmax.f32 %v1290_v45, 0.0 }
 0x275   : > { %v1292_v48 = vpop.f32.mrf.mxu0  ;;  %2108 = vmatmul.mubr.bf16.gmra.mxu1 %v1391_v43 }
 0x276   : > { %v1293_v49 = vadd.f32 %v2618_v51, %v1292_v48  ;;  %v1371_v50 = vmax.f32 %v1301_v46, 0.0 }
 0x277   : > { %v2069_v52 = vpop.f32.mrf.mxu0 }
 0x278   : > { %v1369_v54 = vmax.f32 %v1293_v49, 0.0  ;;  %v1393_v58 = vpack.c.bf16 %v1371_v50, %v1370_v55  ;;  %v1314_v62 = vadd.f32 %v2069_v52, %v2618_v51 }
 0x279   : > { %v1305_v56 = vpop.f32.mrf.mxu0 }
 0x27a   : > { %v1392_v57 = vpack.c.bf16 %v1369_v54, %v1368_v53  ;;  %v1306_v60 = vadd.f32 %v2618_v51, %v1305_v56  ;;  %v1374_v5 = vmax.f32 %v1314_v62, 0.0 }
 0x27b   : > { %v2070_v59 = vpop.f32.mrf.mxu0 }
 0x27c   : > { %v1317_v61 = vadd.f32 %v2070_v59, %v2618_v51  ;;  %2111 = vmatprep.mubr.bf16.mxu1 %v1392_v57  ;;  %v1372_v3 = vmax.f32 %v1306_v60, 0.0 }
 0x27d   : > { %v1308_v63 = vpop.f32.mrf.mxu0  ;;  %2112 = vmatmul.mubr.bf16.gmra.mxu1 %v1393_v58 }
 0x27e   : > { %v1309_v0 = vadd.f32 %v2618_v51, %v1308_v63  ;;  %v1375_v1 = vmax.f32 %v1317_v61, 0.0 }
 0x27f   : > { %v2073_v2 = vpop.f32.mrf.mxu0 }
 0x280   : > { %v1373_v4 = vmax.f32 %v1309_v0, 0.0  ;;  %v1395_v8 = vpack.c.bf16 %v1375_v1, %v1374_v5  ;;  %v1330_v12 = vadd.f32 %v2073_v2, %v2618_v51 }
 0x281   : > { %v1321_v6 = vpop.f32.mrf.mxu0 }
 0x282   : > { %v1394_v7 = vpack.c.bf16 %v1373_v4, %v1372_v3  ;;  %v1322_v10 = vadd.f32 %v2618_v51, %v1321_v6  ;;  %v1378_v19 = vmax.f32 %v1330_v12, 0.0 }
 0x283   : > { %v2074_v9 = vpop.f32.mrf.mxu0 }
 0x284   : > { %v1333_v11 = vadd.f32 %v2074_v9, %v2618_v51  ;;  %2115 = vmatprep.mubr.bf16.mxu1 %v1394_v7  ;;  %v1376_v17 = vmax.f32 %v1322_v10, 0.0 }
 0x285   : > { %v1324_v13 = vpop.f32.mrf.mxu0  ;;  %2116 = vmatmul.mubr.bf16.gmra.mxu1 %v1395_v8 }
 0x286   : > { %v1325_v14 = vadd.f32 %v2618_v51, %v1324_v13  ;;  %v1379_v15 = vmax.f32 %v1333_v11, 0.0 }
 0x287   : > { %v2077_v16 = vpop.f32.mrf.mxu0 }
 0x288   : > { %v1377_v18 = vmax.f32 %v1325_v14, 0.0  ;;  %v1397_v22 = vpack.c.bf16 %v1379_v15, %v1378_v19  ;;  %v1346_v26 = vadd.f32 %v2077_v16, %v2618_v51 }
 0x289   : > { %v1337_v20 = vpop.f32.mrf.mxu0 }
 0x28a   : > { %v1396_v21 = vpack.c.bf16 %v1377_v18, %v1376_v17  ;;  %v1338_v24 = vadd.f32 %v2618_v51, %v1337_v20  ;;  %v1382_v32 = vmax.f32 %v1346_v26, 0.0 }
 0x28b   : > { %v2078_v23 = vpop.f32.mrf.mxu0 }
 0x28c   : > { %v1349_v25 = vadd.f32 %v2078_v23, %v2618_v51  ;;  %2119 = vmatprep.mubr.bf16.mxu1 %v1396_v21  ;;  %v1380_v30 = vmax.f32 %v1338_v24, 0.0 }
 0x28d   : > { %v1340_v27 = vpop.f32.mrf.mxu0  ;;  %2120 = vmatmul.mubr.bf16.gmra.mxu1 %v1397_v22 }
 0x28e   : > { %v1341_v28 = vadd.f32 %v2618_v51, %v1340_v27  ;;  %v1383_v29 = vmax.f32 %v1349_v25, 0.0 }
 0x290   : > { %v1381_v31 = vmax.f32 %v1341_v28, 0.0  ;;  %v1399_v34 = vpack.c.bf16 %v1383_v29, %v1382_v32 }
 0x292   : > { %v1398_v33 = vpack.c.bf16 %v1381_v31, %v1380_v30 }
 0x294   : > { %2123 = vmatprep.mubr.bf16.mxu1 %v1398_v33 }
 0x295   : > { %2124 = vmatmul.mubr.bf16.gmra.mxu1 %v1399_v34 }
 0x31d   : > { %v2097_v36 = vpop.f32.mrf.mxu1 }
 0x31e   : > { %v1514_v37 = vadd.f32 %v2097_v36, %v2655_v35 }
 0x31f   : > { %v1505_v51 = vpop.f32.mrf.mxu1 }
 0x320   : > { %v1634_v38 = vmax.f32 %v1514_v37, 0.0  ;;  %v1506_v39 = vadd.f32 %v2655_v35, %v1505_v51 }
 0x321   : > { %v2098_v40 = vpop.f32.mrf.mxu1 }
 0x322   : > { %1666 = vst [vmem:[%s2513_s18 + $0x10] sm:$0xff] %v1634_v38  ;;  %v1632_v41 = vmax.f32 %v1506_v39, 0.0  ;;  %v1517_v42 = vadd.f32 %v2098_v40, %v2655_v35 }
 0x323   : > { %v1508_v43 = vpop.f32.mrf.mxu1 }
 0x324   : > { %1664 = vst [vmem:[%s2513_s18] sm:$0xff] %v1632_v41  ;;  %v1635_v44 = vmax.f32 %v1517_v42, 0.0  ;;  %v1509_v45 = vadd.f32 %v2655_v35, %v1508_v43 }
 0x325   : > { %v2101_v46 = vpop.f32.mrf.mxu1 }
 0x326   : > { %1667 = vst [vmem:[%s2513_s18 + $0x18] sm:$0xff] %v1635_v44  ;;  %v1633_v47 = vmax.f32 %v1509_v45, 0.0  ;;  %v1530_v48 = vadd.f32 %v2101_v46, %v2655_v35 }
 0x327   : > { %v1521_v49 = vpop.f32.mrf.mxu1 }
 0x328   : > { %1665 = vst [vmem:[%s2513_s18 + $0x8] sm:$0xff] %v1633_v47  ;;  %v1638_v50 = vmax.f32 %v1530_v48, 0.0  ;;  %v1522_v52 = vadd.f32 %v2655_v35, %v1521_v49 }
 0x329   : > { %v2102_v53 = vpop.f32.mrf.mxu1 }
 0x32a   : > { %1670 = vst [vmem:[%s2513_s18 + $0x30] sm:$0xff] %v1638_v50  ;;  %v1636_v54 = vmax.f32 %v1522_v52, 0.0  ;;  %v1533_v55 = vadd.f32 %v2102_v53, %v2655_v35 }
 0x32b   : > { %v1524_v56 = vpop.f32.mrf.mxu1 }
 0x32c   : > { %1668 = vst [vmem:[%s2513_s18 + $0x20] sm:$0xff] %v1636_v54  ;;  %v1639_v57 = vmax.f32 %v1533_v55, 0.0  ;;  %v1525_v58 = vadd.f32 %v2655_v35, %v1524_v56 }
 0x32d   : > { %v2105_v59 = vpop.f32.mrf.mxu1 }
 0x32e   : > { %1671 = vst [vmem:[%s2513_s18 + $0x38] sm:$0xff] %v1639_v57  ;;  %v1637_v60 = vmax.f32 %v1525_v58, 0.0  ;;  %v1546_v61 = vadd.f32 %v2105_v59, %v2655_v35 }
 0x32f   : > { %v1537_v62 = vpop.f32.mrf.mxu1 }
 0x330   : > { %1669 = vst [vmem:[%s2513_s18 + $0x28] sm:$0xff] %v1637_v60  ;;  %v1642_v63 = vmax.f32 %v1546_v61, 0.0  ;;  %v1538_v0 = vadd.f32 %v2655_v35, %v1537_v62 }
 0x331   : > { %v2106_v1 = vpop.f32.mrf.mxu1 }
 0x332   : > { %1674 = vst [vmem:[%s2513_s18 + $0x50] sm:$0xff] %v1642_v63  ;;  %v1640_v2 = vmax.f32 %v1538_v0, 0.0  ;;  %v1549_v3 = vadd.f32 %v2106_v1, %v2655_v35 }
 0x333   : > { %v1540_v4 = vpop.f32.mrf.mxu1 }
 0x334   : > { %1672 = vst [vmem:[%s2513_s18 + $0x40] sm:$0xff] %v1640_v2  ;;  %v1643_v5 = vmax.f32 %v1549_v3, 0.0  ;;  %v1541_v6 = vadd.f32 %v2655_v35, %v1540_v4 }
 0x335   : > { %v2109_v7 = vpop.f32.mrf.mxu1 }
 0x336   : > { %1675 = vst [vmem:[%s2513_s18 + $0x58] sm:$0xff] %v1643_v5  ;;  %v1641_v8 = vmax.f32 %v1541_v6, 0.0  ;;  %v1562_v9 = vadd.f32 %v2109_v7, %v2655_v35 }
 0x337   : > { %v1553_v10 = vpop.f32.mrf.mxu1 }
 0x338   : > { %1673 = vst [vmem:[%s2513_s18 + $0x48] sm:$0xff] %v1641_v8  ;;  %v1646_v11 = vmax.f32 %v1562_v9, 0.0  ;;  %v1554_v12 = vadd.f32 %v2655_v35, %v1553_v10 }
 0x339   : > { %v2110_v13 = vpop.f32.mrf.mxu1 }
 0x33a   : > { %1678 = vst [vmem:[%s2513_s18 + $0x70] sm:$0xff] %v1646_v11  ;;  %v1644_v14 = vmax.f32 %v1554_v12, 0.0  ;;  %v1565_v15 = vadd.f32 %v2110_v13, %v2655_v35 }
 0x33b   : > { %v1556_v16 = vpop.f32.mrf.mxu1 }
 0x33c   : > { %1676 = vst [vmem:[%s2513_s18 + $0x60] sm:$0xff] %v1644_v14  ;;  %v1647_v17 = vmax.f32 %v1565_v15, 0.0  ;;  %v1557_v18 = vadd.f32 %v2655_v35, %v1556_v16 }
 0x33d   : > { %v2113_v19 = vpop.f32.mrf.mxu1 }
 0x33e   : > { %1679 = vst [vmem:[%s2513_s18 + $0x78] sm:$0xff] %v1647_v17  ;;  %v1645_v20 = vmax.f32 %v1557_v18, 0.0  ;;  %v1578_v21 = vadd.f32 %v2113_v19, %v2655_v35 }
 0x33f   : > { %v1569_v22 = vpop.f32.mrf.mxu1 }
 0x340   : > { %1677 = vst [vmem:[%s2513_s18 + $0x68] sm:$0xff] %v1645_v20  ;;  %v1650_v23 = vmax.f32 %v1578_v21, 0.0  ;;  %v1570_v24 = vadd.f32 %v2655_v35, %v1569_v22 }
 0x341   : > { %v2114_v25 = vpop.f32.mrf.mxu1 }
 0x342   : > { %1682 = vst [vmem:[%s2513_s18 + $0x90] sm:$0xff] %v1650_v23  ;;  %v1648_v26 = vmax.f32 %v1570_v24, 0.0  ;;  %v1581_v27 = vadd.f32 %v2114_v25, %v2655_v35 }
 0x343   : > { %v1572_v28 = vpop.f32.mrf.mxu1 }
 0x344   : > { %1680 = vst [vmem:[%s2513_s18 + $0x80] sm:$0xff] %v1648_v26  ;;  %v1651_v29 = vmax.f32 %v1581_v27, 0.0  ;;  %v1573_v30 = vadd.f32 %v2655_v35, %v1572_v28 }
 0x345   : > { %v2117_v31 = vpop.f32.mrf.mxu1 }
 0x346   : > { %1683 = vst [vmem:[%s2513_s18 + $0x98] sm:$0xff] %v1651_v29  ;;  %v1649_v32 = vmax.f32 %v1573_v30, 0.0  ;;  %v1594_v33 = vadd.f32 %v2117_v31, %v2655_v35 }
 0x347   : > { %v1585_v34 = vpop.f32.mrf.mxu1 }
 0x348   : > { %1681 = vst [vmem:[%s2513_s18 + $0x88] sm:$0xff] %v1649_v32  ;;  %v1654_v36 = vmax.f32 %v1594_v33, 0.0  ;;  %v1586_v37 = vadd.f32 %v2655_v35, %v1585_v34 }
 0x349   : > { %v2118_v51 = vpop.f32.mrf.mxu1 }
 0x34a   : > { %1686 = vst [vmem:[%s2513_s18 + $0xb0] sm:$0xff] %v1654_v36  ;;  %v1652_v38 = vmax.f32 %v1586_v37, 0.0  ;;  %v1597_v39 = vadd.f32 %v2118_v51, %v2655_v35 }
 0x34b   : > { %v1588_v40 = vpop.f32.mrf.mxu1 }
 0x34c   : > { %1684 = vst [vmem:[%s2513_s18 + $0xa0] sm:$0xff] %v1652_v38  ;;  %v1655_v41 = vmax.f32 %v1597_v39, 0.0  ;;  %v1589_v42 = vadd.f32 %v2655_v35, %v1588_v40 }
 0x34d   : > { %v2121_v43 = vpop.f32.mrf.mxu1 }
 0x34e   : > { %1687 = vst [vmem:[%s2513_s18 + $0xb8] sm:$0xff] %v1655_v41  ;;  %v1653_v44 = vmax.f32 %v1589_v42, 0.0  ;;  %v1610_v45 = vadd.f32 %v2121_v43, %v2655_v35 }
 0x34f   : > { %v1601_v46 = vpop.f32.mrf.mxu1 }
 0x350   : > { %1685 = vst [vmem:[%s2513_s18 + $0xa8] sm:$0xff] %v1653_v44  ;;  %v1658_v47 = vmax.f32 %v1610_v45, 0.0  ;;  %v1602_v48 = vadd.f32 %v2655_v35, %v1601_v46 }
 0x351   : > { %v2122_v49 = vpop.f32.mrf.mxu1 }
 0x352   : > { %1690 = vst [vmem:[%s2513_s18 + $0xd0] sm:$0xff] %v1658_v47  ;;  %v1656_v50 = vmax.f32 %v1602_v48, 0.0  ;;  %v1613_v52 = vadd.f32 %v2122_v49, %v2655_v35 }
 0x353   : > { %v1604_v53 = vpop.f32.mrf.mxu1 }
 0x354   : > { %1688 = vst [vmem:[%s2513_s18 + $0xc0] sm:$0xff] %v1656_v50  ;;  %v1659_v54 = vmax.f32 %v1613_v52, 0.0  ;;  %v1605_v55 = vadd.f32 %v2655_v35, %v1604_v53 }
 0x355   : > { %v2125_v56 = vpop.f32.mrf.mxu1 }
 0x356   : > { %1691 = vst [vmem:[%s2513_s18 + $0xd8] sm:$0xff] %v1659_v54  ;;  %v1657_v57 = vmax.f32 %v1605_v55, 0.0  ;;  %v1626_v58 = vadd.f32 %v2125_v56, %v2655_v35 }
 0x357   : > { %v1617_v59 = vpop.f32.mrf.mxu1 }
 0x358   : > { %1689 = vst [vmem:[%s2513_s18 + $0xc8] sm:$0xff] %v1657_v57  ;;  %v1662_v60 = vmax.f32 %v1626_v58, 0.0  ;;  %v1618_v61 = vadd.f32 %v2655_v35, %v1617_v59 }
 0x359   : > { %v2126_v62 = vpop.f32.mrf.mxu1 }
 0x35a   : > { %1694 = vst [vmem:[%s2513_s18 + $0xf0] sm:$0xff] %v1662_v60  ;;  %v1660_v63 = vmax.f32 %v1618_v61, 0.0  ;;  %v1629_v0 = vadd.f32 %v2126_v62, %v2655_v35 }
 0x35b   : > { %v1620_v1 = vpop.f32.mrf.mxu1 }
 0x35c   : > { %1692 = vst [vmem:[%s2513_s18 + $0xe0] sm:$0xff] %v1660_v63  ;;  %v1663_v2 = vmax.f32 %v1629_v0, 0.0  ;;  %v1621_v3 = vadd.f32 %v2655_v35, %v1620_v1 }
 0x35e   : > { %1695 = vst [vmem:[%s2513_s18 + $0xf8] sm:$0xff] %v1663_v2  ;;  %v1661_v4 = vmax.f32 %v1621_v3, 0.0 }
 0x360   : > { %1693 = vst [vmem:[%s2513_s18 + $0xe8] sm:$0xff] %v1661_v4 }
 0x361 PF: > { %s16_s27 = sadd.s32 1, %s2334_s27   ;;  %s2749_s21 = smov %s2314_s22 }
 0x362   : > { %p13_p0 = scmp.ge.s32.totalorder %s16_s27, 6   ;;  %s2750_s22 = smov %s2423_s10 }
 0x363   : > { %s2751_s23 = smov %s2326_s25  ;;  %s2752_s24 = smov %s2330_s26 }
 0x364   : > { %s2753_s25 = smov %s2756_s28  ;;  %s2754_s26 = smov %s2760_s29 }
 0x365   :  { %15 = sbr.rel (!%p13_p0) target bundleno = 4 (0x4), region = 128 }

</bundles_post_ra>
